<compile_context>
chip_gen: v6e
topology: v6e:2x2x1
jax: 0.10.0
libtpu: 0.0.40
codegen_flags: <defaults>
</compile_context>

<pallas_src>
import jax
import jax.numpy as jnp
from jax.experimental import pallas as pl
from jax.experimental.pallas import tpu as pltpu

d_model = 512
d_ff = 2048
FF_CHUNK = 512          # d_ff handled in 4 chunks of 512 inside the kernel
LN_EPS = 1e-5


def _ffn_kernel(x_ref, w1_ref, b1_ref, w2_ref, b2_ref, o_ref):
    # x_ref: (TM, d_model) f32 token tile; w1/w2 are bf16, fully VMEM-resident.
    x = x_ref[...]                            # f32, kept exact for the residual
    x_bf = x.astype(jnp.bfloat16)

    # Two kernel_size=1 convs == two per-token GEMMs.  Chunk d_ff so the full
    # (TM, 2048) f32 hidden never exists: per chunk, compute h_c = relu(x@W1_c+b1_c)
    # and immediately fold it into y via the second GEMM.  Static 4-iter loop;
    # all ref slices are 512-wide / 512-tall (lane/sublane-tile aligned).
    y = None
    for c in range(d_ff // FF_CHUNK):
        lo = c * FF_CHUNK
        h = jnp.dot(x_bf, w1_ref[:, lo:lo + FF_CHUNK],
                    preferred_element_type=jnp.float32)
        h = jnp.maximum(h + b1_ref[:, lo:lo + FF_CHUNK], 0.0)
        part = jnp.dot(h.astype(jnp.bfloat16), w2_ref[lo:lo + FF_CHUNK, :],
                       preferred_element_type=jnp.float32)
        y = part if y is None else y + part

    # Residual + LayerNorm over the feature axis (gamma=1, beta=0), fused
    # single pass: sum and sum-of-squares, clamped variance, EUP rsqrt.
    z = y + b2_ref[...] + x
    inv_d = jnp.float32(1.0 / d_model)
    mean = jnp.sum(z, axis=-1, keepdims=True) * inv_d
    mean_sq = jnp.sum(z * z, axis=-1, keepdims=True) * inv_d
    var = jnp.maximum(mean_sq - mean * mean, 0.0)   # guard against cancellation
    o_ref[...] = ((z - mean) * jax.lax.rsqrt(var + LN_EPS)).astype(o_ref.dtype)


def _round_up(a: int, b: int) -> int:
    return (a + b - 1) // b * b


def _choose_tm(n_tok: int) -> int:
    """Adaptive token tile: <=512 rows, >=8-aligned, keeps >=2 grid steps."""
    tm = min(512, _round_up(n_tok, 8))
    # Keep at least 2 grid steps when there is enough work so the "parallel"
    # axis can be sharded across v7x's two TensorCores.
    if n_tok >= 512 and pl.cdiv(n_tok, tm) < 2:
        tm = _round_up(pl.cdiv(n_tok, 2), 8)
    return tm


@jax.jit
def poswise_ffn(x, w1, b1, w2, b2):
    """x: [B, S, d_model] float32.  w1: [d_model, d_ff], w2: [d_ff, d_model]."""
    B, S, D = x.shape
    assert D == d_model
    n_tok = B * S
    tm = _choose_tm(n_tok)

    # No padding: grid is cdiv(n_tok, tm) over the raw array; the ragged last
    # block is handled by Pallas masking (all kernel ops are row-wise).
    x2d = x.reshape(n_tok, D).astype(jnp.float32)
    w1_bf = w1.astype(jnp.bfloat16)
    w2_bf = w2.astype(jnp.bfloat16)
    b1_2d = b1.reshape(1, d_ff).astype(jnp.float32)
    b2_2d = b2.reshape(1, d_model).astype(jnp.float32)

    flops = 2 * n_tok * d_model * d_ff * 2          # two GEMMs
    bytes_accessed = (
        2 * n_tok * d_model * 4                     # x in + out (f32)
        + 2 * (d_model * d_ff) * 2                  # bf16 weights (read once)
        + (d_ff + d_model) * 4                      # biases
    )

    out2d = pl.pallas_call(
        _ffn_kernel,
        out_shape=jax.ShapeDtypeStruct((n_tok, D), x.dtype),
        grid_spec=pltpu.PrefetchScalarGridSpec(
            num_scalar_prefetch=0,
            grid=(pl.cdiv(n_tok, tm),),
            in_specs=[
                pl.BlockSpec((tm, D), lambda i: (i, 0)),      # token tile
                pl.BlockSpec((D, d_ff), lambda i: (0, 0)),    # W1 (resident, bf16)
                pl.BlockSpec((1, d_ff), lambda i: (0, 0)),    # b1
                pl.BlockSpec((d_ff, D), lambda i: (0, 0)),    # W2 (resident, bf16)
                pl.BlockSpec((1, D), lambda i: (0, 0)),       # b2
            ],
            out_specs=pl.BlockSpec((tm, D), lambda i: (i, 0)),
        ),
        compiler_params=pltpu.CompilerParams(
            dimension_semantics=("parallel",),
            vmem_limit_bytes=40 << 20,               # fits v7x's 64 MiB/TC
        ),
        cost_estimate=pl.CostEstimate(
            flops=flops, transcendentals=n_tok, bytes_accessed=bytes_accessed),
    )(x2d, w1_bf, b1_2d, w2_bf, b2_2d)

    return out2d.reshape(B, S, D)


if __name__ == "__main__":
    key = jax.random.PRNGKey(0)
    k_x, k_w1, k_b1, k_w2, k_b2 = jax.random.split(key, 5)

    # Deterministic parameters (conv weights stored transposed as [in, out]).
    w1 = jax.random.normal(k_w1, (d_model, d_ff), dtype=jnp.float32) * 0.02
    b1 = jax.random.normal(k_b1, (d_ff,), dtype=jnp.float32) * 0.02
    w2 = jax.random.normal(k_w2, (d_ff, d_model), dtype=jnp.float32) * 0.02
    b2 = jax.random.normal(k_b2, (d_model,), dtype=jnp.float32) * 0.02

    def reference(x):
        # Pure-f32 JAX reference of the same math (kernel uses bf16 matmul
        # inputs with f32 accumulation, hence the loose tolerance below).
        h = jnp.maximum(x @ w1 + b1, 0.0)
        y = h @ w2 + b2 + x
        mean = y.mean(-1, keepdims=True)
        var = ((y - mean) ** 2).mean(-1, keepdims=True)
        return (y - mean) / jnp.sqrt(var + LN_EPS)

    # Case 1: small spec-consistent shape (batch=2, seq=8).
    x1 = jax.random.normal(k_x, (2, 8, d_model), dtype=jnp.float32)
    out1 = jax.block_until_ready(poswise_ffn(x1, w1, b1, w2, b2))
    ref1 = reference(x1)
    assert out1.shape == ref1.shape
    assert jnp.allclose(out1, ref1, atol=2e-2, rtol=2e-2), float(
        jnp.max(jnp.abs(out1 - ref1)))

    # Case 2: ragged token count (3*200 = 600 tokens -> tm=512, grid=2 with a
    # masked last block) to exercise the no-pad / masked-store path.
    x2 = jax.random.normal(k_x, (3, 200, d_model), dtype=jnp.float32)
    out2 = jax.block_until_ready(poswise_ffn(x2, w1, b1, w2, b2))
    ref2 = reference(x2)
    assert out2.shape == ref2.shape
    assert jnp.allclose(out2, ref2, atol=2e-2, rtol=2e-2), float(
        jnp.max(jnp.abs(out2 - ref2)))

    print("KERNEL_OK")
</pallas_src>

<mosaic_0001>
module attributes {stable_mosaic.version = 11 : i64} {
  func.func @_ffn_kernel(%arg0: i32, %arg1: memref<16x512xf32, #tpu.memory_space<vmem>>, %arg2: memref<512x2048xbf16, #tpu.memory_space<vmem>>, %arg3: memref<1x2048xf32, #tpu.memory_space<vmem>>, %arg4: memref<2048x512xbf16, #tpu.memory_space<vmem>>, %arg5: memref<1x512xf32, #tpu.memory_space<vmem>>, %arg6: memref<16x512xf32, #tpu.memory_space<vmem>>) attributes {dimension_semantics = [#tpu.dimension_semantics<parallel>], iteration_bounds = array<i64: 1>, scalar_prefetch = 0 : i64, scratch_operands = 0 : i64, tpu.core_type = #tpu.core_type<tc>, window_params = [{transform_indices = @transform_0, window_bounds = array<i64: 16, 512>}, {pipeline_mode = #tpu.pipeline_mode<synchronous>, transform_indices = @transform_1, window_bounds = array<i64: 512, 2048>}, {pipeline_mode = #tpu.pipeline_mode<synchronous>, transform_indices = @transform_2, window_bounds = array<i64: 1, 2048>}, {pipeline_mode = #tpu.pipeline_mode<synchronous>, transform_indices = @transform_3, window_bounds = array<i64: 2048, 512>}, {pipeline_mode = #tpu.pipeline_mode<synchronous>, transform_indices = @transform_4, window_bounds = array<i64: 1, 512>}, {transform_indices = @transform_5, window_bounds = array<i64: 16, 512>}]} {
    %c0 = arith.constant 0 : index
    %c0_0 = arith.constant 0 : index
    %0 = vector.load %arg1[%c0, %c0_0] : memref<16x512xf32, #tpu.memory_space<vmem>>, vector<16x512xf32>
    %1 = arith.truncf %0 : vector<16x512xf32> to vector<16x512xbf16>
    %c0_1 = arith.constant 0 : index
    %c0_2 = arith.constant 0 : index
    %2 = vector.load %arg2[%c0_1, %c0_2] : memref<512x2048xbf16, #tpu.memory_space<vmem>>, vector<512x512xbf16>
    %cst = arith.constant dense<0.000000e+00> : vector<16x512xf32>
    %3 = tpu.matmul %1, %2, %cst {dimension_numbers = #tpu.dot_dimension_numbers<[1], [0], [0], [1], [0, 0, 1, 1], [], []>} : vector<16x512xbf16>, vector<512x512xbf16>, vector<16x512xf32> -> vector<16x512xf32>
    %c0_3 = arith.constant 0 : index
    %c0_4 = arith.constant 0 : index
    %4 = vector.load %arg3[%c0_3, %c0_4] : memref<1x2048xf32, #tpu.memory_space<vmem>>, vector<1x512xf32>
    %5 = vector.broadcast %4 : vector<1x512xf32> to vector<16x512xf32>
    %6 = arith.addf %3, %5 : vector<16x512xf32>
    %cst_5 = arith.constant 0.000000e+00 : f32
    %7 = vector.broadcast %cst_5 : f32 to vector<16x512xf32>
    %8 = arith.maximumf %6, %7 : vector<16x512xf32>
    %9 = arith.truncf %8 : vector<16x512xf32> to vector<16x512xbf16>
    %c0_6 = arith.constant 0 : index
    %c0_7 = arith.constant 0 : index
    %10 = vector.load %arg4[%c0_6, %c0_7] : memref<2048x512xbf16, #tpu.memory_space<vmem>>, vector<512x512xbf16>
    %cst_8 = arith.constant dense<0.000000e+00> : vector<16x512xf32>
    %11 = tpu.matmul %9, %10, %cst_8 {dimension_numbers = #tpu.dot_dimension_numbers<[1], [0], [0], [1], [0, 0, 1, 1], [], []>} : vector<16x512xbf16>, vector<512x512xbf16>, vector<16x512xf32> -> vector<16x512xf32>
    %c0_9 = arith.constant 0 : index
    %c512 = arith.constant 512 : index
    %12 = vector.load %arg2[%c0_9, %c512] : memref<512x2048xbf16, #tpu.memory_space<vmem>>, vector<512x512xbf16>
    %cst_10 = arith.constant dense<0.000000e+00> : vector<16x512xf32>
    %13 = tpu.matmul %1, %12, %cst_10 {dimension_numbers = #tpu.dot_dimension_numbers<[1], [0], [0], [1], [0, 0, 1, 1], [], []>} : vector<16x512xbf16>, vector<512x512xbf16>, vector<16x512xf32> -> vector<16x512xf32>
    %c0_11 = arith.constant 0 : index
    %c512_12 = arith.constant 512 : index
    %14 = vector.load %arg3[%c0_11, %c512_12] : memref<1x2048xf32, #tpu.memory_space<vmem>>, vector<1x512xf32>
    %15 = vector.broadcast %14 : vector<1x512xf32> to vector<16x512xf32>
    %16 = arith.addf %13, %15 : vector<16x512xf32>
    %cst_13 = arith.constant 0.000000e+00 : f32
    %17 = vector.broadcast %cst_13 : f32 to vector<16x512xf32>
    %18 = arith.maximumf %16, %17 : vector<16x512xf32>
    %19 = arith.truncf %18 : vector<16x512xf32> to vector<16x512xbf16>
    %c512_14 = arith.constant 512 : index
    %c0_15 = arith.constant 0 : index
    %20 = vector.load %arg4[%c512_14, %c0_15] : memref<2048x512xbf16, #tpu.memory_space<vmem>>, vector<512x512xbf16>
    %cst_16 = arith.constant dense<0.000000e+00> : vector<16x512xf32>
    %21 = tpu.matmul %19, %20, %cst_16 {dimension_numbers = #tpu.dot_dimension_numbers<[1], [0], [0], [1], [0, 0, 1, 1], [], []>} : vector<16x512xbf16>, vector<512x512xbf16>, vector<16x512xf32> -> vector<16x512xf32>
    %22 = arith.addf %11, %21 : vector<16x512xf32>
    %c0_17 = arith.constant 0 : index
    %c1024 = arith.constant 1024 : index
    %23 = vector.load %arg2[%c0_17, %c1024] : memref<512x2048xbf16, #tpu.memory_space<vmem>>, vector<512x512xbf16>
    %cst_18 = arith.constant dense<0.000000e+00> : vector<16x512xf32>
    %24 = tpu.matmul %1, %23, %cst_18 {dimension_numbers = #tpu.dot_dimension_numbers<[1], [0], [0], [1], [0, 0, 1, 1], [], []>} : vector<16x512xbf16>, vector<512x512xbf16>, vector<16x512xf32> -> vector<16x512xf32>
    %c0_19 = arith.constant 0 : index
    %c1024_20 = arith.constant 1024 : index
    %25 = vector.load %arg3[%c0_19, %c1024_20] : memref<1x2048xf32, #tpu.memory_space<vmem>>, vector<1x512xf32>
    %26 = vector.broadcast %25 : vector<1x512xf32> to vector<16x512xf32>
    %27 = arith.addf %24, %26 : vector<16x512xf32>
    %cst_21 = arith.constant 0.000000e+00 : f32
    %28 = vector.broadcast %cst_21 : f32 to vector<16x512xf32>
    %29 = arith.maximumf %27, %28 : vector<16x512xf32>
    %30 = arith.truncf %29 : vector<16x512xf32> to vector<16x512xbf16>
    %c1024_22 = arith.constant 1024 : index
    %c0_23 = arith.constant 0 : index
    %31 = vector.load %arg4[%c1024_22, %c0_23] : memref<2048x512xbf16, #tpu.memory_space<vmem>>, vector<512x512xbf16>
    %cst_24 = arith.constant dense<0.000000e+00> : vector<16x512xf32>
    %32 = tpu.matmul %30, %31, %cst_24 {dimension_numbers = #tpu.dot_dimension_numbers<[1], [0], [0], [1], [0, 0, 1, 1], [], []>} : vector<16x512xbf16>, vector<512x512xbf16>, vector<16x512xf32> -> vector<16x512xf32>
    %33 = arith.addf %22, %32 : vector<16x512xf32>
    %c0_25 = arith.constant 0 : index
    %c1536 = arith.constant 1536 : index
    %34 = vector.load %arg2[%c0_25, %c1536] : memref<512x2048xbf16, #tpu.memory_space<vmem>>, vector<512x512xbf16>
    %cst_26 = arith.constant dense<0.000000e+00> : vector<16x512xf32>
    %35 = tpu.matmul %1, %34, %cst_26 {dimension_numbers = #tpu.dot_dimension_numbers<[1], [0], [0], [1], [0, 0, 1, 1], [], []>} : vector<16x512xbf16>, vector<512x512xbf16>, vector<16x512xf32> -> vector<16x512xf32>
    %c0_27 = arith.constant 0 : index
    %c1536_28 = arith.constant 1536 : index
    %36 = vector.load %arg3[%c0_27, %c1536_28] : memref<1x2048xf32, #tpu.memory_space<vmem>>, vector<1x512xf32>
    %37 = vector.broadcast %36 : vector<1x512xf32> to vector<16x512xf32>
    %38 = arith.addf %35, %37 : vector<16x512xf32>
    %cst_29 = arith.constant 0.000000e+00 : f32
    %39 = vector.broadcast %cst_29 : f32 to vector<16x512xf32>
    %40 = arith.maximumf %38, %39 : vector<16x512xf32>
    %41 = arith.truncf %40 : vector<16x512xf32> to vector<16x512xbf16>
    %c1536_30 = arith.constant 1536 : index
    %c0_31 = arith.constant 0 : index
    %42 = vector.load %arg4[%c1536_30, %c0_31] : memref<2048x512xbf16, #tpu.memory_space<vmem>>, vector<512x512xbf16>
    %cst_32 = arith.constant dense<0.000000e+00> : vector<16x512xf32>
    %43 = tpu.matmul %41, %42, %cst_32 {dimension_numbers = #tpu.dot_dimension_numbers<[1], [0], [0], [1], [0, 0, 1, 1], [], []>} : vector<16x512xbf16>, vector<512x512xbf16>, vector<16x512xf32> -> vector<16x512xf32>
    %44 = arith.addf %33, %43 : vector<16x512xf32>
    %c0_33 = arith.constant 0 : index
    %c0_34 = arith.constant 0 : index
    %45 = vector.load %arg5[%c0_33, %c0_34] : memref<1x512xf32, #tpu.memory_space<vmem>>, vector<1x512xf32>
    %46 = vector.broadcast %45 : vector<1x512xf32> to vector<16x512xf32>
    %47 = arith.addf %44, %46 : vector<16x512xf32>
    %48 = arith.addf %47, %0 : vector<16x512xf32>
    %cst_35 = arith.constant dense<0.000000e+00> : vector<16xf32>
    %49 = vector.multi_reduction <add>, %48, %cst_35 [1] : vector<16x512xf32> to vector<16xf32>
    %50 = vector.shape_cast %49 : vector<16xf32> to vector<16x1xf32>
    %cst_36 = arith.constant 0.001953125 : f32
    %51 = vector.broadcast %cst_36 : f32 to vector<16x1xf32>
    %52 = arith.mulf %50, %51 : vector<16x1xf32>
    %53 = arith.mulf %48, %48 : vector<16x512xf32>
    %cst_37 = arith.constant dense<0.000000e+00> : vector<16xf32>
    %54 = vector.multi_reduction <add>, %53, %cst_37 [1] : vector<16x512xf32> to vector<16xf32>
    %55 = vector.shape_cast %54 : vector<16xf32> to vector<16x1xf32>
    %cst_38 = arith.constant 0.001953125 : f32
    %56 = vector.broadcast %cst_38 : f32 to vector<16x1xf32>
    %57 = arith.mulf %55, %56 : vector<16x1xf32>
    %58 = arith.mulf %52, %52 : vector<16x1xf32>
    %59 = arith.subf %57, %58 : vector<16x1xf32>
    %cst_39 = arith.constant 0.000000e+00 : f32
    %60 = vector.broadcast %cst_39 : f32 to vector<16x1xf32>
    %61 = arith.maximumf %59, %60 : vector<16x1xf32>
    %62 = vector.broadcast %52 : vector<16x1xf32> to vector<16x512xf32>
    %63 = arith.subf %48, %62 : vector<16x512xf32>
    %cst_40 = arith.constant 9.99999974E-6 : f32
    %64 = vector.broadcast %cst_40 : f32 to vector<16x1xf32>
    %65 = arith.addf %61, %64 : vector<16x1xf32>
    %66 = math.rsqrt %65 : vector<16x1xf32>
    %67 = vector.broadcast %66 : vector<16x1xf32> to vector<16x512xf32>
    %68 = arith.mulf %63, %67 : vector<16x512xf32>
    %c0_41 = arith.constant 0 : index
    %c0_42 = arith.constant 0 : index
    %69 = vector.load %arg6[%c0_41, %c0_42] : memref<16x512xf32, #tpu.memory_space<vmem>>, vector<16x512xf32>
    tpu.vector_store %arg6[%c0_41, %c0_42], %68 {strides = array<i32>} : memref<16x512xf32, #tpu.memory_space<vmem>>, vector<16x512xf32>,
    return
  }
  func.func @transform_0(%arg0: i32) -> (i32, i32) {
    %c0_i32 = arith.constant 0 : i32
    %c0_i32_0 = arith.constant 0 : i32
    return %arg0, %c0_i32 : i32, i32
  }
  func.func @transform_1(%arg0: i32) -> (i32, i32) {
    %c0_i32 = arith.constant 0 : i32
    %c0_i32_0 = arith.constant 0 : i32
    %c0_i32_1 = arith.constant 0 : i32
    return %c0_i32, %c0_i32_0 : i32, i32
  }
  func.func @transform_2(%arg0: i32) -> (i32, i32) {
    %c0_i32 = arith.constant 0 : i32
    %c0_i32_0 = arith.constant 0 : i32
    %c0_i32_1 = arith.constant 0 : i32
    return %c0_i32, %c0_i32_0 : i32, i32
  }
  func.func @transform_3(%arg0: i32) -> (i32, i32) {
    %c0_i32 = arith.constant 0 : i32
    %c0_i32_0 = arith.constant 0 : i32
    %c0_i32_1 = arith.constant 0 : i32
    return %c0_i32, %c0_i32_0 : i32, i32
  }
  func.func @transform_4(%arg0: i32) -> (i32, i32) {
    %c0_i32 = arith.constant 0 : i32
    %c0_i32_0 = arith.constant 0 : i32
    %c0_i32_1 = arith.constant 0 : i32
    return %c0_i32, %c0_i32_0 : i32, i32
  }
  func.func @transform_5(%arg0: i32) -> (i32, i32) {
    %c0_i32 = arith.constant 0 : i32
    %c0_i32_0 = arith.constant 0 : i32
    return %arg0, %c0_i32 : i32, i32
  }
}

</mosaic_0001>

<bundles_post_ra>
// kernel: poswise_ffn.1
= control target key start
LH: loop header
LB: loop body
LE: loop exit
PB: predicated region body
PF: predicated region fallthrough
CT: control target
= control target key end

     0   :  { %s13083_s0 = inlined_call_operand.vmem [shape: f32[16,512], index: 0, kind: input, shape index: {}]   ;;  %s13084_s1 = inlined_call_operand.vmem [shape: bf16[512,2048], index: 1, kind: input, shape index: {}]   ;;  %s13085_s2 = inlined_call_operand.vmem [shape: f32[1,2048], index: 2, kind: input, shape index: {}]   ;;  %s13086_s3 = inlined_call_operand.vmem [shape: bf16[2048,512], index: 3, kind: input, shape index: {}]   ;;  %s13087_s4 = inlined_call_operand.vmem [shape: f32[1,512], index: 4, kind: input, shape index: {}]   ;;  %s13088_s5 = inlined_call_operand.hbm [shape: f32[16,512], index: 5, kind: output, shape index: {}]  }
   0x1   :  { %v61_v0 = vld [vmem:[%s13084_s1 + $0x380] sm:$0xff]  ;;  %v22_v54 = vld [vmem:[%s13083_s0 + $0x8] sm:$0xff]  ;;  %v24_v59 = vld [vmem:[%s13083_s0 + $0x18] sm:$0xff] }
   0x2   :  { %v63_v1 = vld [vmem:[%s13084_s1 + $0x3c0] sm:$0xff]  ;;  %v26_v55 = vld [vmem:[%s13083_s0 + $0x28] sm:$0xff]  ;;  %v28_v60 = vld [vmem:[%s13083_s0 + $0x38] sm:$0xff] }
   0x3   :  { %v125_v2 = vld [vmem:[%s13084_s1 + $0xb80] sm:$0xff]  ;;  %v7854_v3 = vcombine.high %v61_v0, %v63_v1  ;;  %v7853_v5 = vcombine.low %v61_v0, %v63_v1  ;;  %v9783_v58 = vpack.c.bf16 %v26_v55, %v22_v54  ;;  %v9797_v63 = vpack.c.bf16 %v28_v60, %v24_v59 }
   0x4   :  { %v127_v4 = vld [vmem:[%s13084_s1 + $0xbc0] sm:$0xff] }
   0x5   :  { %v57_v6 = vld [vmem:[%s13084_s1 + $0x300] sm:$0xff]  ;;  %v7918_v8 = vcombine.high %v125_v2, %v127_v4  ;;  %v7917_v9 = vcombine.low %v125_v2, %v127_v4  ;;  %823 = vmatprep.subr.bf16.mxu0 %v7854_v3  ;;  %855 = vmatprep.mubr.bf16.mxu0 %v9783_v58 }
   0x6   :  { %v59_v7 = vld [vmem:[%s13084_s1 + $0x340] sm:$0xff]  ;;  %824 = vmatpush1.bf16.msra.mxu0 %v7853_v5  ;;  %898 = vmatprep.mubr.bf16.mxu1 %v9797_v63 }
   0x7   :  { %v7850_v10 = vcombine.high %v57_v6, %v59_v7  ;;  %v121_v11 = vld [vmem:[%s13084_s1 + $0xb00] sm:$0xff]  ;;  %866 = vmatprep.subr.bf16.mxu1 %v7918_v8  ;;  %v7849_v18 = vcombine.low %v57_v6, %v59_v7 }
   0x8   :  { %v123_v12 = vld [vmem:[%s13084_s1 + $0xb40] sm:$0xff]  ;;  %867 = vmatpush1.bf16.msra.mxu1 %v7917_v9 }
   0x9   :  { %v53_v13 = vld [vmem:[%s13084_s1 + $0x280] sm:$0xff]  ;;  %v7914_v14 = vcombine.high %v121_v11, %v123_v12  ;;  %825 = vmatprep.subr.bf16.mxu0 %v7850_v10  ;;  %v7913_v19 = vcombine.low %v121_v11, %v123_v12 }
   0xa   :  { %v55_v15 = vld [vmem:[%s13084_s1 + $0x2c0] sm:$0xff]  ;;  %826 = vmatpush1.bf16.msra.mxu0 %v7849_v18 }
   0xb   :  { %v117_v16 = vld [vmem:[%s13084_s1 + $0xa80] sm:$0xff]  ;;  %v7846_v20 = vcombine.high %v53_v13, %v55_v15  ;;  %868 = vmatprep.subr.bf16.mxu1 %v7914_v14  ;;  %v7845_v26 = vcombine.low %v53_v13, %v55_v15 }
   0xc   :  { %v119_v17 = vld [vmem:[%s13084_s1 + $0xac0] sm:$0xff]  ;;  %869 = vmatpush1.bf16.msra.mxu1 %v7913_v19 }
   0xd   :  { %v7910_v21 = vcombine.high %v117_v16, %v119_v17  ;;  %v49_v22 = vld [vmem:[%s13084_s1 + $0x200] sm:$0xff]  ;;  %827 = vmatprep.subr.bf16.mxu0 %v7846_v20  ;;  %v7909_v27 = vcombine.low %v117_v16, %v119_v17 }
   0xe   :  { %v51_v23 = vld [vmem:[%s13084_s1 + $0x240] sm:$0xff]  ;;  %828 = vmatpush1.bf16.msra.mxu0 %v7845_v26 }
   0xf   :  { %v113_v24 = vld [vmem:[%s13084_s1 + $0xa00] sm:$0xff]  ;;  %v7842_v28 = vcombine.high %v49_v22, %v51_v23  ;;  %870 = vmatprep.subr.bf16.mxu1 %v7910_v21  ;;  %v7841_v34 = vcombine.low %v49_v22, %v51_v23 }
  0x10   :  { %v115_v25 = vld [vmem:[%s13084_s1 + $0xa40] sm:$0xff]  ;;  %871 = vmatpush1.bf16.msra.mxu1 %v7909_v27 }
  0x11   :  { %v7906_v29 = vcombine.high %v113_v24, %v115_v25  ;;  %v45_v30 = vld [vmem:[%s13084_s1 + $0x180] sm:$0xff]  ;;  %829 = vmatprep.subr.bf16.mxu0 %v7842_v28  ;;  %v7905_v35 = vcombine.low %v113_v24, %v115_v25 }
  0x12   :  { %v47_v31 = vld [vmem:[%s13084_s1 + $0x1c0] sm:$0xff]  ;;  %830 = vmatpush1.bf16.msra.mxu0 %v7841_v34 }
  0x13   :  { %v109_v32 = vld [vmem:[%s13084_s1 + $0x980] sm:$0xff]  ;;  %v7838_v36 = vcombine.high %v45_v30, %v47_v31  ;;  %872 = vmatprep.subr.bf16.mxu1 %v7906_v29  ;;  %v7837_v42 = vcombine.low %v45_v30, %v47_v31 }
  0x14   :  { %v111_v33 = vld [vmem:[%s13084_s1 + $0x9c0] sm:$0xff]  ;;  %873 = vmatpush1.bf16.msra.mxu1 %v7905_v35 }
  0x15   :  { %v7902_v37 = vcombine.high %v109_v32, %v111_v33  ;;  %v41_v38 = vld [vmem:[%s13084_s1 + $0x100] sm:$0xff]  ;;  %831 = vmatprep.subr.bf16.mxu0 %v7838_v36  ;;  %v7901_v43 = vcombine.low %v109_v32, %v111_v33 }
  0x16   :  { %v43_v39 = vld [vmem:[%s13084_s1 + $0x140] sm:$0xff]  ;;  %832 = vmatpush1.bf16.msra.mxu0 %v7837_v42 }
  0x17   :  { %v105_v40 = vld [vmem:[%s13084_s1 + $0x900] sm:$0xff]  ;;  %v7834_v44 = vcombine.high %v41_v38, %v43_v39  ;;  %874 = vmatprep.subr.bf16.mxu1 %v7902_v37  ;;  %v7833_v50 = vcombine.low %v41_v38, %v43_v39 }
  0x18   :  { %v107_v41 = vld [vmem:[%s13084_s1 + $0x940] sm:$0xff]  ;;  %875 = vmatpush1.bf16.msra.mxu1 %v7901_v43 }
  0x19   :  { %v7898_v45 = vcombine.high %v105_v40, %v107_v41  ;;  %v37_v46 = vld [vmem:[%s13084_s1 + $0x80] sm:$0xff]  ;;  %833 = vmatprep.subr.bf16.mxu0 %v7834_v44  ;;  %v7897_v51 = vcombine.low %v105_v40, %v107_v41 }
  0x1a   :  { %v39_v47 = vld [vmem:[%s13084_s1 + $0xc0] sm:$0xff]  ;;  %834 = vmatpush1.bf16.msra.mxu0 %v7833_v50 }
  0x1b   :  { %v101_v48 = vld [vmem:[%s13084_s1 + $0x880] sm:$0xff]  ;;  %v7830_v52 = vcombine.high %v37_v46, %v39_v47  ;;  %876 = vmatprep.subr.bf16.mxu1 %v7898_v45  ;;  %v7829_v0 = vcombine.low %v37_v46, %v39_v47 }
  0x1c   :  { %v103_v49 = vld [vmem:[%s13084_s1 + $0x8c0] sm:$0xff]  ;;  %877 = vmatpush1.bf16.msra.mxu1 %v7897_v51 }
  0x1d   :  { %v33_v53 = vld [vmem:[%s13084_s1] sm:$0xff]  ;;  %v7894_v56 = vcombine.high %v101_v48, %v103_v49  ;;  %835 = vmatprep.subr.bf16.mxu0 %v7830_v52  ;;  %v7893_v1 = vcombine.low %v101_v48, %v103_v49 }
  0x1e   :  { %v35_v57 = vld [vmem:[%s13084_s1 + $0x40] sm:$0xff]  ;;  %836 = vmatpush1.bf16.msra.mxu0 %v7829_v0 }
  0x1f   :  { %v97_v61 = vld [vmem:[%s13084_s1 + $0x800] sm:$0xff]  ;;  %v7826_v2 = vcombine.high %v33_v53, %v35_v57  ;;  %878 = vmatprep.subr.bf16.mxu1 %v7894_v56  ;;  %v7825_v8 = vcombine.low %v33_v53, %v35_v57 }
  0x20   :  { %v99_v62 = vld [vmem:[%s13084_s1 + $0x840] sm:$0xff]  ;;  %879 = vmatpush1.bf16.msra.mxu1 %v7893_v1 }
  0x21   :  { %v7890_v3 = vcombine.high %v97_v61, %v99_v62  ;;  %v93_v4 = vld [vmem:[%s13084_s1 + $0x780] sm:$0xff]  ;;  %837 = vmatprep.subr.bf16.mxu0 %v7826_v2  ;;  %v7889_v9 = vcombine.low %v97_v61, %v99_v62 }
  0x22   :  { %v95_v5 = vld [vmem:[%s13084_s1 + $0x7c0] sm:$0xff]  ;;  %838 = vmatpush1.bf16.msra.mxu0 %v7825_v8  ;;  %v126_v8 = vld [vmem:[%s13084_s1 + $0xb88] sm:$0xff] }
  0x23   :  { %v157_v6 = vld [vmem:[%s13084_s1 + $0xf80] sm:$0xff]  ;;  %v7886_v10 = vcombine.high %v93_v4, %v95_v5  ;;  %880 = vmatprep.subr.bf16.mxu1 %v7890_v3  ;;  %v7885_v16 = vcombine.low %v93_v4, %v95_v5 }
  0x24   :  { %v159_v7 = vld [vmem:[%s13084_s1 + $0xfc0] sm:$0xff]  ;;  %881 = vmatpush1.bf16.msra.mxu1 %v7889_v9  ;;  %v128_v9 = vld [vmem:[%s13084_s1 + $0xbc8] sm:$0xff] }
  0x25   :  { %v7950_v11 = vcombine.high %v157_v6, %v159_v7  ;;  %v89_v12 = vld [vmem:[%s13084_s1 + $0x700] sm:$0xff]  ;;  %839 = vmatprep.subr.bf16.mxu0 %v7886_v10  ;;  %v7949_v17 = vcombine.low %v157_v6, %v159_v7  ;;  %v62_v6 = vld [vmem:[%s13084_s1 + $0x388] sm:$0xff] }
  0x26   :  { %v91_v13 = vld [vmem:[%s13084_s1 + $0x740] sm:$0xff]  ;;  %840 = vmatpush2.bf16.msra.mxu0 %v7885_v16  ;;  %v64_v7 = vld [vmem:[%s13084_s1 + $0x3c8] sm:$0xff] }
  0x27   :  { %v153_v14 = vld [vmem:[%s13084_s1 + $0xf00] sm:$0xff]  ;;  %v7882_v18 = vcombine.high %v89_v12, %v91_v13  ;;  %882 = vmatprep.subr.bf16.mxu1 %v7950_v11  ;;  %v7881_v24 = vcombine.low %v89_v12, %v91_v13  ;;  %v7856_v16 = vcombine.high %v62_v6, %v64_v7 }
  0x28   :  { %v155_v15 = vld [vmem:[%s13084_s1 + $0xf40] sm:$0xff]  ;;  %883 = vmatpush2.bf16.msra.mxu1 %v7949_v17  ;;  %v7920_v17 = vcombine.high %v126_v8, %v128_v9 }
  0x29   :  { %v7946_v19 = vcombine.high %v153_v14, %v155_v15  ;;  %v85_v20 = vld [vmem:[%s13084_s1 + $0x680] sm:$0xff]  ;;  %841 = vmatprep.subr.bf16.mxu0 %v7882_v18  ;;  %v7945_v25 = vcombine.low %v153_v14, %v155_v15  ;;  %v23_v14 = vld [vmem:[%s13083_s0 + $0x10] sm:$0xff]  ;;  %v58_v18 = vld [vmem:[%s13084_s1 + $0x308] sm:$0xff] }
  0x2a   :  { %v87_v21 = vld [vmem:[%s13084_s1 + $0x6c0] sm:$0xff]  ;;  %842 = vmatpush2.bf16.msra.mxu0 %v7881_v24  ;;  %v27_v15 = vld [vmem:[%s13083_s0 + $0x30] sm:$0xff]  ;;  %v7855_v24 = vcombine.low %v62_v6, %v64_v7  ;;  %v36_v6 = vld [vmem:[%s13084_s1 + $0x48] sm:$0xff] }
  0x2b   :  { %v149_v22 = vld [vmem:[%s13084_s1 + $0xe80] sm:$0xff]  ;;  %v7878_v26 = vcombine.high %v85_v20, %v87_v21  ;;  %884 = vmatprep.subr.bf16.mxu1 %v7946_v19  ;;  %v7877_v32 = vcombine.low %v85_v20, %v87_v21  ;;  %v60_v19 = vld [vmem:[%s13084_s1 + $0x348] sm:$0xff] }
  0x2c   :  { %v151_v23 = vld [vmem:[%s13084_s1 + $0xec0] sm:$0xff]  ;;  %885 = vmatpush2.bf16.msra.mxu1 %v7945_v25  ;;  %v122_v21 = vld [vmem:[%s13084_s1 + $0xb08] sm:$0xff]  ;;  %v7919_v25 = vcombine.low %v126_v8, %v128_v9 }
  0x2d   :  { %v7942_v27 = vcombine.high %v149_v22, %v151_v23  ;;  %v81_v28 = vld [vmem:[%s13084_s1 + $0x600] sm:$0xff]  ;;  %843 = vmatprep.subr.bf16.mxu0 %v7878_v26  ;;  %v7941_v33 = vcombine.low %v149_v22, %v151_v23  ;;  %v124_v22 = vld [vmem:[%s13084_s1 + $0xb48] sm:$0xff]  ;;  %v9935_v23 = vpack.c.bf16 %v27_v15, %v23_v14  ;;  %v7852_v26 = vcombine.high %v58_v18, %v60_v19 }
  0x2e   :  { %v83_v29 = vld [vmem:[%s13084_s1 + $0x640] sm:$0xff]  ;;  %844 = vmatpush2.bf16.msra.mxu0 %v7877_v32  ;;  %v7851_v32 = vcombine.low %v58_v18, %v60_v19  ;;  %v98_v7 = vld [vmem:[%s13084_s1 + $0x808] sm:$0xff] }
  0x2f   :  { %v145_v30 = vld [vmem:[%s13084_s1 + $0xe00] sm:$0xff]  ;;  %v7874_v34 = vcombine.high %v81_v28, %v83_v29  ;;  %886 = vmatprep.subr.bf16.mxu1 %v7942_v27  ;;  %v7873_v40 = vcombine.low %v81_v28, %v83_v29  ;;  %v7916_v27 = vcombine.high %v122_v21, %v124_v22  ;;  %v54_v28 = vld [vmem:[%s13084_s1 + $0x288] sm:$0xff] }
  0x30   :  { %v147_v31 = vld [vmem:[%s13084_s1 + $0xe40] sm:$0xff]  ;;  %887 = vmatpush2.bf16.msra.mxu1 %v7941_v33  ;;  %v56_v29 = vld [vmem:[%s13084_s1 + $0x2c8] sm:$0xff]  ;;  %v7915_v33 = vcombine.low %v122_v21, %v124_v22 }
  0x31   :  { %v7938_v35 = vcombine.high %v145_v30, %v147_v31  ;;  %v77_v36 = vld [vmem:[%s13084_s1 + $0x580] sm:$0xff]  ;;  %845 = vmatprep.subr.bf16.mxu0 %v7874_v34  ;;  %v7937_v41 = vcombine.low %v145_v30, %v147_v31  ;;  %v118_v30 = vld [vmem:[%s13084_s1 + $0xa88] sm:$0xff]  ;;  %v7848_v34 = vcombine.high %v54_v28, %v56_v29 }
  0x32   :  { %v79_v37 = vld [vmem:[%s13084_s1 + $0x5c0] sm:$0xff]  ;;  %846 = vmatpush2.bf16.msra.mxu0 %v7873_v40  ;;  %v120_v31 = vld [vmem:[%s13084_s1 + $0xac8] sm:$0xff]  ;;  %v7847_v40 = vcombine.low %v54_v28, %v56_v29 }
  0x33   :  { %v141_v38 = vld [vmem:[%s13084_s1 + $0xd80] sm:$0xff]  ;;  %v7870_v42 = vcombine.high %v77_v36, %v79_v37  ;;  %888 = vmatprep.subr.bf16.mxu1 %v7938_v35  ;;  %v7869_v48 = vcombine.low %v77_v36, %v79_v37  ;;  %v50_v35 = vld [vmem:[%s13084_s1 + $0x208] sm:$0xff] }
  0x34   :  { %v143_v39 = vld [vmem:[%s13084_s1 + $0xdc0] sm:$0xff]  ;;  %889 = vmatpush2.bf16.msra.mxu1 %v7937_v41  ;;  %v52_v36 = vld [vmem:[%s13084_s1 + $0x248] sm:$0xff]  ;;  %v7911_v41 = vcombine.low %v118_v30, %v120_v31 }
  0x35   :  { %v7934_v43 = vcombine.high %v141_v38, %v143_v39  ;;  %v73_v44 = vld [vmem:[%s13084_s1 + $0x500] sm:$0xff]  ;;  %847 = vmatprep.subr.bf16.mxu0 %v7870_v42  ;;  %v7933_v49 = vcombine.low %v141_v38, %v143_v39  ;;  %v114_v37 = vld [vmem:[%s13084_s1 + $0xa08] sm:$0xff]  ;;  %v7912_v38 = vcombine.high %v118_v30, %v120_v31  ;;  %v7844_v42 = vcombine.high %v50_v35, %v52_v36 }
  0x36   :  { %v75_v45 = vld [vmem:[%s13084_s1 + $0x540] sm:$0xff]  ;;  %848 = vmatpush2.bf16.msra.mxu0 %v7869_v48  ;;  %v116_v39 = vld [vmem:[%s13084_s1 + $0xa48] sm:$0xff]  ;;  %v7843_v48 = vcombine.low %v50_v35, %v52_v36 }
  0x37   :  { %v137_v46 = vld [vmem:[%s13084_s1 + $0xd00] sm:$0xff]  ;;  %v7866_v50 = vcombine.high %v73_v44, %v75_v45  ;;  %890 = vmatprep.subr.bf16.mxu1 %v7934_v43  ;;  %v7865_v56 = vcombine.low %v73_v44, %v75_v45  ;;  %v46_v43 = vld [vmem:[%s13084_s1 + $0x188] sm:$0xff] }
  0x38   :  { %v139_v47 = vld [vmem:[%s13084_s1 + $0xd40] sm:$0xff]  ;;  %891 = vmatpush2.bf16.msra.mxu1 %v7933_v49  ;;  %v48_v44 = vld [vmem:[%s13084_s1 + $0x1c8] sm:$0xff]  ;;  %v7907_v49 = vcombine.low %v114_v37, %v116_v39 }
  0x39   :  { %v7930_v51 = vcombine.high %v137_v46, %v139_v47  ;;  %v69_v52 = vld [vmem:[%s13084_s1 + $0x480] sm:$0xff]  ;;  %849 = vmatprep.subr.bf16.mxu0 %v7866_v50  ;;  %v7929_v57 = vcombine.low %v137_v46, %v139_v47  ;;  %v110_v45 = vld [vmem:[%s13084_s1 + $0x988] sm:$0xff]  ;;  %v7908_v46 = vcombine.high %v114_v37, %v116_v39  ;;  %v7840_v50 = vcombine.high %v46_v43, %v48_v44 }
  0x3a   :  { %v71_v53 = vld [vmem:[%s13084_s1 + $0x4c0] sm:$0xff]  ;;  %850 = vmatpush2.bf16.msra.mxu0 %v7865_v56  ;;  %v112_v47 = vld [vmem:[%s13084_s1 + $0x9c8] sm:$0xff]  ;;  %v7839_v56 = vcombine.low %v46_v43, %v48_v44 }
  0x3b   :  { %v133_v54 = vld [vmem:[%s13084_s1 + $0xc80] sm:$0xff]  ;;  %v7862_v59 = vcombine.high %v69_v52, %v71_v53  ;;  %892 = vmatprep.subr.bf16.mxu1 %v7930_v51  ;;  %v7861_v2 = vcombine.low %v69_v52, %v71_v53  ;;  %v42_v51 = vld [vmem:[%s13084_s1 + $0x108] sm:$0xff] }
  0x3c   :  { %v135_v55 = vld [vmem:[%s13084_s1 + $0xcc0] sm:$0xff]  ;;  %893 = vmatpush2.bf16.msra.mxu1 %v7929_v57  ;;  %v44_v52 = vld [vmem:[%s13084_s1 + $0x148] sm:$0xff]  ;;  %v7903_v57 = vcombine.low %v110_v45, %v112_v47 }
  0x3d   :  { %v7926_v60 = vcombine.high %v133_v54, %v135_v55  ;;  %v65_v61 = vld [vmem:[%s13084_s1 + $0x400] sm:$0xff]  ;;  %851 = vmatprep.subr.bf16.mxu0 %v7862_v59  ;;  %v7925_v3 = vcombine.low %v133_v54, %v135_v55  ;;  %v106_v53 = vld [vmem:[%s13084_s1 + $0x908] sm:$0xff]  ;;  %v7904_v54 = vcombine.high %v110_v45, %v112_v47  ;;  %v7836_v59 = vcombine.high %v42_v51, %v44_v52 }
  0x3e   :  { %v67_v62 = vld [vmem:[%s13084_s1 + $0x440] sm:$0xff]  ;;  %852 = vmatpush2.bf16.msra.mxu0 %v7861_v2  ;;  %v108_v55 = vld [vmem:[%s13084_s1 + $0x948] sm:$0xff]  ;;  %v7835_v2 = vcombine.low %v42_v51, %v44_v52 }
  0x3f   :  { %v129_v0 = vld [vmem:[%s13084_s1 + $0xc00] sm:$0xff]  ;;  %v7858_v4 = vcombine.high %v65_v61, %v67_v62  ;;  %894 = vmatprep.subr.bf16.mxu1 %v7926_v60  ;;  %v7857_v10 = vcombine.low %v65_v61, %v67_v62  ;;  %v38_v60 = vld [vmem:[%s13084_s1 + $0x88] sm:$0xff] }
  0x40   :  { %v131_v1 = vld [vmem:[%s13084_s1 + $0xc40] sm:$0xff]  ;;  %895 = vmatpush2.bf16.msra.mxu1 %v7925_v3  ;;  %v40_v61 = vld [vmem:[%s13084_s1 + $0xc8] sm:$0xff]  ;;  %v7899_v3 = vcombine.low %v106_v53, %v108_v55 }
  0x41   :  { %v7922_v5 = vcombine.high %v129_v0, %v131_v1  ;;  %v21_v11 = vld [vmem:[%s13083_s0] sm:$0xff]  ;;  %853 = vmatprep.subr.bf16.mxu0 %v7858_v4  ;;  %v7921_v13 = vcombine.low %v129_v0, %v131_v1  ;;  %v102_v62 = vld [vmem:[%s13084_s1 + $0x888] sm:$0xff]  ;;  %v7900_v0 = vcombine.high %v106_v53, %v108_v55  ;;  %v7832_v4 = vcombine.high %v38_v60, %v40_v61 }
  0x42   :  { %v25_v12 = vld [vmem:[%s13083_s0 + $0x20] sm:$0xff]  ;;  %854 = vmatpush2.bf16.msra.mxu0 %v7857_v10  ;;  %v104_v1 = vld [vmem:[%s13084_s1 + $0x8c8] sm:$0xff]  ;;  %v7831_v10 = vcombine.low %v38_v60, %v40_v61 }
  0x43   :  { %896 = vmatprep.subr.bf16.mxu1 %v7922_v5  ;;  %v9927_v20 = vpack.c.bf16 %v25_v12, %v21_v11  ;;  %909 = vmatprep.subr.bf16.mxu0 %v7856_v16  ;;  %v34_v5 = vld [vmem:[%s13084_s1 + $0x8] sm:$0xff]  ;;  %v7896_v8 = vcombine.high %v102_v62, %v104_v1  ;;  %v7895_v11 = vcombine.low %v102_v62, %v104_v1 }
  0x44   :  { %897 = vmatpush2.bf16.msra.mxu1 %v7921_v13  ;;  %v100_v9 = vld [vmem:[%s13084_s1 + $0x848] sm:$0xff]  ;;  %v7828_v12 = vcombine.high %v34_v5, %v36_v6  ;;  %v7827_v18 = vcombine.low %v34_v5, %v36_v6 }
  0x45   :  { %952 = vmatprep.subr.bf16.mxu1 %v7920_v17  ;;  %856 = vmatmul.mubr.bf16.vlgmr.msra.gmra.mxu0 %v9927_v20  ;;  %v94_v13 = vld [vmem:[%s13084_s1 + $0x788] sm:$0xff]  ;;  %v7892_v16 = vcombine.high %v98_v7, %v100_v9  ;;  %v7891_v19 = vcombine.low %v98_v7, %v100_v9 }
  0x46   :  { %910 = vmatpush1.bf16.msra.mxu0 %v7855_v24  ;;  %941 = vmatprep.mubr.bf16.mxu0 %v9783_v58  ;;  %v96_v14 = vld [vmem:[%s13084_s1 + $0x7c8] sm:$0xff] }
  0x47   :  { %899 = vmatmul.mubr.bf16.vlgmr.msra.gmra.mxu1 %v9935_v23  ;;  %911 = vmatprep.subr.bf16.mxu0 %v7852_v26  ;;  %v158_v15 = vld [vmem:[%s13084_s1 + $0xf88] sm:$0xff]  ;;  %v7888_v21 = vcombine.high %v94_v13, %v96_v14  ;;  %v7887_v28 = vcombine.low %v94_v13, %v96_v14 }
  0x48   :  { %953 = vmatpush1.bf16.msra.mxu1 %v7919_v25  ;;  %984 = vmatprep.mubr.bf16.mxu1 %v9797_v63  ;;  %v160_v17 = vld [vmem:[%s13084_s1 + $0xfc8] sm:$0xff] }
  0x49   :  { %954 = vmatprep.subr.bf16.mxu1 %v7916_v27  ;;  %v90_v22 = vld [vmem:[%s13084_s1 + $0x708] sm:$0xff]  ;;  %v7952_v26 = vcombine.high %v158_v15, %v160_v17  ;;  %v7951_v29 = vcombine.low %v158_v15, %v160_v17  ;;  %v1163_v17 = vld [vmem:[%s13084_s1 + $0x390] sm:$0xff] }
  0x4a   :  { %912 = vmatpush1.bf16.msra.mxu0 %v7851_v32  ;;  %v92_v24 = vld [vmem:[%s13084_s1 + $0x748] sm:$0xff] }
  0x4b   :  { %913 = vmatprep.subr.bf16.mxu0 %v7848_v34  ;;  %v154_v25 = vld [vmem:[%s13084_s1 + $0xf08] sm:$0xff]  ;;  %v7884_v30 = vcombine.high %v90_v22, %v92_v24  ;;  %v7883_v36 = vcombine.low %v90_v22, %v92_v24  ;;  %v1229_v22 = vld [vmem:[%s13084_s1 + $0xbd0] sm:$0xff] }
  0x4c   :  { %955 = vmatpush1.bf16.msra.mxu1 %v7915_v33  ;;  %v156_v27 = vld [vmem:[%s13084_s1 + $0xf48] sm:$0xff] }
  0x4d   :  { %956 = vmatprep.subr.bf16.mxu1 %v7912_v38  ;;  %v86_v31 = vld [vmem:[%s13084_s1 + $0x688] sm:$0xff]  ;;  %v7948_v34 = vcombine.high %v154_v25, %v156_v27  ;;  %v7947_v37 = vcombine.low %v154_v25, %v156_v27  ;;  %v1159_v27 = vld [vmem:[%s13084_s1 + $0x310] sm:$0xff] }
  0x4e   :  { %914 = vmatpush1.bf16.msra.mxu0 %v7847_v40  ;;  %v88_v32 = vld [vmem:[%s13084_s1 + $0x6c8] sm:$0xff] }
  0x4f   :  { %915 = vmatprep.subr.bf16.mxu0 %v7844_v42  ;;  %v150_v33 = vld [vmem:[%s13084_s1 + $0xe88] sm:$0xff]  ;;  %v7880_v38 = vcombine.high %v86_v31, %v88_v32  ;;  %v7879_v44 = vcombine.low %v86_v31, %v88_v32  ;;  %v1225_v31 = vld [vmem:[%s13084_s1 + $0xb50] sm:$0xff] }
  0x50   :  { %957 = vmatpush1.bf16.msra.mxu1 %v7911_v41  ;;  %v152_v35 = vld [vmem:[%s13084_s1 + $0xec8] sm:$0xff] }
  0x51   :  { %958 = vmatprep.subr.bf16.mxu1 %v7908_v46  ;;  %v82_v39 = vld [vmem:[%s13084_s1 + $0x608] sm:$0xff]  ;;  %v7944_v42 = vcombine.high %v150_v33, %v152_v35  ;;  %v7943_v45 = vcombine.low %v150_v33, %v152_v35  ;;  %v1155_v33 = vld [vmem:[%s13084_s1 + $0x290] sm:$0xff] }
  0x52   :  { %916 = vmatpush1.bf16.msra.mxu0 %v7843_v48  ;;  %v84_v40 = vld [vmem:[%s13084_s1 + $0x648] sm:$0xff] }
  0x53   :  { %917 = vmatprep.subr.bf16.mxu0 %v7840_v50  ;;  %v146_v41 = vld [vmem:[%s13084_s1 + $0xe08] sm:$0xff]  ;;  %v7876_v46 = vcombine.high %v82_v39, %v84_v40  ;;  %v7875_v52 = vcombine.low %v82_v39, %v84_v40 }
  0x54   :  { %959 = vmatpush1.bf16.msra.mxu1 %v7907_v49  ;;  %v148_v43 = vld [vmem:[%s13084_s1 + $0xe48] sm:$0xff] }
  0x55   :  { %960 = vmatprep.subr.bf16.mxu1 %v7904_v54  ;;  %v78_v47 = vld [vmem:[%s13084_s1 + $0x588] sm:$0xff]  ;;  %v7940_v50 = vcombine.high %v146_v41, %v148_v43  ;;  %v7939_v53 = vcombine.low %v146_v41, %v148_v43  ;;  %v1151_v41 = vld [vmem:[%s13084_s1 + $0x210] sm:$0xff] }
  0x56   :  { %918 = vmatpush1.bf16.msra.mxu0 %v7839_v56  ;;  %v80_v48 = vld [vmem:[%s13084_s1 + $0x5c8] sm:$0xff] }
  0x57   :  { %919 = vmatprep.subr.bf16.mxu0 %v7836_v59  ;;  %v142_v49 = vld [vmem:[%s13084_s1 + $0xd88] sm:$0xff]  ;;  %v7872_v54 = vcombine.high %v78_v47, %v80_v48  ;;  %v7871_v61 = vcombine.low %v78_v47, %v80_v48 }
  0x58   :  { %961 = vmatpush1.bf16.msra.mxu1 %v7903_v57  ;;  %v144_v51 = vld [vmem:[%s13084_s1 + $0xdc8] sm:$0xff] }
  0x59   :  { %962 = vmatprep.subr.bf16.mxu1 %v7900_v0  ;;  %v74_v55 = vld [vmem:[%s13084_s1 + $0x508] sm:$0xff]  ;;  %v7936_v59 = vcombine.high %v142_v49, %v144_v51  ;;  %v7935_v62 = vcombine.low %v142_v49, %v144_v51  ;;  %v1147_v49 = vld [vmem:[%s13084_s1 + $0x190] sm:$0xff] }
  0x5a   :  { %920 = vmatpush1.bf16.msra.mxu0 %v7835_v2  ;;  %v76_v56 = vld [vmem:[%s13084_s1 + $0x548] sm:$0xff] }
  0x5b   :  { %921 = vmatprep.subr.bf16.mxu0 %v7832_v4  ;;  %v138_v57 = vld [vmem:[%s13084_s1 + $0xd08] sm:$0xff]  ;;  %v7868_v0 = vcombine.high %v74_v55, %v76_v56  ;;  %v7867_v6 = vcombine.low %v74_v55, %v76_v56 }
  0x5c   :  { %963 = vmatpush1.bf16.msra.mxu1 %v7899_v3  ;;  %v140_v60 = vld [vmem:[%s13084_s1 + $0xd48] sm:$0xff] }
  0x5d   :  { %964 = vmatprep.subr.bf16.mxu1 %v7896_v8  ;;  %v70_v1 = vld [vmem:[%s13084_s1 + $0x488] sm:$0xff]  ;;  %v7932_v4 = vcombine.high %v138_v57, %v140_v60  ;;  %v7931_v7 = vcombine.low %v138_v57, %v140_v60  ;;  %v1143_v57 = vld [vmem:[%s13084_s1 + $0x110] sm:$0xff] }
  0x5e   :  { %922 = vmatpush1.bf16.msra.mxu0 %v7831_v10  ;;  %v72_v2 = vld [vmem:[%s13084_s1 + $0x4c8] sm:$0xff] }
  0x5f   :  { %923 = vmatprep.subr.bf16.mxu0 %v7828_v12  ;;  %v134_v3 = vld [vmem:[%s13084_s1 + $0xc88] sm:$0xff]  ;;  %v7864_v8 = vcombine.high %v70_v1, %v72_v2  ;;  %v7863_v14 = vcombine.low %v70_v1, %v72_v2 }
  0x60   :  { %965 = vmatpush1.bf16.msra.mxu1 %v7895_v11  ;;  %v136_v5 = vld [vmem:[%s13084_s1 + $0xcc8] sm:$0xff] }
  0x61   :  { %966 = vmatprep.subr.bf16.mxu1 %v7892_v16  ;;  %v66_v9 = vld [vmem:[%s13084_s1 + $0x408] sm:$0xff]  ;;  %v7928_v12 = vcombine.high %v134_v3, %v136_v5  ;;  %v7927_v15 = vcombine.low %v134_v3, %v136_v5  ;;  %v1139_v3 = vld [vmem:[%s13084_s1 + $0x90] sm:$0xff] }
  0x62   :  { %924 = vmatpush1.bf16.msra.mxu0 %v7827_v18  ;;  %v68_v10 = vld [vmem:[%s13084_s1 + $0x448] sm:$0xff]  ;;  %v1165_v18 = vld [vmem:[%s13084_s1 + $0x3d0] sm:$0xff] }
  0x63   :  { %925 = vmatprep.subr.bf16.mxu0 %v7888_v21  ;;  %v130_v11 = vld [vmem:[%s13084_s1 + $0xc08] sm:$0xff]  ;;  %v7860_v16 = vcombine.high %v66_v9, %v68_v10  ;;  %v7859_v24 = vcombine.low %v66_v9, %v68_v10  ;;  %v7981_v32 = vcombine.low %v1163_v17, %v1165_v18 }
  0x64   :  { %967 = vmatpush1.bf16.msra.mxu1 %v7891_v19  ;;  %v132_v13 = vld [vmem:[%s13084_s1 + $0xc48] sm:$0xff]  ;;  %v1227_v19 = vld [vmem:[%s13084_s1 + $0xb90] sm:$0xff] }
  0x65   :  { %968 = vmatprep.subr.bf16.mxu1 %v7952_v26  ;;  %v7924_v21 = vcombine.high %v130_v11, %v132_v13  ;;  %v7923_v25 = vcombine.low %v130_v11, %v132_v13  ;;  %v7982_v26 = vcombine.high %v1163_v17, %v1165_v18  ;;  %v8045_v35 = vcombine.low %v1227_v19, %v1229_v22  ;;  %v1135_v11 = vld [vmem:[%s13084_s1 + $0x10] sm:$0xff] }
  0x66   :  { %926 = vmatpush2.bf16.msra.mxu0 %v7887_v28  ;;  %v1161_v28 = vld [vmem:[%s13084_s1 + $0x350] sm:$0xff] }
  0x67   :  { %927 = vmatprep.subr.bf16.mxu0 %v7884_v30  ;;  %v8046_v30 = vcombine.high %v1227_v19, %v1229_v22  ;;  %v7977_v40 = vcombine.low %v1159_v27, %v1161_v28  ;;  %v1195_v19 = vld [vmem:[%s13084_s1 + $0x790] sm:$0xff] }
  0x68   :  { %969 = vmatpush2.bf16.msra.mxu1 %v7951_v29  ;;  %v1223_v29 = vld [vmem:[%s13084_s1 + $0xb10] sm:$0xff] }
  0x69   :  { %970 = vmatprep.subr.bf16.mxu1 %v7948_v34  ;;  %v1157_v34 = vld [vmem:[%s13084_s1 + $0x2d0] sm:$0xff]  ;;  %v8042_v39 = vcombine.high %v1223_v29, %v1225_v31  ;;  %v8041_v43 = vcombine.low %v1223_v29, %v1225_v31 }
  0x6a   :  { %928 = vmatpush2.bf16.msra.mxu0 %v7883_v36  ;;  %v7978_v36 = vcombine.high %v1159_v27, %v1161_v28  ;;  %v7973_v48 = vcombine.low %v1155_v33, %v1157_v34  ;;  %v1191_v29 = vld [vmem:[%s13084_s1 + $0x710] sm:$0xff] }
  0x6b   :  { %929 = vmatprep.subr.bf16.mxu0 %v7880_v38  ;;  %v1221_v38 = vld [vmem:[%s13084_s1 + $0xad0] sm:$0xff] }
  0x6c   :  { %971 = vmatpush2.bf16.msra.mxu1 %v7947_v37  ;;  %v1219_v37 = vld [vmem:[%s13084_s1 + $0xa90] sm:$0xff] }
  0x6d   :  { %972 = vmatprep.subr.bf16.mxu1 %v7944_v42  ;;  %v1153_v42 = vld [vmem:[%s13084_s1 + $0x250] sm:$0xff]  ;;  %v8038_v47 = vcombine.high %v1219_v37, %v1221_v38  ;;  %v8037_v51 = vcombine.low %v1219_v37, %v1221_v38 }
  0x6e   :  { %930 = vmatpush2.bf16.msra.mxu0 %v7879_v44  ;;  %v7974_v44 = vcombine.high %v1155_v33, %v1157_v34  ;;  %v7969_v56 = vcombine.low %v1151_v41, %v1153_v42  ;;  %v1255_v33 = vld [vmem:[%s13084_s1 + $0xf10] sm:$0xff] }
  0x6f   :  { %931 = vmatprep.subr.bf16.mxu0 %v7876_v46  ;;  %v1217_v46 = vld [vmem:[%s13084_s1 + $0xa50] sm:$0xff] }
  0x70   :  { %973 = vmatpush2.bf16.msra.mxu1 %v7943_v45  ;;  %v1215_v45 = vld [vmem:[%s13084_s1 + $0xa10] sm:$0xff] }
  0x71   :  { %974 = vmatprep.subr.bf16.mxu1 %v7940_v50  ;;  %v1149_v50 = vld [vmem:[%s13084_s1 + $0x1d0] sm:$0xff]  ;;  %v8034_v55 = vcombine.high %v1215_v45, %v1217_v46  ;;  %v8033_v60 = vcombine.low %v1215_v45, %v1217_v46 }
  0x72   :  { %932 = vmatpush2.bf16.msra.mxu0 %v7875_v52  ;;  %v7970_v52 = vcombine.high %v1151_v41, %v1153_v42  ;;  %v7965_v2 = vcombine.low %v1147_v49, %v1149_v50  ;;  %v1257_v34 = vld [vmem:[%s13084_s1 + $0xf50] sm:$0xff] }
  0x73   :  { %933 = vmatprep.subr.bf16.mxu0 %v7872_v54  ;;  %v1213_v54 = vld [vmem:[%s13084_s1 + $0x9d0] sm:$0xff] }
  0x74   :  { %975 = vmatpush2.bf16.msra.mxu1 %v7939_v53  ;;  %v1211_v53 = vld [vmem:[%s13084_s1 + $0x990] sm:$0xff] }
  0x75   :  { %976 = vmatprep.subr.bf16.mxu1 %v7936_v59  ;;  %v1145_v59 = vld [vmem:[%s13084_s1 + $0x150] sm:$0xff]  ;;  %v8030_v1 = vcombine.high %v1211_v53, %v1213_v54  ;;  %v8029_v5 = vcombine.low %v1211_v53, %v1213_v54 }
  0x76   :  { %934 = vmatpush2.bf16.msra.mxu0 %v7871_v61  ;;  %v7966_v61 = vcombine.high %v1147_v49, %v1149_v50  ;;  %v7961_v10 = vcombine.low %v1143_v57, %v1145_v59  ;;  %v1187_v37 = vld [vmem:[%s13084_s1 + $0x690] sm:$0xff] }
  0x77   :  { %935 = vmatprep.subr.bf16.mxu0 %v7868_v0  ;;  %v1209_v0 = vld [vmem:[%s13084_s1 + $0x950] sm:$0xff] }
  0x78   :  { %977 = vmatpush2.bf16.msra.mxu1 %v7935_v62  ;;  %v1207_v62 = vld [vmem:[%s13084_s1 + $0x910] sm:$0xff] }
  0x79   :  { %978 = vmatprep.subr.bf16.mxu1 %v7932_v4  ;;  %v1141_v4 = vld [vmem:[%s13084_s1 + $0xd0] sm:$0xff]  ;;  %v8026_v9 = vcombine.high %v1207_v62, %v1209_v0  ;;  %v8025_v13 = vcombine.low %v1207_v62, %v1209_v0 }
  0x7a   :  { %936 = vmatpush2.bf16.msra.mxu0 %v7867_v6  ;;  %v7962_v6 = vcombine.high %v1143_v57, %v1145_v59  ;;  %v7957_v18 = vcombine.low %v1139_v3, %v1141_v4  ;;  %v1189_v38 = vld [vmem:[%s13084_s1 + $0x6d0] sm:$0xff] }
  0x7b   :  { %937 = vmatprep.subr.bf16.mxu0 %v7864_v8  ;;  %v1205_v8 = vld [vmem:[%s13084_s1 + $0x8d0] sm:$0xff] }
  0x7c   :  { %979 = vmatpush2.bf16.msra.mxu1 %v7931_v7  ;;  %v1203_v7 = vld [vmem:[%s13084_s1 + $0x890] sm:$0xff] }
  0x7d   :  { %980 = vmatprep.subr.bf16.mxu1 %v7928_v12  ;;  %v1137_v12 = vld [vmem:[%s13084_s1 + $0x50] sm:$0xff]  ;;  %v8022_v17 = vcombine.high %v1203_v7, %v1205_v8  ;;  %v8021_v22 = vcombine.low %v1203_v7, %v1205_v8 }
  0x7e   :  { %938 = vmatpush2.bf16.msra.mxu0 %v7863_v14  ;;  %v7958_v14 = vcombine.high %v1139_v3, %v1141_v4  ;;  %v7953_v28 = vcombine.low %v1135_v11, %v1137_v12  ;;  %v1251_v41 = vld [vmem:[%s13084_s1 + $0xe90] sm:$0xff] }
  0x7f   :  { %939 = vmatprep.subr.bf16.mxu0 %v7860_v16  ;;  %v1201_v16 = vld [vmem:[%s13084_s1 + $0x850] sm:$0xff] }
  0x80   :  { %981 = vmatpush2.bf16.msra.mxu1 %v7927_v15  ;;  %v1199_v15 = vld [vmem:[%s13084_s1 + $0x810] sm:$0xff] }
  0x81   :  { %982 = vmatprep.subr.bf16.mxu1 %v7924_v21  ;;  %v1197_v21 = vld [vmem:[%s13084_s1 + $0x7d0] sm:$0xff]  ;;  %v8018_v27 = vcombine.high %v1199_v15, %v1201_v16  ;;  %v8017_v31 = vcombine.low %v1199_v15, %v1201_v16 }
  0x82   :  { %940 = vmatpush2.bf16.msra.mxu0 %v7859_v24  ;;  %v7954_v24 = vcombine.high %v1135_v11, %v1137_v12  ;;  %v1253_v42 = vld [vmem:[%s13084_s1 + $0xed0] sm:$0xff] }
  0x83   :  { %1925 = vmatprep.subr.bf16.mxu0 %v7982_v26  ;;  %v1261_v26 = vld [vmem:[%s13084_s1 + $0xfd0] sm:$0xff] }
  0x84   :  { %983 = vmatpush2.bf16.msra.mxu1 %v7923_v25  ;;  %v1259_v25 = vld [vmem:[%s13084_s1 + $0xf90] sm:$0xff] }
  0x85   :  { %1968 = vmatprep.subr.bf16.mxu1 %v8046_v30  ;;  %942 = vmatmul.mubr.bf16.vlgmr.msra.gmra.mxu0 %v9927_v20  ;;  %v1193_v30 = vld [vmem:[%s13084_s1 + $0x750] sm:$0xff] }
  0x86   :  { %1926 = vmatpush1.bf16.msra.mxu0 %v7981_v32  ;;  %1957 = vmatprep.mubr.bf16.mxu0 %v9783_v58  ;;  %v8014_v32 = vcombine.high %v1195_v19, %v1197_v21  ;;  %v1183_v45 = vld [vmem:[%s13084_s1 + $0x610] sm:$0xff] }
  0x87   :  { %985 = vmatmul.mubr.bf16.vlgmr.msra.gmra.mxu1 %v9935_v23  ;;  %1927 = vmatprep.subr.bf16.mxu0 %v7978_v36  ;;  %v8013_v36 = vcombine.low %v1195_v19, %v1197_v21  ;;  %v1185_v46 = vld [vmem:[%s13084_s1 + $0x650] sm:$0xff] }
  0x88   :  { %1969 = vmatpush1.bf16.msra.mxu1 %v8045_v35  ;;  %2000 = vmatprep.mubr.bf16.mxu1 %v9797_v63  ;;  %v8078_v35 = vcombine.high %v1259_v25, %v1261_v26  ;;  %v1247_v49 = vld [vmem:[%s13084_s1 + $0xe10] sm:$0xff] }
  0x89   :  { %1970 = vmatprep.subr.bf16.mxu1 %v8042_v39  ;;  %v8077_v39 = vcombine.low %v1259_v25, %v1261_v26  ;;  %v1249_v50 = vld [vmem:[%s13084_s1 + $0xe50] sm:$0xff]  ;;  %v1164_v25 = vld [vmem:[%s13084_s1 + $0x398] sm:$0xff] }
  0x8a   :  { %1928 = vmatpush1.bf16.msra.mxu0 %v7977_v40  ;;  %v8010_v40 = vcombine.high %v1191_v29, %v1193_v30  ;;  %v1179_v53 = vld [vmem:[%s13084_s1 + $0x590] sm:$0xff]  ;;  %v1166_v26 = vld [vmem:[%s13084_s1 + $0x3d8] sm:$0xff] }
  0x8b   :  { %1929 = vmatprep.subr.bf16.mxu0 %v7974_v44  ;;  %v8009_v44 = vcombine.low %v1191_v29, %v1193_v30  ;;  %v1181_v54 = vld [vmem:[%s13084_s1 + $0x5d0] sm:$0xff]  ;;  %v1228_v29 = vld [vmem:[%s13084_s1 + $0xb98] sm:$0xff] }
  0x8c   :  { %1971 = vmatpush1.bf16.msra.mxu1 %v8041_v43  ;;  %v8074_v43 = vcombine.high %v1255_v33, %v1257_v34  ;;  %v1243_v57 = vld [vmem:[%s13084_s1 + $0xd90] sm:$0xff]  ;;  %v1230_v30 = vld [vmem:[%s13084_s1 + $0xbd8] sm:$0xff] }
  0x8d   :  { %1972 = vmatprep.subr.bf16.mxu1 %v8038_v47  ;;  %v8073_v47 = vcombine.low %v1255_v33, %v1257_v34  ;;  %v1245_v59 = vld [vmem:[%s13084_s1 + $0xdd0] sm:$0xff]  ;;  %v1160_v33 = vld [vmem:[%s13084_s1 + $0x318] sm:$0xff] }
  0x8e   :  { %1930 = vmatpush1.bf16.msra.mxu0 %v7973_v48  ;;  %v8006_v48 = vcombine.high %v1187_v37, %v1189_v38  ;;  %v1175_v62 = vld [vmem:[%s13084_s1 + $0x510] sm:$0xff]  ;;  %v1162_v34 = vld [vmem:[%s13084_s1 + $0x358] sm:$0xff] }
  0x8f   :  { %1931 = vmatprep.subr.bf16.mxu0 %v7970_v52  ;;  %v8005_v52 = vcombine.low %v1187_v37, %v1189_v38  ;;  %v1177_v0 = vld [vmem:[%s13084_s1 + $0x550] sm:$0xff]  ;;  %v1224_v37 = vld [vmem:[%s13084_s1 + $0xb18] sm:$0xff] }
  0x90   :  { %1973 = vmatpush1.bf16.msra.mxu1 %v8037_v51  ;;  %v8070_v51 = vcombine.high %v1251_v41, %v1253_v42  ;;  %v1239_v3 = vld [vmem:[%s13084_s1 + $0xd10] sm:$0xff]  ;;  %v1226_v38 = vld [vmem:[%s13084_s1 + $0xb58] sm:$0xff] }
  0x91   :  { %1974 = vmatprep.subr.bf16.mxu1 %v8034_v55  ;;  %v8069_v55 = vcombine.low %v1251_v41, %v1253_v42  ;;  %v1241_v4 = vld [vmem:[%s13084_s1 + $0xd50] sm:$0xff]  ;;  %v1156_v41 = vld [vmem:[%s13084_s1 + $0x298] sm:$0xff] }
  0x92   :  { %1932 = vmatpush1.bf16.msra.mxu0 %v7969_v56  ;;  %v8002_v56 = vcombine.high %v1183_v45, %v1185_v46  ;;  %v1171_v7 = vld [vmem:[%s13084_s1 + $0x490] sm:$0xff]  ;;  %v1158_v42 = vld [vmem:[%s13084_s1 + $0x2d8] sm:$0xff] }
  0x93   :  { %1933 = vmatprep.subr.bf16.mxu0 %v7966_v61  ;;  %v8001_v61 = vcombine.low %v1183_v45, %v1185_v46  ;;  %v1173_v8 = vld [vmem:[%s13084_s1 + $0x4d0] sm:$0xff]  ;;  %v1220_v45 = vld [vmem:[%s13084_s1 + $0xa98] sm:$0xff] }
  0x94   :  { %1975 = vmatpush1.bf16.msra.mxu1 %v8033_v60  ;;  %v8066_v60 = vcombine.high %v1247_v49, %v1249_v50  ;;  %v1235_v11 = vld [vmem:[%s13084_s1 + $0xc90] sm:$0xff]  ;;  %v1222_v46 = vld [vmem:[%s13084_s1 + $0xad8] sm:$0xff] }
  0x95   :  { %1976 = vmatprep.subr.bf16.mxu1 %v8030_v1  ;;  %v8065_v1 = vcombine.low %v1247_v49, %v1249_v50  ;;  %v1237_v12 = vld [vmem:[%s13084_s1 + $0xcd0] sm:$0xff]  ;;  %v1152_v49 = vld [vmem:[%s13084_s1 + $0x218] sm:$0xff] }
  0x96   :  { %1934 = vmatpush1.bf16.msra.mxu0 %v7965_v2  ;;  %v7998_v2 = vcombine.high %v1179_v53, %v1181_v54  ;;  %v1167_v15 = vld [vmem:[%s13084_s1 + $0x410] sm:$0xff]  ;;  %v1154_v50 = vld [vmem:[%s13084_s1 + $0x258] sm:$0xff] }
  0x97   :  { %1935 = vmatprep.subr.bf16.mxu0 %v7962_v6  ;;  %v7997_v6 = vcombine.low %v1179_v53, %v1181_v54  ;;  %v1169_v16 = vld [vmem:[%s13084_s1 + $0x450] sm:$0xff]  ;;  %v1216_v53 = vld [vmem:[%s13084_s1 + $0xa18] sm:$0xff] }
  0x98   :  { %1977 = vmatpush1.bf16.msra.mxu1 %v8029_v5  ;;  %v8062_v5 = vcombine.high %v1243_v57, %v1245_v59  ;;  %v1231_v19 = vld [vmem:[%s13084_s1 + $0xc10] sm:$0xff]  ;;  %v1218_v54 = vld [vmem:[%s13084_s1 + $0xa58] sm:$0xff] }
  0x99   :  { %1978 = vmatprep.subr.bf16.mxu1 %v8026_v9  ;;  %v8061_v9 = vcombine.low %v1243_v57, %v1245_v59  ;;  %v1233_v21 = vld [vmem:[%s13084_s1 + $0xc50] sm:$0xff]  ;;  %v1148_v57 = vld [vmem:[%s13084_s1 + $0x198] sm:$0xff] }
  0x9a   :  { %1936 = vmatpush1.bf16.msra.mxu0 %v7961_v10  ;;  %v7994_v10 = vcombine.high %v1175_v62, %v1177_v0  ;;  %v1150_v59 = vld [vmem:[%s13084_s1 + $0x1d8] sm:$0xff] }
  0x9b   :  { %1937 = vmatprep.subr.bf16.mxu0 %v7958_v14  ;;  %v7993_v14 = vcombine.low %v1175_v62, %v1177_v0  ;;  %v1212_v62 = vld [vmem:[%s13084_s1 + $0x998] sm:$0xff] }
  0x9c   :  { %1979 = vmatpush1.bf16.msra.mxu1 %v8025_v13  ;;  %v8058_v13 = vcombine.high %v1239_v3, %v1241_v4  ;;  %v1214_v0 = vld [vmem:[%s13084_s1 + $0x9d8] sm:$0xff] }
  0x9d   :  { %1980 = vmatprep.subr.bf16.mxu1 %v8022_v17  ;;  %v8057_v17 = vcombine.low %v1239_v3, %v1241_v4  ;;  %v1144_v3 = vld [vmem:[%s13084_s1 + $0x118] sm:$0xff] }
  0x9e   :  { %1938 = vmatpush1.bf16.msra.mxu0 %v7957_v18  ;;  %v7990_v18 = vcombine.high %v1171_v7, %v1173_v8  ;;  %v1146_v4 = vld [vmem:[%s13084_s1 + $0x158] sm:$0xff] }
  0x9f   :  { %1939 = vmatprep.subr.bf16.mxu0 %v7954_v24  ;;  %v7989_v24 = vcombine.low %v1171_v7, %v1173_v8  ;;  %v1208_v7 = vld [vmem:[%s13084_s1 + $0x918] sm:$0xff] }
  0xa0   :  { %1981 = vmatpush1.bf16.msra.mxu1 %v8021_v22  ;;  %v8054_v22 = vcombine.high %v1235_v11, %v1237_v12  ;;  %v1210_v8 = vld [vmem:[%s13084_s1 + $0x958] sm:$0xff] }
  0xa1   :  { %1982 = vmatprep.subr.bf16.mxu1 %v8018_v27  ;;  %v8053_v27 = vcombine.low %v1235_v11, %v1237_v12  ;;  %v8031_v11 = vcombine.low %v1212_v62, %v1214_v0  ;;  %v7964_v12 = vcombine.high %v1144_v3, %v1146_v4 }
  0xa2   :  { %1940 = vmatpush1.bf16.msra.mxu0 %v7953_v28  ;;  %v7986_v28 = vcombine.high %v1167_v15, %v1169_v16 }
  0xa3   :  { %1941 = vmatprep.subr.bf16.mxu0 %v8014_v32  ;;  %v7985_v32 = vcombine.low %v1167_v15, %v1169_v16  ;;  %v1142_v15 = vld [vmem:[%s13084_s1 + $0xd8] sm:$0xff] }
  0xa4   :  { %1983 = vmatpush1.bf16.msra.mxu1 %v8017_v31  ;;  %v8050_v31 = vcombine.high %v1231_v19, %v1233_v21  ;;  %v1204_v16 = vld [vmem:[%s13084_s1 + $0x898] sm:$0xff] }
  0xa5   :  { %1984 = vmatprep.subr.bf16.mxu1 %v8078_v35  ;;  %v8049_v35 = vcombine.low %v1231_v19, %v1233_v21  ;;  %v8027_v19 = vcombine.low %v1208_v7, %v1210_v8 }
  0xa6   :  { %1942 = vmatpush2.bf16.msra.mxu0 %v8013_v36  ;;  %v7984_v36 = vcombine.high %v1164_v25, %v1166_v26 }
  0xa7   :  { %1943 = vmatprep.subr.bf16.mxu0 %v8010_v40  ;;  %v7983_v40 = vcombine.low %v1164_v25, %v1166_v26  ;;  %v1138_v25 = vld [vmem:[%s13084_s1 + $0x58] sm:$0xff] }
  0xa8   :  { %1985 = vmatpush2.bf16.msra.mxu1 %v8077_v39  ;;  %v8048_v39 = vcombine.high %v1228_v29, %v1230_v30  ;;  %v1200_v26 = vld [vmem:[%s13084_s1 + $0x818] sm:$0xff] }
  0xa9   :  { %1986 = vmatprep.subr.bf16.mxu1 %v8074_v43  ;;  %v8047_v43 = vcombine.low %v1228_v29, %v1230_v30  ;;  %v1196_v29 = vld [vmem:[%s13084_s1 + $0x798] sm:$0xff] }
  0xaa   :  { %1944 = vmatpush2.bf16.msra.mxu0 %v8009_v44  ;;  %v7980_v44 = vcombine.high %v1160_v33, %v1162_v34  ;;  %v1198_v30 = vld [vmem:[%s13084_s1 + $0x7d8] sm:$0xff] }
  0xab   :  { %1945 = vmatprep.subr.bf16.mxu0 %v8006_v48  ;;  %v7979_v48 = vcombine.low %v1160_v33, %v1162_v34  ;;  %v1260_v33 = vld [vmem:[%s13084_s1 + $0xf98] sm:$0xff] }
  0xac   :  { %1987 = vmatpush2.bf16.msra.mxu1 %v8073_v47  ;;  %v8044_v47 = vcombine.high %v1224_v37, %v1226_v38  ;;  %v1262_v34 = vld [vmem:[%s13084_s1 + $0xfd8] sm:$0xff] }
  0xad   :  { %1988 = vmatprep.subr.bf16.mxu1 %v8070_v51  ;;  %v8043_v51 = vcombine.low %v1224_v37, %v1226_v38  ;;  %v1192_v37 = vld [vmem:[%s13084_s1 + $0x718] sm:$0xff] }
  0xae   :  { %1946 = vmatpush2.bf16.msra.mxu0 %v8005_v52  ;;  %v7976_v52 = vcombine.high %v1156_v41, %v1158_v42  ;;  %v1194_v38 = vld [vmem:[%s13084_s1 + $0x758] sm:$0xff] }
  0xaf   :  { %1947 = vmatprep.subr.bf16.mxu0 %v8002_v56  ;;  %v7975_v56 = vcombine.low %v1156_v41, %v1158_v42  ;;  %v1256_v41 = vld [vmem:[%s13084_s1 + $0xf18] sm:$0xff] }
  0xb0   :  { %1989 = vmatpush2.bf16.msra.mxu1 %v8069_v55  ;;  %v8040_v55 = vcombine.high %v1220_v45, %v1222_v46  ;;  %v1258_v42 = vld [vmem:[%s13084_s1 + $0xf58] sm:$0xff] }
  0xb1   :  { %1990 = vmatprep.subr.bf16.mxu1 %v8066_v60  ;;  %v8039_v60 = vcombine.low %v1220_v45, %v1222_v46  ;;  %v1188_v45 = vld [vmem:[%s13084_s1 + $0x698] sm:$0xff] }
  0xb2   :  { %1948 = vmatpush2.bf16.msra.mxu0 %v8001_v61  ;;  %v7972_v61 = vcombine.high %v1152_v49, %v1154_v50  ;;  %v1190_v46 = vld [vmem:[%s13084_s1 + $0x6d8] sm:$0xff] }
  0xb3   :  { %1949 = vmatprep.subr.bf16.mxu0 %v7998_v2  ;;  %v7971_v2 = vcombine.low %v1152_v49, %v1154_v50  ;;  %v1252_v49 = vld [vmem:[%s13084_s1 + $0xe98] sm:$0xff] }
  0xb4   :  { %1991 = vmatpush2.bf16.msra.mxu1 %v8065_v1  ;;  %v8036_v1 = vcombine.high %v1216_v53, %v1218_v54  ;;  %v1254_v50 = vld [vmem:[%s13084_s1 + $0xed8] sm:$0xff] }
  0xb5   :  { %1992 = vmatprep.subr.bf16.mxu1 %v8062_v5  ;;  %v8035_v5 = vcombine.low %v1216_v53, %v1218_v54  ;;  %v1184_v53 = vld [vmem:[%s13084_s1 + $0x618] sm:$0xff] }
  0xb6   :  { %1950 = vmatpush2.bf16.msra.mxu0 %v7997_v6  ;;  %v7968_v6 = vcombine.high %v1148_v57, %v1150_v59  ;;  %v1186_v54 = vld [vmem:[%s13084_s1 + $0x658] sm:$0xff] }
  0xb7   :  { %1951 = vmatprep.subr.bf16.mxu0 %v7994_v10  ;;  %v7967_v10 = vcombine.low %v1148_v57, %v1150_v59  ;;  %v1248_v57 = vld [vmem:[%s13084_s1 + $0xe18] sm:$0xff] }
  0xb8   :  { %1993 = vmatpush2.bf16.msra.mxu1 %v8061_v9  ;;  %v8032_v9 = vcombine.high %v1212_v62, %v1214_v0  ;;  %v1250_v59 = vld [vmem:[%s13084_s1 + $0xe58] sm:$0xff] }
  0xb9   :  { %1994 = vmatprep.subr.bf16.mxu1 %v8058_v13  ;;  %v8028_v13 = vcombine.high %v1208_v7, %v1210_v8  ;;  %v1180_v62 = vld [vmem:[%s13084_s1 + $0x598] sm:$0xff] }
  0xba   :  { %1952 = vmatpush2.bf16.msra.mxu0 %v7993_v14  ;;  %v1140_v14 = vld [vmem:[%s13084_s1 + $0x98] sm:$0xff] }
  0xbb   :  { %1953 = vmatprep.subr.bf16.mxu0 %v7990_v18  ;;  %v7963_v18 = vcombine.low %v1144_v3, %v1146_v4  ;;  %v7960_v21 = vcombine.high %v1140_v14, %v1142_v15  ;;  %v1182_v0 = vld [vmem:[%s13084_s1 + $0x5d8] sm:$0xff] }
  0xbc   :  { %1995 = vmatpush2.bf16.msra.mxu1 %v8057_v17  ;;  %v1206_v17 = vld [vmem:[%s13084_s1 + $0x8d8] sm:$0xff] }
  0xbd   :  { %1996 = vmatprep.subr.bf16.mxu1 %v8054_v22  ;;  %v8024_v22 = vcombine.high %v1204_v16, %v1206_v17  ;;  %v1244_v3 = vld [vmem:[%s13084_s1 + $0xd98] sm:$0xff] }
  0xbe   :  { %1954 = vmatpush2.bf16.msra.mxu0 %v7989_v24  ;;  %v1136_v24 = vld [vmem:[%s13084_s1 + $0x18] sm:$0xff] }
  0xbf   :  { %1955 = vmatprep.subr.bf16.mxu0 %v7986_v28  ;;  %v7959_v28 = vcombine.low %v1140_v14, %v1142_v15  ;;  %v1246_v4 = vld [vmem:[%s13084_s1 + $0xdd8] sm:$0xff]  ;;  %v7999_v14 = vcombine.low %v1180_v62, %v1182_v0 }
  0xc0   :  { %1997 = vmatpush2.bf16.msra.mxu1 %v8053_v27  ;;  %v1202_v27 = vld [vmem:[%s13084_s1 + $0x858] sm:$0xff] }
  0xc1   :  { %1998 = vmatprep.subr.bf16.mxu1 %v8050_v31  ;;  %v8023_v31 = vcombine.low %v1204_v16, %v1206_v17  ;;  %v1176_v7 = vld [vmem:[%s13084_s1 + $0x518] sm:$0xff]  ;;  %v8063_v17 = vcombine.low %v1244_v3, %v1246_v4 }
  0xc2   :  { %1956 = vmatpush2.bf16.msra.mxu0 %v7985_v32  ;;  %v7956_v32 = vcombine.high %v1136_v24, %v1138_v25  ;;  %v1178_v8 = vld [vmem:[%s13084_s1 + $0x558] sm:$0xff] }
  0xc3   :  { %2011 = vmatprep.subr.bf16.mxu0 %v7984_v36  ;;  %v7955_v36 = vcombine.low %v1136_v24, %v1138_v25  ;;  %v1172_v15 = vld [vmem:[%s13084_s1 + $0x498] sm:$0xff]  ;;  %v7995_v24 = vcombine.low %v1176_v7, %v1178_v8 }
  0xc4   :  { %1999 = vmatpush2.bf16.msra.mxu1 %v8049_v35  ;;  %v8020_v35 = vcombine.high %v1200_v26, %v1202_v27  ;;  %v1174_v16 = vld [vmem:[%s13084_s1 + $0x4d8] sm:$0xff] }
  0xc5   :  { %2054 = vmatprep.subr.bf16.mxu1 %v8048_v39  ;;  %1958 = vmatmul.mubr.bf16.vlgmr.msra.gmra.mxu0 %v9927_v20  ;;  %v8019_v39 = vcombine.low %v1200_v26, %v1202_v27  ;;  %v1168_v25 = vld [vmem:[%s13084_s1 + $0x418] sm:$0xff]  ;;  %v163_v27 = vlaneseq }
  0xc6   :  { %2012 = vmatpush1.bf16.msra.mxu0 %v7983_v40  ;;  %2043 = vmatprep.mubr.bf16.mxu0 %v9783_v58  ;;  %v8016_v40 = vcombine.high %v1196_v29, %v1198_v30  ;;  %v1170_v26 = vld [vmem:[%s13084_s1 + $0x458] sm:$0xff] }
  0xc7   :  { %2001 = vmatmul.mubr.bf16.vlgmr.msra.gmra.mxu1 %v9935_v23  ;;  %2013 = vmatprep.subr.bf16.mxu0 %v7980_v44  ;;  %v8015_v44 = vcombine.low %v1196_v29, %v1198_v30  ;;  %v7992_v29 = vcombine.high %v1172_v15, %v1174_v16  ;;  %v1232_v30 = vld [vmem:[%s13084_s1 + $0xc18] sm:$0xff] }
  0xc8   :  { %2055 = vmatpush1.bf16.msra.mxu1 %v8047_v43  ;;  %2086 = vmatprep.mubr.bf16.mxu1 %v9797_v63  ;;  %v8080_v43 = vcombine.high %v1260_v33, %v1262_v34 }
  0xc9   :  { %2056 = vmatprep.subr.bf16.mxu1 %v8044_v47  ;;  %v8079_v47 = vcombine.low %v1260_v33, %v1262_v34  ;;  %v7991_v33 = vcombine.low %v1172_v15, %v1174_v16  ;;  %v10501_v34 = vshrl.u32 %v163_v27, 7 }
  0xca   :  { %2014 = vmatpush1.bf16.msra.mxu0 %v7979_v48  ;;  %v8012_v48 = vcombine.high %v1192_v37, %v1194_v38 }
  0xcb   :  { %2015 = vmatprep.subr.bf16.mxu0 %v7976_v52  ;;  %v8011_v52 = vcombine.low %v1192_v37, %v1194_v38  ;;  %v10506_v38 = vld [vmem:[%s13085_s2] sm:$0xf] }
  0xcc   :  { %2057 = vmatpush1.bf16.msra.mxu1 %v8043_v51  ;;  %v8076_v51 = vcombine.high %v1256_v41, %v1258_v42 }
  0xcd   :  { %2058 = vmatprep.subr.bf16.mxu1 %v8040_v55  ;;  %v8075_v55 = vcombine.low %v1256_v41, %v1258_v42  ;;  %v10512_v41 = vsub.s32 0, %v10501_v34 }
  0xce   :  { %2016 = vmatpush1.bf16.msra.mxu0 %v7975_v56  ;;  %v8008_v56 = vcombine.high %v1188_v45, %v1190_v46 }
  0xcf   :  { %2017 = vmatprep.subr.bf16.mxu0 %v7972_v61  ;;  %v8007_v61 = vcombine.low %v1188_v45, %v1190_v46  ;;  %v8857_v45 = vld [vmem:[%s13086_s3 + $0x4c4] ss:$16 sps:$4 sm:$0xff]   ;;  %v166_v46 = vrot.slane %v10506_v38, %v10512_v41 }
  0xd0   :  { %2059 = vmatpush1.bf16.msra.mxu1 %v8039_v60  ;;  %v8072_v60 = vcombine.high %v1252_v49, %v1254_v50 }
  0xd1   :  { %2060 = vmatprep.subr.bf16.mxu1 %v8036_v1  ;;  %v8071_v1 = vcombine.low %v1252_v49, %v1254_v50 }
  0xd2   :  { %2018 = vmatpush1.bf16.msra.mxu0 %v7971_v2  ;;  %v8004_v2 = vcombine.high %v1184_v53, %v1186_v54 }
  0xd3   :  { %2019 = vmatprep.subr.bf16.mxu0 %v7968_v6  ;;  %v8003_v6 = vcombine.low %v1184_v53, %v1186_v54  ;;  %v8860_v53 = vld [vmem:[%s13086_s3 + $0x4a4] ss:$16 sps:$4 sm:$0xff]  }
  0xd4   :  { %2061 = vmatpush1.bf16.msra.mxu1 %v8035_v5  ;;  %v8068_v5 = vcombine.high %v1248_v57, %v1250_v59 }
  0xd5   :  { %2062 = vmatprep.subr.bf16.mxu1 %v8032_v9  ;;  %v8067_v9 = vcombine.low %v1248_v57, %v1250_v59  ;;  %v8858_v57 = vld [vmem:[%s13086_s3 + $0x4a0] ss:$16 sps:$4 sm:$0xff]  }
  0xd6   :  { %2020 = vmatpush1.bf16.msra.mxu0 %v7967_v10  ;;  %v8000_v10 = vcombine.high %v1180_v62, %v1182_v0 }
  0xd7   :  { %2021 = vmatprep.subr.bf16.mxu0 %v7964_v12  ;;  %v1242_v12 = vld [vmem:[%s13084_s1 + $0xd58] sm:$0xff] }
  0xd8   :  { %2063 = vmatpush1.bf16.msra.mxu1 %v8031_v11  ;;  %v1240_v11 = vld [vmem:[%s13084_s1 + $0xd18] sm:$0xff] }
  0xd9   :  { %2064 = vmatprep.subr.bf16.mxu1 %v8028_v13  ;;  %v8064_v13 = vcombine.high %v1244_v3, %v1246_v4  ;;  %v8861_v4 = vld [vmem:[%s13086_s3 + $0x480] ss:$16 sps:$4 sm:$0xff]  }
  0xda   :  { %2022 = vmatpush1.bf16.msra.mxu0 %v7963_v18  ;;  %v7996_v18 = vcombine.high %v1176_v7, %v1178_v8 }
  0xdb   :  { %2023 = vmatprep.subr.bf16.mxu0 %v7960_v21  ;;  %v1238_v21 = vld [vmem:[%s13084_s1 + $0xcd8] sm:$0xff] }
  0xdc   :  { %2065 = vmatpush1.bf16.msra.mxu1 %v8027_v19  ;;  %v1236_v19 = vld [vmem:[%s13084_s1 + $0xc98] sm:$0xff] }
  0xdd   :  { %2066 = vmatprep.subr.bf16.mxu1 %v8024_v22  ;;  %v8060_v22 = vcombine.high %v1240_v11, %v1242_v12 }
  0xde   :  { %2024 = vmatpush1.bf16.msra.mxu0 %v7959_v28  ;;  %v8059_v28 = vcombine.low %v1240_v11, %v1242_v12 }
  0xdf   :  { %2025 = vmatprep.subr.bf16.mxu0 %v7956_v32  ;;  %v8056_v32 = vcombine.high %v1236_v19, %v1238_v21 }
  0xe0   :  { %2067 = vmatpush1.bf16.msra.mxu1 %v8023_v31  ;;  %v1234_v31 = vld [vmem:[%s13084_s1 + $0xc58] sm:$0xff] }
  0xe1   :  { %2068 = vmatprep.subr.bf16.mxu1 %v8020_v35  ;;  %v8055_v35 = vcombine.low %v1236_v19, %v1238_v21  ;;  %v8052_v37 = vcombine.high %v1232_v30, %v1234_v31  ;;  %v8051_v42 = vcombine.low %v1232_v30, %v1234_v31 }
  0xe2   :  { %2026 = vmatpush1.bf16.msra.mxu0 %v7955_v36  ;;  %v7988_v36 = vcombine.high %v1168_v25, %v1170_v26 }
  0xe3   :  { %2027 = vmatprep.subr.bf16.mxu0 %v8016_v40  ;;  %v7987_v40 = vcombine.low %v1168_v25, %v1170_v26 }
  0xe4   :  { %2069 = vmatpush1.bf16.msra.mxu1 %v8019_v39  ;;  %v8854_v39 = vld [vmem:[%s13086_s3 + $0x4e4] ss:$16 sps:$4 sm:$0xff]  }
  0xe5   :  { %2070 = vmatprep.subr.bf16.mxu1 %v8080_v43  ;;  %v10515_v43 = vsub.s32 1, %v10501_v34 }
  0xe6   :  { %2028 = vmatpush2.bf16.msra.mxu0 %v8015_v44  ;;  %v8852_v44 = vld [vmem:[%s13086_s3 + $0x4e0] ss:$16 sps:$4 sm:$0xff]  }
  0xe7   :  { %2029 = vmatprep.subr.bf16.mxu0 %v8012_v48  ;;  %v8855_v48 = vld [vmem:[%s13086_s3 + $0x4c0] ss:$16 sps:$4 sm:$0xff]  }
  0xe8   :  { %2071 = vmatpush2.bf16.msra.mxu1 %v8079_v47  ;;  %v170_v47 = vrot.slane %v10506_v38, %v10515_v43 }
  0xe9   :  { %2072 = vmatprep.subr.bf16.mxu1 %v8076_v51 }
  0xea   :  { %2030 = vmatpush2.bf16.msra.mxu0 %v8011_v52 }
  0xeb   :  { %2031 = vmatprep.subr.bf16.mxu0 %v8008_v56 }
  0xec   :  { %2073 = vmatpush2.bf16.msra.mxu1 %v8075_v55 }
  0xed   :  { %2074 = vmatprep.subr.bf16.mxu1 %v8072_v60 }
  0xee   :  { %2032 = vmatpush2.bf16.msra.mxu0 %v8007_v61 }
  0xef   :  { %2033 = vmatprep.subr.bf16.mxu0 %v8004_v2 }
  0xf0   :  { %2075 = vmatpush2.bf16.msra.mxu1 %v8071_v1  ;;  %v8863_v1 = vld [vmem:[%s13086_s3 + $0x484] ss:$16 sps:$4 sm:$0xff]  }
  0xf1   :  { %2076 = vmatprep.subr.bf16.mxu1 %v8068_v5 }
  0xf2   :  { %2034 = vmatpush2.bf16.msra.mxu0 %v8003_v6 }
  0xf3   :  { %2035 = vmatprep.subr.bf16.mxu0 %v8000_v10 }
  0xf4   :  { %2077 = vmatpush2.bf16.msra.mxu1 %v8067_v9  ;;  %v8866_v9 = vld [vmem:[%s13086_s3 + $0x464] ss:$16 sps:$4 sm:$0xff]  }
  0xf5   :  { %2078 = vmatprep.subr.bf16.mxu1 %v8064_v13 }
  0xf6   :  { %2036 = vmatpush2.bf16.msra.mxu0 %v7999_v14 }
  0xf7   :  { %2037 = vmatprep.subr.bf16.mxu0 %v7996_v18 }
  0xf8   :  { %2079 = vmatpush2.bf16.msra.mxu1 %v8063_v17 }
  0xf9   :  { %2080 = vmatprep.subr.bf16.mxu1 %v8060_v22 }
  0xfa   :  { %2038 = vmatpush2.bf16.msra.mxu0 %v7995_v24 }
  0xfb   :  { %2039 = vmatprep.subr.bf16.mxu0 %v7992_v29 }
  0xfc   :  { %2081 = vmatpush2.bf16.msra.mxu1 %v8059_v28 }
  0xfd   :  { %2082 = vmatprep.subr.bf16.mxu1 %v8056_v32 }
  0xfe   :  { %2040 = vmatpush2.bf16.msra.mxu0 %v7991_v33 }
  0xff   :  { %2041 = vmatprep.subr.bf16.mxu0 %v7988_v36 }
 0x100   :  { %2083 = vmatpush2.bf16.msra.mxu1 %v8055_v35 }
 0x101   :  { %2084 = vmatprep.subr.bf16.mxu1 %v8052_v37 }
 0x102   :  { %2042 = vmatpush2.bf16.msra.mxu0 %v7987_v40 }
 0x103   :  { %2877 = vmatprep.subr.bf16.mxu0 %v8854_v39 }
 0x104   :  { %2085 = vmatpush2.bf16.msra.mxu1 %v8051_v42 }
 0x105   :  { %v857_v49 = vpop.f32.mrf.mxu0  ;;  %2044 = vmatmul.mubr.bf16.vlgmr.msra.gmra.mxu0 %v9927_v20 }
 0x106   :  { %v858_v50 = vadd.f32 %v857_v49, %v166_v46  ;;  %2878 = vmatpush1.bf16.msra.mxu0 %v8852_v44 }
 0x107   :  { %v900_v51 = vpop.f32.mrf.mxu1  ;;  %2087 = vmatmul.mubr.bf16.vlgmr.msra.gmra.mxu1 %v9935_v23  ;;  %v859_v52 = vpop.f32.mrf.mxu0  ;;  %2879 = vmatprep.subr.bf16.mxu0 %v8857_v45 }
 0x108   :  { %v901_v54 = vadd.f32 %v900_v51, %v858_v50  ;;  %v860_v55 = vadd.f32 %v859_v52, %v170_v47 }
 0x109   :  { %v902_v56 = vpop.f32.mrf.mxu1  ;;  %v861_v59 = vpop.f32.mrf.mxu0 }
 0x10a   :  { %v903_v60 = vadd.f32 %v902_v56, %v860_v55  ;;  %v862_v61 = vadd.f32 %v861_v59, %v166_v46  ;;  %2880 = vmatpush1.bf16.msra.mxu0 %v8855_v48  ;;  %v995_v6 = vmax.f32 %v901_v54, 0.0 }
 0x10b   :  { %v904_v62 = vpop.f32.mrf.mxu1  ;;  %v863_v0 = vpop.f32.mrf.mxu0  ;;  %2881 = vmatprep.subr.bf16.mxu0 %v8860_v53 }
 0x10c   :  { %v905_v2 = vadd.f32 %v904_v62, %v862_v61  ;;  %v864_v3 = vadd.f32 %v863_v0, %v170_v47 }
 0x10d   :  { %v906_v5 = vpop.f32.mrf.mxu1 }
 0x10e   :  { %v999_v7 = vmax.f32 %v905_v2, 0.0  ;;  %v907_v8 = vadd.f32 %v906_v5, %v864_v3  ;;  %2882 = vmatpush1.bf16.msra.mxu0 %v8858_v57 }
 0x10f   :  { %2883 = vmatprep.subr.bf16.mxu0 %v8863_v1 }
 0x110   :  { %10 = vsyncpa [#allocation3], 0  ;;  %v996_v10 = vmax.f32 %v903_v60, 0.0  ;;  %v10547_v11 = vpack.c.bf16 %v999_v7, %v995_v6  ;;  %v1000_v12 = vmax.f32 %v907_v8, 0.0  ;;  %v8864_v14 = vld [vmem:[%s13086_s3 + $0x460] ss:$16 sps:$4 sm:$0xff]  }
 0x111   :  { %v8869_v15 = vld [vmem:[%s13086_s3 + $0x444] ss:$16 sps:$4 sm:$0xff]   ;;  %v8900_v17 = vld [vmem:[%s13086_s3 + $0x6e0] ss:$16 sps:$4 sm:$0xff]   ;;  %v10684_v2 = vsub.s32 2, %v10501_v34  ;;  %v10699_v7 = vsub.s32 3, %v10501_v34 }
 0x112   :  { %v10549_v13 = vpack.c.bf16 %v1000_v12, %v996_v10  ;;  %2884 = vmatpush1.bf16.msra.mxu0 %v8861_v4  ;;  %v8902_v16 = vld [vmem:[%s13086_s3 + $0x6e4] ss:$16 sps:$4 sm:$0xff]   ;;  %v8867_v18 = vld [vmem:[%s13086_s3 + $0x440] ss:$16 sps:$4 sm:$0xff]   ;;  %v8905_v6 = vld [vmem:[%s13086_s3 + $0x4ec] ss:$16 sps:$4 sm:$0xff]  }
 0x113   :  { %2885 = vmatprep.subr.bf16.mxu0 %v8866_v9  ;;  %2920 = vmatprep.subr.bf16.mxu1 %v8902_v16  ;;  %v8906_v19 = vld [vmem:[%s13086_s3 + $0x6c0] ss:$16 sps:$4 sm:$0xff]   ;;  %v8908_v21 = vld [vmem:[%s13086_s3 + $0x6c4] ss:$16 sps:$4 sm:$0xff]   ;;  %v174_v8 = vrot.slane %v10506_v38, %v10684_v2  ;;  %v178_v12 = vrot.slane %v10506_v38, %v10699_v7 }
 0x114   :  { %2921 = vmatpush1.bf16.msra.mxu1 %v8900_v17  ;;  %v8872_v22 = vld [vmem:[%s13086_s3 + $0x424] ss:$16 sps:$4 sm:$0xff]   ;;  %v8870_v24 = vld [vmem:[%s13086_s3 + $0x420] ss:$16 sps:$4 sm:$0xff]  }
 0x115   :  { %2922 = vmatprep.subr.bf16.mxu1 %v8908_v21  ;;  %v8912_v25 = vld [vmem:[%s13086_s3 + $0x6a0] ss:$16 sps:$4 sm:$0xff]   ;;  %v8914_v26 = vld [vmem:[%s13086_s3 + $0x6a4] ss:$16 sps:$4 sm:$0xff]  }
 0x116   :  { %2886 = vmatpush1.bf16.msra.mxu0 %v8864_v14  ;;  %v8875_v27 = vld [vmem:[%s13086_s3 + $0x404] ss:$16 sps:$4 sm:$0xff]   ;;  %v8873_v28 = vld [vmem:[%s13086_s3 + $0x400] ss:$16 sps:$4 sm:$0xff]  }
 0x117   :  { %2887 = vmatprep.subr.bf16.mxu0 %v8869_v15  ;;  %v8918_v29 = vld [vmem:[%s13086_s3 + $0x680] ss:$16 sps:$4 sm:$0xff]   ;;  %v8920_v30 = vld [vmem:[%s13086_s3 + $0x684] ss:$16 sps:$4 sm:$0xff]  }
 0x118   :  { %2923 = vmatpush1.bf16.msra.mxu1 %v8906_v19  ;;  %v8878_v31 = vld [vmem:[%s13086_s3 + $0x5e4] ss:$16 sps:$4 sm:$0xff]   ;;  %v8876_v32 = vld [vmem:[%s13086_s3 + $0x5e0] ss:$16 sps:$4 sm:$0xff]  }
 0x119   :  { %2924 = vmatprep.subr.bf16.mxu1 %v8914_v26  ;;  %v8924_v33 = vld [vmem:[%s13086_s3 + $0x660] ss:$16 sps:$4 sm:$0xff]   ;;  %v8926_v35 = vld [vmem:[%s13086_s3 + $0x664] ss:$16 sps:$4 sm:$0xff]  }
 0x11a   :  { %2888 = vmatpush1.bf16.msra.mxu0 %v8867_v18  ;;  %v8881_v36 = vld [vmem:[%s13086_s3 + $0x5c4] ss:$16 sps:$4 sm:$0xff]   ;;  %v8879_v37 = vld [vmem:[%s13086_s3 + $0x5c0] ss:$16 sps:$4 sm:$0xff]  }
 0x11b   :  { %2889 = vmatprep.subr.bf16.mxu0 %v8872_v22  ;;  %v8930_v39 = vld [vmem:[%s13086_s3 + $0x640] ss:$16 sps:$4 sm:$0xff]   ;;  %v8932_v40 = vld [vmem:[%s13086_s3 + $0x644] ss:$16 sps:$4 sm:$0xff]  }
 0x11c   :  { %2925 = vmatpush1.bf16.msra.mxu1 %v8912_v25  ;;  %v8884_v42 = vld [vmem:[%s13086_s3 + $0x5a4] ss:$16 sps:$4 sm:$0xff]   ;;  %v8882_v44 = vld [vmem:[%s13086_s3 + $0x5a0] ss:$16 sps:$4 sm:$0xff]  }
 0x11d   :  { %2926 = vmatprep.subr.bf16.mxu1 %v8920_v30  ;;  %v8936_v45 = vld [vmem:[%s13086_s3 + $0x620] ss:$16 sps:$4 sm:$0xff]   ;;  %v8938_v46 = vld [vmem:[%s13086_s3 + $0x624] ss:$16 sps:$4 sm:$0xff]  }
 0x11e   :  { %2890 = vmatpush1.bf16.msra.mxu0 %v8870_v24  ;;  %v8887_v47 = vld [vmem:[%s13086_s3 + $0x584] ss:$16 sps:$4 sm:$0xff]   ;;  %v8885_v48 = vld [vmem:[%s13086_s3 + $0x580] ss:$16 sps:$4 sm:$0xff]  }
 0x11f   :  { %2891 = vmatprep.subr.bf16.mxu0 %v8875_v27  ;;  %v8942_v49 = vld [vmem:[%s13086_s3 + $0x600] ss:$16 sps:$4 sm:$0xff]   ;;  %v8944_v50 = vld [vmem:[%s13086_s3 + $0x604] ss:$16 sps:$4 sm:$0xff]  }
 0x120   :  { %2927 = vmatpush1.bf16.msra.mxu1 %v8918_v29  ;;  %v8890_v51 = vld [vmem:[%s13086_s3 + $0x564] ss:$16 sps:$4 sm:$0xff]   ;;  %v8888_v52 = vld [vmem:[%s13086_s3 + $0x560] ss:$16 sps:$4 sm:$0xff]  }
 0x121   :  { %2928 = vmatprep.subr.bf16.mxu1 %v8926_v35  ;;  %v8948_v53 = vld [vmem:[%s13086_s3 + $0x7e0] ss:$16 sps:$4 sm:$0xff]   ;;  %v8950_v54 = vld [vmem:[%s13086_s3 + $0x7e4] ss:$16 sps:$4 sm:$0xff]  }
 0x122   :  { %2892 = vmatpush1.bf16.msra.mxu0 %v8873_v28  ;;  %v8893_v55 = vld [vmem:[%s13086_s3 + $0x544] ss:$16 sps:$4 sm:$0xff]   ;;  %v8891_v56 = vld [vmem:[%s13086_s3 + $0x540] ss:$16 sps:$4 sm:$0xff]  }
 0x123   :  { %2893 = vmatprep.subr.bf16.mxu0 %v8878_v31  ;;  %v8954_v57 = vld [vmem:[%s13086_s3 + $0x7c0] ss:$16 sps:$4 sm:$0xff]   ;;  %v8956_v59 = vld [vmem:[%s13086_s3 + $0x7c4] ss:$16 sps:$4 sm:$0xff]  }
 0x124   :  { %2929 = vmatpush1.bf16.msra.mxu1 %v8924_v33  ;;  %v8896_v60 = vld [vmem:[%s13086_s3 + $0x524] ss:$16 sps:$4 sm:$0xff]   ;;  %v8894_v61 = vld [vmem:[%s13086_s3 + $0x520] ss:$16 sps:$4 sm:$0xff]  }
 0x125   :  { %2930 = vmatprep.subr.bf16.mxu1 %v8932_v40  ;;  %v8960_v62 = vld [vmem:[%s13086_s3 + $0x7a0] ss:$16 sps:$4 sm:$0xff]   ;;  %v8962_v0 = vld [vmem:[%s13086_s3 + $0x7a4] ss:$16 sps:$4 sm:$0xff]  }
 0x126   :  { %2894 = vmatpush2.bf16.msra.mxu0 %v8876_v32  ;;  %v8899_v1 = vld [vmem:[%s13086_s3 + $0x504] ss:$16 sps:$4 sm:$0xff]   ;;  %v8897_v3 = vld [vmem:[%s13086_s3 + $0x500] ss:$16 sps:$4 sm:$0xff]  }
 0x127   :  { %2895 = vmatprep.subr.bf16.mxu0 %v8881_v36  ;;  %v8966_v4 = vld [vmem:[%s13086_s3 + $0x780] ss:$16 sps:$4 sm:$0xff]   ;;  %v8968_v5 = vld [vmem:[%s13086_s3 + $0x784] ss:$16 sps:$4 sm:$0xff]  }
 0x128   :  { %2931 = vmatpush1.bf16.msra.mxu1 %v8930_v39  ;;  %v8972_v9 = vld [vmem:[%s13086_s3 + $0x760] ss:$16 sps:$4 sm:$0xff]   ;;  %v8974_v10 = vld [vmem:[%s13086_s3 + $0x764] ss:$16 sps:$4 sm:$0xff]  }
 0x129   :  { %2932 = vmatprep.subr.bf16.mxu1 %v8938_v46  ;;  %v8980_v17 = vld [vmem:[%s13086_s3 + $0x744] ss:$16 sps:$4 sm:$0xff]   ;;  %v8978_v22 = vld [vmem:[%s13086_s3 + $0x740] ss:$16 sps:$4 sm:$0xff]   ;;  %v8998_v46 = vld [vmem:[%s13086_s3 + $0x6ec] ss:$16 sps:$4 sm:$0xff]  }
 0x12a   :  { %2896 = vmatpush2.bf16.msra.mxu0 %v8879_v37  ;;  %v8986_v28 = vld [vmem:[%s13086_s3 + $0x724] ss:$16 sps:$4 sm:$0xff]   ;;  %v8984_v31 = vld [vmem:[%s13086_s3 + $0x720] ss:$16 sps:$4 sm:$0xff]  }
 0x12b   :  { %2897 = vmatprep.subr.bf16.mxu0 %v8884_v42  ;;  %v8992_v37 = vld [vmem:[%s13086_s3 + $0x704] ss:$16 sps:$4 sm:$0xff]  }
 0x12c   :  { %2933 = vmatpush1.bf16.msra.mxu1 %v8936_v45 }
 0x12d   :  { %2934 = vmatprep.subr.bf16.mxu1 %v8944_v50 }
 0x12e   :  { %2898 = vmatpush2.bf16.msra.mxu0 %v8882_v44  ;;  %v8990_v44 = vld [vmem:[%s13086_s3 + $0x700] ss:$16 sps:$4 sm:$0xff]  }
 0x12f   :  { %2899 = vmatprep.subr.bf16.mxu0 %v8887_v47  ;;  %v10739_v47 = vld [vmem:[%s13085_s2 + $0x4] sm:$0xf] }
 0x130   :  { %2935 = vmatpush1.bf16.msra.mxu1 %v8942_v49  ;;  %v1268_v49 = vrot.slane %v10739_v47, %v10512_v41 }
 0x131   :  { %2936 = vmatprep.subr.bf16.mxu1 %v8950_v54 }
 0x132   :  { %2900 = vmatpush2.bf16.msra.mxu0 %v8885_v48  ;;  %v1272_v48 = vrot.slane %v10739_v47, %v10515_v43 }
 0x133   :  { %2901 = vmatprep.subr.bf16.mxu0 %v8890_v51 }
 0x134   :  { %2937 = vmatpush2.bf16.msra.mxu1 %v8948_v53 }
 0x135   :  { %2938 = vmatprep.subr.bf16.mxu1 %v8956_v59 }
 0x136   :  { %2902 = vmatpush2.bf16.msra.mxu0 %v8888_v52 }
 0x137   :  { %2903 = vmatprep.subr.bf16.mxu0 %v8893_v55 }
 0x138   :  { %2939 = vmatpush2.bf16.msra.mxu1 %v8954_v57 }
 0x139   :  { %2940 = vmatprep.subr.bf16.mxu1 %v8962_v0 }
 0x13a   :  { %2904 = vmatpush2.bf16.msra.mxu0 %v8891_v56 }
 0x13b   :  { %2905 = vmatprep.subr.bf16.mxu0 %v8896_v60 }
 0x13c   :  { %2941 = vmatpush2.bf16.msra.mxu1 %v8960_v62 }
 0x13d   :  { %2942 = vmatprep.subr.bf16.mxu1 %v8968_v5 }
 0x13e   :  { %2906 = vmatpush2.bf16.msra.mxu0 %v8894_v61 }
 0x13f   :  { %2907 = vmatprep.subr.bf16.mxu0 %v8899_v1 }
 0x140   :  { %2943 = vmatpush2.bf16.msra.mxu1 %v8966_v4 }
 0x141   :  { %2944 = vmatprep.subr.bf16.mxu1 %v8974_v10 }
 0x142   :  { %2908 = vmatpush2.bf16.msra.mxu0 %v8897_v3 }
 0x143   :  { %2963 = vmatprep.subr.bf16.mxu0 %v8905_v6 }
 0x144   :  { %2945 = vmatpush2.bf16.msra.mxu1 %v8972_v9 }
 0x145   :  { %v943_v34 = vpop.f32.mrf.mxu0  ;;  %2946 = vmatprep.subr.bf16.mxu1 %v8980_v17  ;;  %v8915_v17 = vld [vmem:[%s13086_s3 + $0x4a8] ss:$16 sps:$4 sm:$0xff]  }
 0x146   :  { %v944_v14 = vadd.f32 %v943_v34, %v174_v8 }
 0x147   :  { %v986_v15 = vpop.f32.mrf.mxu1  ;;  %v945_v16 = vpop.f32.mrf.mxu0 }
 0x148   :  { %v987_v18 = vadd.f32 %v986_v15, %v944_v14  ;;  %v946_v19 = vadd.f32 %v945_v16, %v178_v12  ;;  %2947 = vmatpush2.bf16.msra.mxu1 %v8978_v22  ;;  %v8911_v14 = vld [vmem:[%s13086_s3 + $0x4cc] ss:$16 sps:$4 sm:$0xff]   ;;  %v8909_v15 = vld [vmem:[%s13086_s3 + $0x4c8] ss:$16 sps:$4 sm:$0xff]  }
 0x149   :  { %v988_v21 = vpop.f32.mrf.mxu1  ;;  %v947_v24 = vpop.f32.mrf.mxu0  ;;  %2948 = vmatprep.subr.bf16.mxu1 %v8986_v28  ;;  %v8917_v16 = vld [vmem:[%s13086_s3 + $0x4ac] ss:$16 sps:$4 sm:$0xff]   ;;  %v8927_v22 = vld [vmem:[%s13086_s3 + $0x468] ss:$16 sps:$4 sm:$0xff]  }
 0x14a   :  { %v989_v38 = vadd.f32 %v988_v21, %v946_v19  ;;  %v948_v25 = vadd.f32 %v947_v24, %v174_v8  ;;  %v997_v33 = vmax.f32 %v987_v18, 0.0  ;;  %v8923_v18 = vld [vmem:[%s13086_s3 + $0x48c] ss:$16 sps:$4 sm:$0xff]   ;;  %v8921_v19 = vld [vmem:[%s13086_s3 + $0x488] ss:$16 sps:$4 sm:$0xff]  }
 0x14b   :  { %v990_v26 = vpop.f32.mrf.mxu1  ;;  %v949_v27 = vpop.f32.mrf.mxu0  ;;  %v8929_v21 = vld [vmem:[%s13086_s3 + $0x46c] ss:$16 sps:$4 sm:$0xff]   ;;  %v8945_v28 = vld [vmem:[%s13086_s3 + $0x408] ss:$16 sps:$4 sm:$0xff]  }
 0x14c   :  { %v991_v29 = vadd.f32 %v990_v26, %v948_v25  ;;  %v950_v30 = vadd.f32 %v949_v27, %v178_v12  ;;  %2949 = vmatpush2.bf16.msra.mxu1 %v8984_v31  ;;  %v998_v39 = vmax.f32 %v989_v38, 0.0  ;;  %v8903_v12 = vld [vmem:[%s13086_s3 + $0x4e8] ss:$16 sps:$4 sm:$0xff]   ;;  %v8935_v24 = vld [vmem:[%s13086_s3 + $0x44c] ss:$16 sps:$4 sm:$0xff]  }
 0x14d   :  { %v992_v32 = vpop.f32.mrf.mxu1  ;;  %2950 = vmatprep.subr.bf16.mxu1 %v8992_v37  ;;  %v8933_v38 = vld [vmem:[%s13086_s3 + $0x448] ss:$16 sps:$4 sm:$0xff]   ;;  %v8941_v25 = vld [vmem:[%s13086_s3 + $0x42c] ss:$16 sps:$4 sm:$0xff]  }
 0x14e   :  { %v1001_v35 = vmax.f32 %v991_v29, 0.0  ;;  %v993_v36 = vadd.f32 %v992_v32, %v950_v30  ;;  %v8939_v26 = vld [vmem:[%s13086_s3 + $0x428] ss:$16 sps:$4 sm:$0xff]   ;;  %v8947_v27 = vld [vmem:[%s13086_s3 + $0x40c] ss:$16 sps:$4 sm:$0xff]  }
 0x14f   :  { %v8953_v29 = vld [vmem:[%s13086_s3 + $0x5ec] ss:$16 sps:$4 sm:$0xff]   ;;  %v8951_v30 = vld [vmem:[%s13086_s3 + $0x5e8] ss:$16 sps:$4 sm:$0xff]  }
 0x150   :  { %v10726_v40 = vpack.c.bf16 %v1001_v35, %v997_v33  ;;  %v1002_v42 = vmax.f32 %v993_v36, 0.0  ;;  %2951 = vmatpush2.bf16.msra.mxu1 %v8990_v44  ;;  %v8959_v31 = vld [vmem:[%s13086_s3 + $0x5cc] ss:$16 sps:$4 sm:$0xff]   ;;  %v8957_v32 = vld [vmem:[%s13086_s3 + $0x5c8] ss:$16 sps:$4 sm:$0xff]  }
 0x151   :  { %3006 = vmatprep.subr.bf16.mxu1 %v8998_v46  ;;  %v8965_v33 = vld [vmem:[%s13086_s3 + $0x5ac] ss:$16 sps:$4 sm:$0xff]   ;;  %v8963_v35 = vld [vmem:[%s13086_s3 + $0x5a8] ss:$16 sps:$4 sm:$0xff]   ;;  %v1280_v46 = vrot.slane %v10739_v47, %v10699_v7 }
 0x152   :  { %v10731_v45 = vpack.c.bf16 %v1002_v42, %v998_v39  ;;  %v8971_v36 = vld [vmem:[%s13086_s3 + $0x58c] ss:$16 sps:$4 sm:$0xff]   ;;  %v8969_v37 = vld [vmem:[%s13086_s3 + $0x588] ss:$16 sps:$4 sm:$0xff]  }
 0x153   :  { %v8977_v39 = vld [vmem:[%s13086_s3 + $0x56c] ss:$16 sps:$4 sm:$0xff]   ;;  %v8975_v42 = vld [vmem:[%s13086_s3 + $0x568] ss:$16 sps:$4 sm:$0xff]  }
 0x154   :  { %v8983_v44 = vld [vmem:[%s13086_s3 + $0x54c] ss:$16 sps:$4 sm:$0xff]  }
 0x185   :  { %v1959_v50 = vpop.f32.mrf.mxu0 }
 0x186   :  { %v1960_v55 = vadd.f32 %v1959_v50, %v1268_v49 }
 0x187   :  { %v2002_v51 = vpop.f32.mrf.mxu1  ;;  %v1961_v52 = vpop.f32.mrf.mxu0 }
 0x188   :  { %v1962_v53 = vadd.f32 %v1961_v52, %v1272_v48  ;;  %v2003_v1 = vadd.f32 %v2002_v51, %v1960_v55  ;;  %v8981_v51 = vld [vmem:[%s13086_s3 + $0x548] ss:$16 sps:$4 sm:$0xff]  }
 0x189   :  { %v2004_v54 = vpop.f32.mrf.mxu1  ;;  %v1963_v56 = vpop.f32.mrf.mxu0 }
 0x18a   :  { %v1964_v57 = vadd.f32 %v1963_v56, %v1268_v49  ;;  %v2005_v61 = vadd.f32 %v2004_v54, %v1962_v53  ;;  %v2097_v9 = vmax.f32 %v2003_v1, 0.0  ;;  %v8989_v53 = vld [vmem:[%s13086_s3 + $0x52c] ss:$16 sps:$4 sm:$0xff]  }
 0x18b   :  { %v2006_v59 = vpop.f32.mrf.mxu1  ;;  %v1965_v60 = vpop.f32.mrf.mxu0 }
 0x18c   :  { %v2007_v62 = vadd.f32 %v2006_v59, %v1964_v57  ;;  %v1966_v0 = vadd.f32 %v1965_v60, %v1272_v48  ;;  %v2098_v6 = vmax.f32 %v2005_v61, 0.0  ;;  %v1276_v48 = vrot.slane %v10739_v47, %v10684_v2  ;;  %v8987_v47 = vld [vmem:[%s13086_s3 + $0x528] ss:$16 sps:$4 sm:$0xff]  }
 0x18d   :  { %v2008_v3 = vpop.f32.mrf.mxu1 }
 0x18e   :  { %v2009_v4 = vadd.f32 %v2008_v3, %v1966_v0  ;;  %v2101_v5 = vmax.f32 %v2007_v62, 0.0  ;;  %v8995_v62 = vld [vmem:[%s13086_s3 + $0x50c] ss:$16 sps:$4 sm:$0xff]  }
 0x190   :  { %v2102_v8 = vmax.f32 %v2009_v4, 0.0  ;;  %v10748_v34 = vpack.c.bf16 %v2101_v5, %v2097_v9 }
 0x192   :  { %v2106_v10 = vpack.c.bf16 %v2102_v8, %v2098_v6  ;;  %v8993_v8 = vld [vmem:[%s13086_s3 + $0x508] ss:$16 sps:$4 sm:$0xff]  }
 0x194   :  { %2909 = vmatprep.mubr.bf16.mxu0 %v2106_v10 }
 0x195   :  { %2910 = vmatmul.mubr.bf16.vlgmr.msra.gmra.mxu0 %v10748_v34 }
 0x196   :  { %2964 = vmatpush1.bf16.msra.mxu0 %v8903_v12  ;;  %2995 = vmatprep.mubr.bf16.mxu0 %v2106_v10  ;;  %v9001_v10 = vld [vmem:[%s13086_s3 + $0xe4] ss:$16 sps:$4 sm:$0xff]  }
 0x197   :  { %2965 = vmatprep.subr.bf16.mxu0 %v8911_v14 }
 0x19a   :  { %2966 = vmatpush1.bf16.msra.mxu0 %v8909_v15 }
 0x19b   :  { %2967 = vmatprep.subr.bf16.mxu0 %v8917_v16 }
 0x19e   :  { %2968 = vmatpush1.bf16.msra.mxu0 %v8915_v17  ;;  %v8996_v17 = vld [vmem:[%s13086_s3 + $0x6e8] ss:$16 sps:$4 sm:$0xff]  }
 0x19f   :  { %2969 = vmatprep.subr.bf16.mxu0 %v8923_v18  ;;  %v8999_v18 = vld [vmem:[%s13086_s3 + $0xe0] ss:$16 sps:$4 sm:$0xff]  }
 0x1a2   :  { %2970 = vmatpush1.bf16.msra.mxu0 %v8921_v19 }
 0x1a3   :  { %2971 = vmatprep.subr.bf16.mxu0 %v8929_v21  ;;  %v9004_v21 = vld [vmem:[%s13086_s3 + $0x6cc] ss:$16 sps:$4 sm:$0xff]  }
 0x1a6   :  { %2972 = vmatpush1.bf16.msra.mxu0 %v8927_v22  ;;  %v9007_v22 = vld [vmem:[%s13086_s3 + $0xc4] ss:$16 sps:$4 sm:$0xff]  }
 0x1a7   :  { %2973 = vmatprep.subr.bf16.mxu0 %v8935_v24  ;;  %v9002_v24 = vld [vmem:[%s13086_s3 + $0x6c8] ss:$16 sps:$4 sm:$0xff]  }
 0x1aa   :  { %2974 = vmatpush1.bf16.msra.mxu0 %v8933_v38  ;;  %v9005_v38 = vld [vmem:[%s13086_s3 + $0xc0] ss:$16 sps:$4 sm:$0xff]  }
 0x1ab   :  { %2975 = vmatprep.subr.bf16.mxu0 %v8941_v25  ;;  %v9010_v25 = vld [vmem:[%s13086_s3 + $0x6ac] ss:$16 sps:$4 sm:$0xff]  }
 0x1ae   :  { %2976 = vmatpush1.bf16.msra.mxu0 %v8939_v26  ;;  %v9008_v26 = vld [vmem:[%s13086_s3 + $0x6a8] ss:$16 sps:$4 sm:$0xff]  }
 0x1af   :  { %2977 = vmatprep.subr.bf16.mxu0 %v8947_v27  ;;  %v9011_v27 = vld [vmem:[%s13086_s3 + $0xa0] ss:$16 sps:$4 sm:$0xff]  }
 0x1b2   :  { %2978 = vmatpush1.bf16.msra.mxu0 %v8945_v28  ;;  %v9016_v28 = vld [vmem:[%s13086_s3 + $0x68c] ss:$16 sps:$4 sm:$0xff]  }
 0x1b3   :  { %2979 = vmatprep.subr.bf16.mxu0 %v8953_v29  ;;  %v9019_v29 = vld [vmem:[%s13086_s3 + $0x84] ss:$16 sps:$4 sm:$0xff]  }
 0x1b6   :  { %2980 = vmatpush2.bf16.msra.mxu0 %v8951_v30  ;;  %v9014_v30 = vld [vmem:[%s13086_s3 + $0x688] ss:$16 sps:$4 sm:$0xff]  }
 0x1b7   :  { %2981 = vmatprep.subr.bf16.mxu0 %v8959_v31  ;;  %v9017_v31 = vld [vmem:[%s13086_s3 + $0x80] ss:$16 sps:$4 sm:$0xff]  }
 0x1ba   :  { %2982 = vmatpush2.bf16.msra.mxu0 %v8957_v32  ;;  %v9022_v32 = vld [vmem:[%s13086_s3 + $0x66c] ss:$16 sps:$4 sm:$0xff]  }
 0x1bb   :  { %2983 = vmatprep.subr.bf16.mxu0 %v8965_v33  ;;  %v9025_v33 = vld [vmem:[%s13086_s3 + $0x64] ss:$16 sps:$4 sm:$0xff]  }
 0x1be   :  { %2984 = vmatpush2.bf16.msra.mxu0 %v8963_v35  ;;  %v9020_v35 = vld [vmem:[%s13086_s3 + $0x668] ss:$16 sps:$4 sm:$0xff]  }
 0x1bf   :  { %2985 = vmatprep.subr.bf16.mxu0 %v8971_v36  ;;  %v9023_v36 = vld [vmem:[%s13086_s3 + $0x60] ss:$16 sps:$4 sm:$0xff]  }
 0x1c2   :  { %2986 = vmatpush2.bf16.msra.mxu0 %v8969_v37  ;;  %v9028_v37 = vld [vmem:[%s13086_s3 + $0x64c] ss:$16 sps:$4 sm:$0xff]  }
 0x1c3   :  { %2987 = vmatprep.subr.bf16.mxu0 %v8977_v39  ;;  %v9031_v39 = vld [vmem:[%s13086_s3 + $0x44] ss:$16 sps:$4 sm:$0xff]  }
 0x1c5   :  { %v2045_v49 = vpop.f32.mrf.mxu0 }
 0x1c6   :  { %2988 = vmatpush2.bf16.msra.mxu0 %v8975_v42  ;;  %v2046_v56 = vadd.f32 %v2045_v49, %v1276_v48  ;;  %v9026_v42 = vld [vmem:[%s13086_s3 + $0x648] ss:$16 sps:$4 sm:$0xff]  }
 0x1c7   :  { %v2088_v50 = vpop.f32.mrf.mxu1  ;;  %v2047_v52 = vpop.f32.mrf.mxu0  ;;  %2989 = vmatprep.subr.bf16.mxu0 %v8983_v44  ;;  %v9029_v44 = vld [vmem:[%s13086_s3 + $0x40] ss:$16 sps:$4 sm:$0xff]   ;;  %v9032_v49 = vld [vmem:[%s13086_s3 + $0x628] ss:$16 sps:$4 sm:$0xff]  }
 0x1c8   :  { %v2048_v54 = vadd.f32 %v2047_v52, %v1280_v46  ;;  %v2089_v4 = vadd.f32 %v2088_v50, %v2046_v56  ;;  %v9035_v50 = vld [vmem:[%s13086_s3 + $0x20] ss:$16 sps:$4 sm:$0xff]   ;;  %v9043_v52 = vld [vmem:[%s13086_s3 + $0x4] ss:$16 sps:$4 sm:$0xff]  }
 0x1c9   :  { %v2090_v55 = vpop.f32.mrf.mxu1  ;;  %v2049_v57 = vpop.f32.mrf.mxu0  ;;  %v9049_v56 = vld [vmem:[%s13086_s3 + $0x1e4] ss:$16 sps:$4 sm:$0xff]  }
 0x1ca   :  { %v2050_v59 = vadd.f32 %v2049_v57, %v1276_v48  ;;  %2990 = vmatpush2.bf16.msra.mxu0 %v8981_v51  ;;  %v2091_v0 = vadd.f32 %v2090_v55, %v2048_v54  ;;  %v2099_v15 = vmax.f32 %v2089_v4, 0.0  ;;  %v9037_v48 = vld [vmem:[%s13086_s3 + $0x24] ss:$16 sps:$4 sm:$0xff]   ;;  %v9040_v51 = vld [vmem:[%s13086_s3 + $0x60c] ss:$16 sps:$4 sm:$0xff]  }
 0x1cb   :  { %v2092_v60 = vpop.f32.mrf.mxu1  ;;  %v2051_v61 = vpop.f32.mrf.mxu0  ;;  %2991 = vmatprep.subr.bf16.mxu0 %v8989_v53  ;;  %v9038_v53 = vld [vmem:[%s13086_s3 + $0x608] ss:$16 sps:$4 sm:$0xff]   ;;  %v9041_v54 = vld [vmem:[%s13086_s3] ss:$16 sps:$4 sm:$0xff]   ;;  %v9046_v55 = vld [vmem:[%s13086_s3 + $0x7ec] ss:$16 sps:$4 sm:$0xff]  }
 0x1cc   :  { %v2093_v1 = vadd.f32 %v2092_v60, %v2050_v59  ;;  %v2052_v3 = vadd.f32 %v2051_v61, %v1280_v46  ;;  %v2100_v12 = vmax.f32 %v2091_v0, 0.0  ;;  %v9034_v46 = vld [vmem:[%s13086_s3 + $0x62c] ss:$16 sps:$4 sm:$0xff]   ;;  %v9044_v57 = vld [vmem:[%s13086_s3 + $0x7e8] ss:$16 sps:$4 sm:$0xff]  }
 0x1cd   :  { %v2094_v5 = vpop.f32.mrf.mxu1  ;;  %v9047_v59 = vld [vmem:[%s13086_s3 + $0x1e0] ss:$16 sps:$4 sm:$0xff]   ;;  %v9052_v60 = vld [vmem:[%s13086_s3 + $0x7cc] ss:$16 sps:$4 sm:$0xff]   ;;  %v9050_v61 = vld [vmem:[%s13086_s3 + $0x7c8] ss:$16 sps:$4 sm:$0xff]  }
 0x1ce   :  { %v2095_v6 = vadd.f32 %v2094_v5, %v2052_v3  ;;  %2992 = vmatpush2.bf16.msra.mxu0 %v8987_v47  ;;  %v2103_v9 = vmax.f32 %v2093_v1, 0.0  ;;  %v9055_v47 = vld [vmem:[%s13086_s3 + $0x1c4] ss:$16 sps:$4 sm:$0xff]   ;;  %v9058_v0 = vld [vmem:[%s13086_s3 + $0x7ac] ss:$16 sps:$4 sm:$0xff]  }
 0x1cf   :  { %2993 = vmatprep.subr.bf16.mxu0 %v8995_v62  ;;  %v9053_v62 = vld [vmem:[%s13086_s3 + $0x1c0] ss:$16 sps:$4 sm:$0xff]   ;;  %v9061_v1 = vld [vmem:[%s13086_s3 + $0x1a4] ss:$16 sps:$4 sm:$0xff]   ;;  %v9056_v3 = vld [vmem:[%s13086_s3 + $0x7a8] ss:$16 sps:$4 sm:$0xff]  }
 0x1d0   :  { %v2104_v14 = vmax.f32 %v2095_v6, 0.0  ;;  %v10854_v19 = vpack.c.bf16 %v2103_v9, %v2099_v15  ;;  %v9059_v4 = vld [vmem:[%s13086_s3 + $0x1a0] ss:$16 sps:$4 sm:$0xff]   ;;  %v9064_v5 = vld [vmem:[%s13086_s3 + $0x78c] ss:$16 sps:$4 sm:$0xff]  }
 0x1d1   :  { %v9067_v6 = vld [vmem:[%s13086_s3 + $0x184] ss:$16 sps:$4 sm:$0xff]   ;;  %v9065_v9 = vld [vmem:[%s13086_s3 + $0x180] ss:$16 sps:$4 sm:$0xff]  }
 0x1d2   :  { %v2108_v16 = vpack.c.bf16 %v2104_v14, %v2100_v12  ;;  %2994 = vmatpush2.bf16.msra.mxu0 %v8993_v8  ;;  %v9062_v8 = vld [vmem:[%s13086_s3 + $0x788] ss:$16 sps:$4 sm:$0xff]   ;;  %v9073_v12 = vld [vmem:[%s13086_s3 + $0x164] ss:$16 sps:$4 sm:$0xff]   ;;  %v9071_v15 = vld [vmem:[%s13086_s3 + $0x160] ss:$16 sps:$4 sm:$0xff]  }
 0x1d3   :  { %3689 = vmatprep.subr.bf16.mxu0 %v9001_v10  ;;  %v9070_v10 = vld [vmem:[%s13086_s3 + $0x76c] ss:$16 sps:$4 sm:$0xff]   ;;  %v9068_v14 = vld [vmem:[%s13086_s3 + $0x768] ss:$16 sps:$4 sm:$0xff]  }
 0x1d4   :  { %2952 = vmatprep.mubr.bf16.mxu1 %v2108_v16 }
 0x1d5   :  { %2996 = vmatmul.mubr.bf16.vlgmr.msra.gmra.mxu0 %v10748_v34  ;;  %2953 = vmatmul.mubr.bf16.vlgmr.msra.gmra.mxu1 %v10854_v19  ;;  %v9013_v34 = vld [vmem:[%s13086_s3 + $0xa4] ss:$16 sps:$4 sm:$0xff]  }
 0x1d6   :  { %3007 = vmatpush1.bf16.msra.mxu1 %v8996_v17  ;;  %3690 = vmatpush1.bf16.msra.mxu0 %v8999_v18  ;;  %v9079_v17 = vld [vmem:[%s13086_s3 + $0x144] ss:$16 sps:$4 sm:$0xff]   ;;  %v9074_v18 = vld [vmem:[%s13086_s3 + $0x748] ss:$16 sps:$4 sm:$0xff]  }
 0x1d7   :  { %3721 = vmatprep.mubr.bf16.mxu0 %v10549_v13  ;;  %3038 = vmatprep.mubr.bf16.mxu1 %v2108_v16  ;;  %v9076_v16 = vld [vmem:[%s13086_s3 + $0x74c] ss:$16 sps:$4 sm:$0xff]  }
 0x1d8   :  { %3008 = vmatprep.subr.bf16.mxu1 %v9004_v21  ;;  %3691 = vmatprep.subr.bf16.mxu0 %v9007_v22  ;;  %v9077_v21 = vld [vmem:[%s13086_s3 + $0x140] ss:$16 sps:$4 sm:$0xff]   ;;  %v9082_v22 = vld [vmem:[%s13086_s3 + $0x72c] ss:$16 sps:$4 sm:$0xff]  }
 0x1da   :  { %3009 = vmatpush1.bf16.msra.mxu1 %v9002_v24  ;;  %3692 = vmatpush1.bf16.msra.mxu0 %v9005_v38  ;;  %v9085_v24 = vld [vmem:[%s13086_s3 + $0x124] ss:$16 sps:$4 sm:$0xff]   ;;  %v9080_v38 = vld [vmem:[%s13086_s3 + $0x728] ss:$16 sps:$4 sm:$0xff]  }
 0x1db   :  { %3010 = vmatprep.subr.bf16.mxu1 %v9010_v25  ;;  %3693 = vmatprep.subr.bf16.mxu0 %v9013_v34  ;;  %v9083_v25 = vld [vmem:[%s13086_s3 + $0x120] ss:$16 sps:$4 sm:$0xff]   ;;  %v9088_v34 = vld [vmem:[%s13086_s3 + $0x70c] ss:$16 sps:$4 sm:$0xff]  }
 0x1de   :  { %3011 = vmatpush1.bf16.msra.mxu1 %v9008_v26  ;;  %3694 = vmatpush1.bf16.msra.mxu0 %v9011_v27  ;;  %v9091_v26 = vld [vmem:[%s13086_s3 + $0x104] ss:$16 sps:$4 sm:$0xff]   ;;  %v9086_v27 = vld [vmem:[%s13086_s3 + $0x708] ss:$16 sps:$4 sm:$0xff]  }
 0x1df   :  { %3012 = vmatprep.subr.bf16.mxu1 %v9016_v28  ;;  %3695 = vmatprep.subr.bf16.mxu0 %v9019_v29  ;;  %v9089_v28 = vld [vmem:[%s13086_s3 + $0x100] ss:$16 sps:$4 sm:$0xff]   ;;  %v9094_v29 = vld [vmem:[%s13086_s3 + $0x2e4] ss:$16 sps:$4 sm:$0xff]  }
 0x1e2   :  { %3013 = vmatpush1.bf16.msra.mxu1 %v9014_v30  ;;  %3696 = vmatpush1.bf16.msra.mxu0 %v9017_v31  ;;  %v9097_v30 = vld [vmem:[%s13086_s3 + $0xec] ss:$16 sps:$4 sm:$0xff]   ;;  %v9092_v31 = vld [vmem:[%s13086_s3 + $0x2e0] ss:$16 sps:$4 sm:$0xff]  }
 0x1e3   :  { %3014 = vmatprep.subr.bf16.mxu1 %v9022_v32  ;;  %3697 = vmatprep.subr.bf16.mxu0 %v9025_v33  ;;  %v9095_v32 = vld [vmem:[%s13086_s3 + $0xe8] ss:$16 sps:$4 sm:$0xff]   ;;  %v9100_v33 = vld [vmem:[%s13086_s3 + $0x2c4] ss:$16 sps:$4 sm:$0xff]  }
 0x1e6   :  { %3015 = vmatpush1.bf16.msra.mxu1 %v9020_v35  ;;  %3698 = vmatpush1.bf16.msra.mxu0 %v9023_v36  ;;  %v9103_v35 = vld [vmem:[%s13086_s3 + $0xcc] ss:$16 sps:$4 sm:$0xff]   ;;  %v9098_v36 = vld [vmem:[%s13086_s3 + $0x2c0] ss:$16 sps:$4 sm:$0xff]  }
 0x1e7   :  { %3016 = vmatprep.subr.bf16.mxu1 %v9028_v37  ;;  %3699 = vmatprep.subr.bf16.mxu0 %v9031_v39  ;;  %v9101_v37 = vld [vmem:[%s13086_s3 + $0xc8] ss:$16 sps:$4 sm:$0xff]   ;;  %v9109_v39 = vld [vmem:[%s13086_s3 + $0xac] ss:$16 sps:$4 sm:$0xff]  }
 0x1ea   :  { %3017 = vmatpush1.bf16.msra.mxu1 %v9026_v42  ;;  %3700 = vmatpush1.bf16.msra.mxu0 %v9029_v44  ;;  %v9104_v42 = vld [vmem:[%s13086_s3 + $0x2a0] ss:$16 sps:$4 sm:$0xff]   ;;  %v9112_v44 = vld [vmem:[%s13086_s3 + $0x284] ss:$16 sps:$4 sm:$0xff]  }
 0x1eb   :  { %3018 = vmatprep.subr.bf16.mxu1 %v9034_v46  ;;  %3701 = vmatprep.subr.bf16.mxu0 %v9037_v48  ;;  %v9115_v46 = vld [vmem:[%s13086_s3 + $0x8c] ss:$16 sps:$4 sm:$0xff]   ;;  %v9110_v48 = vld [vmem:[%s13086_s3 + $0x280] ss:$16 sps:$4 sm:$0xff]  }
 0x1ee   :  { %3019 = vmatpush1.bf16.msra.mxu1 %v9032_v49  ;;  %3702 = vmatpush1.bf16.msra.mxu0 %v9035_v50  ;;  %v9113_v49 = vld [vmem:[%s13086_s3 + $0x88] ss:$16 sps:$4 sm:$0xff]   ;;  %v9118_v50 = vld [vmem:[%s13086_s3 + $0x264] ss:$16 sps:$4 sm:$0xff]  }
 0x1ef   :  { %3020 = vmatprep.subr.bf16.mxu1 %v9040_v51  ;;  %3703 = vmatprep.subr.bf16.mxu0 %v9043_v52  ;;  %v9121_v51 = vld [vmem:[%s13086_s3 + $0x6c] ss:$16 sps:$4 sm:$0xff]   ;;  %v9116_v52 = vld [vmem:[%s13086_s3 + $0x260] ss:$16 sps:$4 sm:$0xff]  }
 0x1f2   :  { %3021 = vmatpush1.bf16.msra.mxu1 %v9038_v53  ;;  %3704 = vmatpush1.bf16.msra.mxu0 %v9041_v54  ;;  %v9119_v53 = vld [vmem:[%s13086_s3 + $0x68] ss:$16 sps:$4 sm:$0xff]   ;;  %v9124_v54 = vld [vmem:[%s13086_s3 + $0x244] ss:$16 sps:$4 sm:$0xff]  }
 0x1f3   :  { %3022 = vmatprep.subr.bf16.mxu1 %v9046_v55  ;;  %3705 = vmatprep.subr.bf16.mxu0 %v9049_v56  ;;  %v9127_v55 = vld [vmem:[%s13086_s3 + $0x4c] ss:$16 sps:$4 sm:$0xff]   ;;  %v9122_v56 = vld [vmem:[%s13086_s3 + $0x240] ss:$16 sps:$4 sm:$0xff]  }
 0x1f6   :  { %3023 = vmatpush2.bf16.msra.mxu1 %v9044_v57  ;;  %3706 = vmatpush2.bf16.msra.mxu0 %v9047_v59  ;;  %v9125_v57 = vld [vmem:[%s13086_s3 + $0x48] ss:$16 sps:$4 sm:$0xff]   ;;  %v9130_v59 = vld [vmem:[%s13086_s3 + $0x224] ss:$16 sps:$4 sm:$0xff]  }
 0x1f7   :  { %3024 = vmatprep.subr.bf16.mxu1 %v9052_v60  ;;  %3707 = vmatprep.subr.bf16.mxu0 %v9055_v47  ;;  %v9133_v60 = vld [vmem:[%s13086_s3 + $0x2c] ss:$16 sps:$4 sm:$0xff]   ;;  %v9128_v47 = vld [vmem:[%s13086_s3 + $0x220] ss:$16 sps:$4 sm:$0xff]  }
 0x1fa   :  { %3025 = vmatpush2.bf16.msra.mxu1 %v9050_v61  ;;  %3708 = vmatpush2.bf16.msra.mxu0 %v9053_v62  ;;  %v9131_v61 = vld [vmem:[%s13086_s3 + $0x28] ss:$16 sps:$4 sm:$0xff]   ;;  %v9136_v62 = vld [vmem:[%s13086_s3 + $0x204] ss:$16 sps:$4 sm:$0xff]  }
 0x1fb   :  { %3026 = vmatprep.subr.bf16.mxu1 %v9058_v0  ;;  %3709 = vmatprep.subr.bf16.mxu0 %v9061_v1  ;;  %v9139_v0 = vld [vmem:[%s13086_s3 + $0xc] ss:$16 sps:$4 sm:$0xff]   ;;  %v9134_v1 = vld [vmem:[%s13086_s3 + $0x200] ss:$16 sps:$4 sm:$0xff]  }
 0x1fe   :  { %3027 = vmatpush2.bf16.msra.mxu1 %v9056_v3  ;;  %3710 = vmatpush2.bf16.msra.mxu0 %v9059_v4  ;;  %v9137_v3 = vld [vmem:[%s13086_s3 + $0x8] ss:$16 sps:$4 sm:$0xff]   ;;  %v9142_v4 = vld [vmem:[%s13086_s3 + $0x3e4] ss:$16 sps:$4 sm:$0xff]  }
 0x1ff   :  { %3028 = vmatprep.subr.bf16.mxu1 %v9064_v5  ;;  %3711 = vmatprep.subr.bf16.mxu0 %v9067_v6  ;;  %v9145_v5 = vld [vmem:[%s13086_s3 + $0x1ec] ss:$16 sps:$4 sm:$0xff]   ;;  %v9140_v6 = vld [vmem:[%s13086_s3 + $0x3e0] ss:$16 sps:$4 sm:$0xff]  }
 0x202   :  { %3029 = vmatpush2.bf16.msra.mxu1 %v9062_v8  ;;  %3712 = vmatpush2.bf16.msra.mxu0 %v9065_v9  ;;  %v9143_v8 = vld [vmem:[%s13086_s3 + $0x1e8] ss:$16 sps:$4 sm:$0xff]   ;;  %v9148_v9 = vld [vmem:[%s13086_s3 + $0x3c4] ss:$16 sps:$4 sm:$0xff]  }
 0x203   :  { %3030 = vmatprep.subr.bf16.mxu1 %v9070_v10  ;;  %3713 = vmatprep.subr.bf16.mxu0 %v9073_v12  ;;  %v9151_v10 = vld [vmem:[%s13086_s3 + $0x1cc] ss:$16 sps:$4 sm:$0xff]   ;;  %v9146_v12 = vld [vmem:[%s13086_s3 + $0x3c0] ss:$16 sps:$4 sm:$0xff]  }
 0x206   :  { %3031 = vmatpush2.bf16.msra.mxu1 %v9068_v14  ;;  %3714 = vmatpush2.bf16.msra.mxu0 %v9071_v15  ;;  %v9149_v14 = vld [vmem:[%s13086_s3 + $0x1c8] ss:$16 sps:$4 sm:$0xff]   ;;  %v9154_v15 = vld [vmem:[%s13086_s3 + $0x3a4] ss:$16 sps:$4 sm:$0xff]  }
 0x207   :  { %3032 = vmatprep.subr.bf16.mxu1 %v9076_v16  ;;  %3715 = vmatprep.subr.bf16.mxu0 %v9079_v17  ;;  %v9157_v16 = vld [vmem:[%s13086_s3 + $0x1ac] ss:$16 sps:$4 sm:$0xff]   ;;  %v9152_v17 = vld [vmem:[%s13086_s3 + $0x3a0] ss:$16 sps:$4 sm:$0xff]  }
 0x20a   :  { %3033 = vmatpush2.bf16.msra.mxu1 %v9074_v18  ;;  %3716 = vmatpush2.bf16.msra.mxu0 %v9077_v21  ;;  %v9155_v18 = vld [vmem:[%s13086_s3 + $0x1a8] ss:$16 sps:$4 sm:$0xff]   ;;  %v9160_v21 = vld [vmem:[%s13086_s3 + $0x384] ss:$16 sps:$4 sm:$0xff]  }
 0x20b   :  { %3034 = vmatprep.subr.bf16.mxu1 %v9082_v22  ;;  %3717 = vmatprep.subr.bf16.mxu0 %v9085_v24  ;;  %v9163_v22 = vld [vmem:[%s13086_s3 + $0x18c] ss:$16 sps:$4 sm:$0xff]   ;;  %v9158_v24 = vld [vmem:[%s13086_s3 + $0x380] ss:$16 sps:$4 sm:$0xff]  }
 0x20e   :  { %3035 = vmatpush2.bf16.msra.mxu1 %v9080_v38  ;;  %3718 = vmatpush2.bf16.msra.mxu0 %v9083_v25  ;;  %v9161_v38 = vld [vmem:[%s13086_s3 + $0x188] ss:$16 sps:$4 sm:$0xff]   ;;  %v9166_v25 = vld [vmem:[%s13086_s3 + $0x364] ss:$16 sps:$4 sm:$0xff]  }
 0x20f   :  { %3036 = vmatprep.subr.bf16.mxu1 %v9088_v34  ;;  %3719 = vmatprep.subr.bf16.mxu0 %v9091_v26  ;;  %v9169_v34 = vld [vmem:[%s13086_s3 + $0x16c] ss:$16 sps:$4 sm:$0xff]   ;;  %v9164_v26 = vld [vmem:[%s13086_s3 + $0x360] ss:$16 sps:$4 sm:$0xff]  }
 0x212   :  { %3037 = vmatpush2.bf16.msra.mxu1 %v9086_v27  ;;  %3720 = vmatpush2.bf16.msra.mxu0 %v9089_v28  ;;  %v9167_v27 = vld [vmem:[%s13086_s3 + $0x168] ss:$16 sps:$4 sm:$0xff]   ;;  %v9172_v28 = vld [vmem:[%s13086_s3 + $0x344] ss:$16 sps:$4 sm:$0xff]  }
 0x213   :  { %3732 = vmatprep.subr.bf16.mxu1 %v9094_v29  ;;  %3775 = vmatprep.subr.bf16.mxu0 %v9097_v30  ;;  %v9175_v29 = vld [vmem:[%s13086_s3 + $0x14c] ss:$16 sps:$4 sm:$0xff]   ;;  %v9170_v30 = vld [vmem:[%s13086_s3 + $0x340] ss:$16 sps:$4 sm:$0xff]  }
 0x215   :  { %3039 = vmatmul.mubr.bf16.vlgmr.msra.gmra.mxu1 %v10854_v19  ;;  %3722 = vmatmul.mubr.bf16.vlgmr.msra.gmra.mxu0 %v10547_v11  ;;  %v9106_v19 = vld [vmem:[%s13086_s3 + $0x2a4] ss:$16 sps:$4 sm:$0xff]  }
 0x216   :  { %3733 = vmatpush1.bf16.msra.mxu1 %v9092_v31  ;;  %3764 = vmatprep.mubr.bf16.mxu1 %v10731_v45  ;;  %v9173_v31 = vld [vmem:[%s13086_s3 + $0x148] ss:$16 sps:$4 sm:$0xff]  }
 0x217   :  { %3776 = vmatpush1.bf16.msra.mxu0 %v9095_v32  ;;  %3807 = vmatprep.mubr.bf16.mxu0 %v10549_v13  ;;  %v9107_v13 = vld [vmem:[%s13086_s3 + $0xa8] ss:$16 sps:$4 sm:$0xff]   ;;  %v9178_v32 = vld [vmem:[%s13086_s3 + $0x324] ss:$16 sps:$4 sm:$0xff]  }
 0x218   :  { %3734 = vmatprep.subr.bf16.mxu1 %v9100_v33  ;;  %3777 = vmatprep.subr.bf16.mxu0 %v9103_v35  ;;  %v9181_v33 = vld [vmem:[%s13086_s3 + $0x12c] ss:$16 sps:$4 sm:$0xff]   ;;  %v9176_v35 = vld [vmem:[%s13086_s3 + $0x320] ss:$16 sps:$4 sm:$0xff]  }
 0x21a   :  { %3735 = vmatpush1.bf16.msra.mxu1 %v9098_v36  ;;  %v9179_v36 = vld [vmem:[%s13086_s3 + $0x128] ss:$16 sps:$4 sm:$0xff]  }
 0x21b   :  { %3778 = vmatpush1.bf16.msra.mxu0 %v9101_v37  ;;  %3736 = vmatprep.subr.bf16.mxu1 %v9106_v19  ;;  %v9184_v37 = vld [vmem:[%s13086_s3 + $0x304] ss:$16 sps:$4 sm:$0xff]   ;;  %v9187_v19 = vld [vmem:[%s13086_s3 + $0x10c] ss:$16 sps:$4 sm:$0xff]  }
 0x21c   :  { %3779 = vmatprep.subr.bf16.mxu0 %v9109_v39  ;;  %v3889_v39 = vld [vmem:[%s13084_s1 + $0x3a0] sm:$0xff] }
 0x21e   :  { %3737 = vmatpush1.bf16.msra.mxu1 %v9104_v42  ;;  %v3891_v42 = vld [vmem:[%s13084_s1 + $0x3e0] sm:$0xff] }
 0x21f   :  { %3780 = vmatpush1.bf16.msra.mxu0 %v9107_v13  ;;  %3738 = vmatprep.subr.bf16.mxu1 %v9112_v44  ;;  %v9182_v13 = vld [vmem:[%s13086_s3 + $0x300] ss:$16 sps:$4 sm:$0xff]   ;;  %v9185_v44 = vld [vmem:[%s13086_s3 + $0x108] ss:$16 sps:$4 sm:$0xff]  }
 0x220   :  { %3781 = vmatprep.subr.bf16.mxu0 %v9115_v46  ;;  %v9190_v46 = vld [vmem:[%s13086_s3 + $0x2ec] ss:$16 sps:$4 sm:$0xff]  }
 0x222   :  { %3739 = vmatpush1.bf16.msra.mxu1 %v9110_v48  ;;  %v8366_v48 = vcombine.high %v3889_v39, %v3891_v42 }
 0x223   :  { %3782 = vmatpush1.bf16.msra.mxu0 %v9113_v49  ;;  %3740 = vmatprep.subr.bf16.mxu1 %v9118_v50  ;;  %v9188_v49 = vld [vmem:[%s13086_s3 + $0x2e8] ss:$16 sps:$4 sm:$0xff]   ;;  %v3885_v50 = vld [vmem:[%s13084_s1 + $0x320] sm:$0xff] }
 0x224   :  { %3783 = vmatprep.subr.bf16.mxu0 %v9121_v51  ;;  %v3887_v51 = vld [vmem:[%s13084_s1 + $0x360] sm:$0xff] }
 0x226   :  { %3741 = vmatpush1.bf16.msra.mxu1 %v9116_v52  ;;  %v9193_v52 = vld [vmem:[%s13086_s3 + $0x2cc] ss:$16 sps:$4 sm:$0xff]  }
 0x227   :  { %3784 = vmatpush1.bf16.msra.mxu0 %v9119_v53  ;;  %3742 = vmatprep.subr.bf16.mxu1 %v9124_v54  ;;  %v8365_v53 = vcombine.low %v3889_v39, %v3891_v42  ;;  %v8362_v54 = vcombine.high %v3885_v50, %v3887_v51  ;;  %v3917_v39 = vld [vmem:[%s13084_s1 + $0x720] sm:$0xff] }
 0x228   :  { %3785 = vmatprep.subr.bf16.mxu0 %v9127_v55  ;;  %v9191_v55 = vld [vmem:[%s13086_s3 + $0x2c8] ss:$16 sps:$4 sm:$0xff]   ;;  %v3919_v42 = vld [vmem:[%s13084_s1 + $0x760] sm:$0xff] }
 0x22a   :  { %3743 = vmatpush1.bf16.msra.mxu1 %v9122_v56  ;;  %v3881_v56 = vld [vmem:[%s13084_s1 + $0x2a0] sm:$0xff] }
 0x22b   :  { %3786 = vmatpush1.bf16.msra.mxu0 %v9125_v57  ;;  %3744 = vmatprep.subr.bf16.mxu1 %v9130_v59  ;;  %v3883_v57 = vld [vmem:[%s13084_s1 + $0x2e0] sm:$0xff]  ;;  %v8361_v59 = vcombine.low %v3885_v50, %v3887_v51  ;;  %v9220_v51 = vld [vmem:[%s13086_s3 + $0x3ac] ss:$16 sps:$4 sm:$0xff]  }
 0x22c   :  { %3787 = vmatprep.subr.bf16.mxu0 %v9133_v60  ;;  %v8358_v60 = vcombine.high %v3881_v56, %v3883_v57  ;;  %v3915_v50 = vld [vmem:[%s13084_s1 + $0x6e0] sm:$0xff] }
 0x22e   :  { %3745 = vmatpush1.bf16.msra.mxu1 %v9128_v47  ;;  %v9194_v47 = vld [vmem:[%s13086_s3 + $0x2a8] ss:$16 sps:$4 sm:$0xff]  }
 0x22f   :  { %3788 = vmatpush1.bf16.msra.mxu0 %v9131_v61  ;;  %3746 = vmatprep.subr.bf16.mxu1 %v9136_v62  ;;  %v3879_v61 = vld [vmem:[%s13084_s1 + $0x260] sm:$0xff]  ;;  %v9199_v62 = vld [vmem:[%s13086_s3 + $0x28c] ss:$16 sps:$4 sm:$0xff]  }
 0x230   :  { %3789 = vmatprep.subr.bf16.mxu0 %v9139_v0  ;;  %v8357_v0 = vcombine.low %v3881_v56, %v3883_v57  ;;  %v3911_v56 = vld [vmem:[%s13084_s1 + $0x660] sm:$0xff]  ;;  %v9223_v57 = vld [vmem:[%s13086_s3 + $0x38c] ss:$16 sps:$4 sm:$0xff]  }
 0x232   :  { %3747 = vmatpush1.bf16.msra.mxu1 %v9134_v1 }
 0x233   :  { %3790 = vmatpush1.bf16.msra.mxu0 %v9137_v3  ;;  %3748 = vmatprep.subr.bf16.mxu1 %v9142_v4  ;;  %v9197_v3 = vld [vmem:[%s13086_s3 + $0x288] ss:$16 sps:$4 sm:$0xff]   ;;  %v3873_v4 = vld [vmem:[%s13084_s1 + $0x1a0] sm:$0xff] }
 0x234   :  { %3791 = vmatprep.subr.bf16.mxu0 %v9145_v5  ;;  %v3875_v5 = vld [vmem:[%s13084_s1 + $0x1e0] sm:$0xff] }
 0x236   :  { %3749 = vmatpush2.bf16.msra.mxu1 %v9140_v6  ;;  %v9202_v6 = vld [vmem:[%s13086_s3 + $0x26c] ss:$16 sps:$4 sm:$0xff]  }
 0x237   :  { %3792 = vmatpush2.bf16.msra.mxu0 %v9143_v8  ;;  %3750 = vmatprep.subr.bf16.mxu1 %v9148_v9  ;;  %v8350_v9 = vcombine.high %v3873_v4, %v3875_v5 }
 0x238   :  { %3793 = vmatprep.subr.bf16.mxu0 %v9151_v10  ;;  %v9200_v10 = vld [vmem:[%s13086_s3 + $0x268] ss:$16 sps:$4 sm:$0xff]  }
 0x23a   :  { %3751 = vmatpush2.bf16.msra.mxu1 %v9146_v12  ;;  %v3869_v12 = vld [vmem:[%s13084_s1 + $0x120] sm:$0xff] }
 0x23b   :  { %3794 = vmatpush2.bf16.msra.mxu0 %v9149_v14  ;;  %3752 = vmatprep.subr.bf16.mxu1 %v9154_v15  ;;  %v3871_v14 = vld [vmem:[%s13084_s1 + $0x160] sm:$0xff]  ;;  %v9205_v15 = vld [vmem:[%s13086_s3 + $0x24c] ss:$16 sps:$4 sm:$0xff]  }
 0x23c   :  { %3795 = vmatprep.subr.bf16.mxu0 %v9157_v16  ;;  %v8349_v16 = vcombine.low %v3873_v4, %v3875_v5  ;;  %v3903_v4 = vld [vmem:[%s13084_s1 + $0x560] sm:$0xff]  ;;  %v9229_v5 = vld [vmem:[%s13086_s3 + $0x34c] ss:$16 sps:$4 sm:$0xff]  }
 0x23e   :  { %3753 = vmatpush2.bf16.msra.mxu1 %v9152_v17  ;;  %v8346_v17 = vcombine.high %v3869_v12, %v3871_v14 }
 0x23f   :  { %3796 = vmatpush2.bf16.msra.mxu0 %v9155_v18  ;;  %3754 = vmatprep.subr.bf16.mxu1 %v9160_v21  ;;  %v9203_v18 = vld [vmem:[%s13086_s3 + $0x248] ss:$16 sps:$4 sm:$0xff]   ;;  %v3865_v21 = vld [vmem:[%s13084_s1 + $0xa0] sm:$0xff] }
 0x240   :  { %3797 = vmatprep.subr.bf16.mxu0 %v9163_v22  ;;  %v3867_v22 = vld [vmem:[%s13084_s1 + $0xe0] sm:$0xff] }
 0x242   :  { %3755 = vmatpush2.bf16.msra.mxu1 %v9158_v24  ;;  %v9208_v24 = vld [vmem:[%s13086_s3 + $0x22c] ss:$16 sps:$4 sm:$0xff]  }
 0x243   :  { %3798 = vmatpush2.bf16.msra.mxu0 %v9161_v38  ;;  %3756 = vmatprep.subr.bf16.mxu1 %v9166_v25  ;;  %v8345_v38 = vcombine.low %v3869_v12, %v3871_v14  ;;  %v8342_v25 = vcombine.high %v3865_v21, %v3867_v22  ;;  %v3899_v12 = vld [vmem:[%s13084_s1 + $0x4e0] sm:$0xff]  ;;  %v9232_v14 = vld [vmem:[%s13086_s3 + $0x32c] ss:$16 sps:$4 sm:$0xff]  }
 0x244   :  { %3799 = vmatprep.subr.bf16.mxu0 %v9169_v34  ;;  %v9206_v34 = vld [vmem:[%s13086_s3 + $0x228] ss:$16 sps:$4 sm:$0xff]  }
 0x246   :  { %3757 = vmatpush2.bf16.msra.mxu1 %v9164_v26  ;;  %v3861_v26 = vld [vmem:[%s13084_s1 + $0x20] sm:$0xff] }
 0x247   :  { %3800 = vmatpush2.bf16.msra.mxu0 %v9167_v27  ;;  %3758 = vmatprep.subr.bf16.mxu1 %v9172_v28  ;;  %v3863_v27 = vld [vmem:[%s13084_s1 + $0x60] sm:$0xff]  ;;  %v9211_v28 = vld [vmem:[%s13086_s3 + $0x20c] ss:$16 sps:$4 sm:$0xff]  }
 0x248   :  { %3801 = vmatprep.subr.bf16.mxu0 %v9175_v29  ;;  %v8341_v29 = vcombine.low %v3865_v21, %v3867_v22  ;;  %v3895_v21 = vld [vmem:[%s13084_s1 + $0x460] sm:$0xff]  ;;  %v9235_v22 = vld [vmem:[%s13086_s3 + $0x30c] ss:$16 sps:$4 sm:$0xff]  }
 0x24a   :  { %3759 = vmatpush2.bf16.msra.mxu1 %v9170_v30  ;;  %v8338_v30 = vcombine.high %v3861_v26, %v3863_v27 }
 0x24b   :  { %3802 = vmatpush2.bf16.msra.mxu0 %v9173_v31  ;;  %3760 = vmatprep.subr.bf16.mxu1 %v9178_v32  ;;  %v9209_v31 = vld [vmem:[%s13086_s3 + $0x208] ss:$16 sps:$4 sm:$0xff]   ;;  %v3921_v32 = vld [vmem:[%s13084_s1 + $0x7a0] sm:$0xff] }
 0x24c   :  { %3803 = vmatprep.subr.bf16.mxu0 %v9181_v33  ;;  %v3923_v33 = vld [vmem:[%s13084_s1 + $0x7e0] sm:$0xff] }
 0x24e   :  { %3761 = vmatpush2.bf16.msra.mxu1 %v9176_v35  ;;  %v9214_v35 = vld [vmem:[%s13086_s3 + $0x3ec] ss:$16 sps:$4 sm:$0xff]  }
 0x24f   :  { %3804 = vmatpush2.bf16.msra.mxu0 %v9179_v36  ;;  %3762 = vmatprep.subr.bf16.mxu1 %v9184_v37  ;;  %v8337_v36 = vcombine.low %v3861_v26, %v3863_v27  ;;  %v8398_v37 = vcombine.high %v3921_v32, %v3923_v33  ;;  %v9233_v26 = vld [vmem:[%s13086_s3 + $0x308] ss:$16 sps:$4 sm:$0xff]  }
 0x250   :  { %3805 = vmatprep.subr.bf16.mxu0 %v9187_v19  ;;  %v9212_v19 = vld [vmem:[%s13086_s3 + $0x3e8] ss:$16 sps:$4 sm:$0xff]  }
 0x251   :  { %v3890_v27 = vld [vmem:[%s13084_s1 + $0x3a8] sm:$0xff] }
 0x252   :  { %3763 = vmatpush2.bf16.msra.mxu1 %v9182_v13  ;;  %v9217_v13 = vld [vmem:[%s13086_s3 + $0x3cc] ss:$16 sps:$4 sm:$0xff]  }
 0x253   :  { %3806 = vmatpush2.bf16.msra.mxu0 %v9185_v44  ;;  %3818 = vmatprep.subr.bf16.mxu1 %v9190_v46  ;;  %v8397_v44 = vcombine.low %v3921_v32, %v3923_v33  ;;  %v8394_v46 = vcombine.high %v3917_v39, %v3919_v42  ;;  %v3951_v32 = vld [vmem:[%s13084_s1 + $0xb60] sm:$0xff] }
 0x254   :  { %4651 = vmatprep.subr.bf16.mxu0 %v8366_v48  ;;  %v9215_v48 = vld [vmem:[%s13086_s3 + $0x3c8] ss:$16 sps:$4 sm:$0xff]  }
 0x255   :  { %3765 = vmatmul.mubr.bf16.vlgmr.msra.gmra.mxu1 %v10726_v40 }
 0x256   :  { %3808 = vmatmul.mubr.bf16.vlgmr.msra.gmra.mxu0 %v10547_v11  ;;  %3819 = vmatpush1.bf16.msra.mxu1 %v9188_v49  ;;  %v9196_v11 = vld [vmem:[%s13086_s3 + $0x2ac] ss:$16 sps:$4 sm:$0xff]   ;;  %v3913_v49 = vld [vmem:[%s13084_s1 + $0x6a0] sm:$0xff] }
 0x257   :  { %3850 = vmatprep.mubr.bf16.mxu1 %v10731_v45  ;;  %3820 = vmatprep.subr.bf16.mxu1 %v9193_v52  ;;  %v3877_v45 = vld [vmem:[%s13084_s1 + $0x220] sm:$0xff]  ;;  %v8393_v52 = vcombine.low %v3917_v39, %v3919_v42 }
 0x258   :  { %4652 = vmatpush1.bf16.msra.mxu0 %v8365_v53  ;;  %4683 = vmatprep.mubr.bf16.mxu0 %v9783_v58  ;;  %v8354_v1 = vcombine.high %v3877_v45, %v3879_v61  ;;  %v8353_v8 = vcombine.low %v3877_v45, %v3879_v61  ;;  %v8390_v53 = vcombine.high %v3913_v49, %v3915_v50  ;;  %v3907_v45 = vld [vmem:[%s13084_s1 + $0x5e0] sm:$0xff]  ;;  %v9226_v61 = vld [vmem:[%s13086_s3 + $0x36c] ss:$16 sps:$4 sm:$0xff]  }
 0x259   :  { %4653 = vmatprep.subr.bf16.mxu0 %v8362_v54  ;;  %v9218_v54 = vld [vmem:[%s13086_s3 + $0x3a8] ss:$16 sps:$4 sm:$0xff]  }
 0x25a   :  { %3821 = vmatpush1.bf16.msra.mxu1 %v9191_v55  ;;  %v3909_v55 = vld [vmem:[%s13084_s1 + $0x620] sm:$0xff] }
 0x25b   :  { %3822 = vmatprep.subr.bf16.mxu1 %v9196_v11  ;;  %v8389_v11 = vcombine.low %v3913_v49, %v3915_v50 }
 0x25c   :  { %4654 = vmatpush1.bf16.msra.mxu0 %v8361_v59  ;;  %v8386_v59 = vcombine.high %v3909_v55, %v3911_v56 }
 0x25d   :  { %4655 = vmatprep.subr.bf16.mxu0 %v8358_v60  ;;  %v9221_v60 = vld [vmem:[%s13086_s3 + $0x388] ss:$16 sps:$4 sm:$0xff]  }
 0x25e   :  { %3823 = vmatpush1.bf16.msra.mxu1 %v9194_v47  ;;  %v3905_v47 = vld [vmem:[%s13084_s1 + $0x5a0] sm:$0xff] }
 0x25f   :  { %3824 = vmatprep.subr.bf16.mxu1 %v9199_v62  ;;  %v8385_v62 = vcombine.low %v3909_v55, %v3911_v56 }
 0x260   :  { %4656 = vmatpush1.bf16.msra.mxu0 %v8357_v0  ;;  %v8382_v0 = vcombine.high %v3905_v47, %v3907_v45 }
 0x261   :  { %4657 = vmatprep.subr.bf16.mxu0 %v8354_v1  ;;  %v9224_v1 = vld [vmem:[%s13086_s3 + $0x368] ss:$16 sps:$4 sm:$0xff]  }
 0x262   :  { %3825 = vmatpush1.bf16.msra.mxu1 %v9197_v3  ;;  %v3901_v3 = vld [vmem:[%s13084_s1 + $0x520] sm:$0xff] }
 0x263   :  { %3826 = vmatprep.subr.bf16.mxu1 %v9202_v6  ;;  %v8381_v6 = vcombine.low %v3905_v47, %v3907_v45 }
 0x264   :  { %4658 = vmatpush1.bf16.msra.mxu0 %v8353_v8  ;;  %v8378_v8 = vcombine.high %v3901_v3, %v3903_v4 }
 0x265   :  { %4659 = vmatprep.subr.bf16.mxu0 %v8350_v9  ;;  %v9227_v9 = vld [vmem:[%s13086_s3 + $0x348] ss:$16 sps:$4 sm:$0xff]  }
 0x266   :  { %3827 = vmatpush1.bf16.msra.mxu1 %v9200_v10  ;;  %v3897_v10 = vld [vmem:[%s13084_s1 + $0x4a0] sm:$0xff] }
 0x267   :  { %3828 = vmatprep.subr.bf16.mxu1 %v9205_v15  ;;  %v8377_v15 = vcombine.low %v3901_v3, %v3903_v4 }
 0x268   :  { %4660 = vmatpush1.bf16.msra.mxu0 %v8349_v16  ;;  %v8374_v16 = vcombine.high %v3897_v10, %v3899_v12 }
 0x269   :  { %4661 = vmatprep.subr.bf16.mxu0 %v8346_v17  ;;  %v9230_v17 = vld [vmem:[%s13086_s3 + $0x328] ss:$16 sps:$4 sm:$0xff]  }
 0x26a   :  { %3829 = vmatpush1.bf16.msra.mxu1 %v9203_v18  ;;  %v3893_v18 = vld [vmem:[%s13084_s1 + $0x420] sm:$0xff] }
 0x26b   :  { %3830 = vmatprep.subr.bf16.mxu1 %v9208_v24  ;;  %v3953_v24 = vld [vmem:[%s13084_s1 + $0xba0] sm:$0xff]  ;;  %v8369_v33 = vcombine.low %v3893_v18, %v3895_v21 }
 0x26c   :  { %4662 = vmatpush1.bf16.msra.mxu0 %v8345_v38  ;;  %v3955_v38 = vld [vmem:[%s13084_s1 + $0xbe0] sm:$0xff] }
 0x26d   :  { %4663 = vmatprep.subr.bf16.mxu0 %v8342_v25  ;;  %v8373_v25 = vcombine.low %v3897_v10, %v3899_v12 }
 0x26e   :  { %3831 = vmatpush1.bf16.msra.mxu1 %v9206_v34  ;;  %v8370_v34 = vcombine.high %v3893_v18, %v3895_v21  ;;  %v3935_v18 = vld [vmem:[%s13084_s1 + $0x960] sm:$0xff] }
 0x26f   :  { %3832 = vmatprep.subr.bf16.mxu1 %v9211_v28  ;;  %v3892_v28 = vld [vmem:[%s13084_s1 + $0x3e8] sm:$0xff] }
 0x270   :  { %4664 = vmatpush1.bf16.msra.mxu0 %v8341_v29  ;;  %v2911_v29 = vpop.f32.mrf.mxu0 }
 0x271   :  { %4665 = vmatprep.subr.bf16.mxu0 %v8338_v30  ;;  %v8430_v30 = vcombine.high %v3953_v24, %v3955_v38 }
 0x272   :  { %3833 = vmatpush1.bf16.msra.mxu1 %v9209_v31  ;;  %v3949_v31 = vld [vmem:[%s13084_s1 + $0xb20] sm:$0xff]  ;;  %v2913_v39 = vpop.f32.mrf.mxu0 }
 0x273   :  { %3834 = vmatprep.subr.bf16.mxu1 %v9214_v35  ;;  %v8368_v35 = vcombine.high %v3890_v27, %v3892_v28  ;;  %v8426_v42 = vcombine.high %v3949_v31, %v3951_v32 }
 0x274   :  { %4666 = vmatpush1.bf16.msra.mxu0 %v8337_v36  ;;  %v8429_v36 = vcombine.low %v3953_v24, %v3955_v38  ;;  %v3870_v38 = vld [vmem:[%s13084_s1 + $0x128] sm:$0xff] }
 0x275   :  { %4667 = vmatprep.subr.bf16.mxu0 %v8398_v37  ;;  %v3886_v37 = vld [vmem:[%s13084_s1 + $0x328] sm:$0xff] }
 0x276   :  { %3835 = vmatpush2.bf16.msra.mxu1 %v9212_v19  ;;  %v3888_v19 = vld [vmem:[%s13084_s1 + $0x368] sm:$0xff] }
 0x277   :  { %3836 = vmatprep.subr.bf16.mxu1 %v9217_v13  ;;  %v3945_v13 = vld [vmem:[%s13084_s1 + $0xaa0] sm:$0xff]  ;;  %v8364_v49 = vcombine.high %v3886_v37, %v3888_v19 }
 0x278   :  { %4668 = vmatpush2.bf16.msra.mxu0 %v8397_v44  ;;  %v3947_v44 = vld [vmem:[%s13084_s1 + $0xae0] sm:$0xff] }
 0x279   :  { %4669 = vmatprep.subr.bf16.mxu0 %v8394_v46  ;;  %v8367_v46 = vcombine.low %v3890_v27, %v3892_v28  ;;  %v3931_v27 = vld [vmem:[%s13084_s1 + $0x8e0] sm:$0xff] }
 0x27a   :  { %3837 = vmatpush2.bf16.msra.mxu1 %v9215_v48 }
 0x27b   :  { %3838 = vmatprep.subr.bf16.mxu1 %v9220_v51  ;;  %v8425_v51 = vcombine.low %v3949_v31, %v3951_v32  ;;  %v3866_v31 = vld [vmem:[%s13084_s1 + $0xa8] sm:$0xff] }
 0x27c   :  { %4670 = vmatpush2.bf16.msra.mxu0 %v8393_v52  ;;  %v3882_v52 = vld [vmem:[%s13084_s1 + $0x2a8] sm:$0xff] }
 0x27d   :  { %4671 = vmatprep.subr.bf16.mxu0 %v8390_v53  ;;  %v3884_v53 = vld [vmem:[%s13084_s1 + $0x2e8] sm:$0xff] }
 0x27e   :  { %3839 = vmatpush2.bf16.msra.mxu1 %v9218_v54  ;;  %v2915_v54 = vpop.f32.mrf.mxu0  ;;  %v8360_v47 = vcombine.high %v3882_v52, %v3884_v53  ;;  %v3868_v32 = vld [vmem:[%s13084_s1 + $0xe8] sm:$0xff] }
 0x27f   :  { %3840 = vmatprep.subr.bf16.mxu1 %v9223_v57  ;;  %v3941_v57 = vld [vmem:[%s13084_s1 + $0xa20] sm:$0xff] }
 0x280   :  { %4672 = vmatpush2.bf16.msra.mxu0 %v8389_v11  ;;  %v3943_v11 = vld [vmem:[%s13084_s1 + $0xa60] sm:$0xff] }
 0x281   :  { %4673 = vmatprep.subr.bf16.mxu0 %v8386_v59  ;;  %v8363_v59 = vcombine.low %v3886_v37, %v3888_v19  ;;  %v8418_v4 = vcombine.high %v3941_v57, %v3943_v11  ;;  %v8417_v12 = vcombine.low %v3941_v57, %v3943_v11  ;;  %v8344_v19 = vcombine.high %v3866_v31, %v3868_v32  ;;  %v3983_v57 = vld [vmem:[%s13084_s1 + $0xf60] sm:$0xff] }
 0x282   :  { %3841 = vmatpush2.bf16.msra.mxu1 %v9221_v60 }
 0x283   :  { %3842 = vmatprep.subr.bf16.mxu1 %v9226_v61  ;;  %v8421_v61 = vcombine.low %v3945_v13, %v3947_v44 }
 0x284   :  { %4674 = vmatpush2.bf16.msra.mxu0 %v8385_v62  ;;  %v3878_v62 = vld [vmem:[%s13084_s1 + $0x228] sm:$0xff] }
 0x285   :  { %4675 = vmatprep.subr.bf16.mxu0 %v8382_v0  ;;  %v3880_v0 = vld [vmem:[%s13084_s1 + $0x268] sm:$0xff] }
 0x286   :  { %3843 = vmatpush2.bf16.msra.mxu1 %v9224_v1  ;;  %v2917_v1 = vpop.f32.mrf.mxu0  ;;  %v8356_v10 = vcombine.high %v3878_v62, %v3880_v0  ;;  %v8355_v21 = vcombine.low %v3878_v62, %v3880_v0  ;;  %v3977_v0 = vld [vmem:[%s13084_s1 + $0xea0] sm:$0xff] }
 0x287   :  { %3844 = vmatprep.subr.bf16.mxu1 %v9229_v5 }
 0x288   :  { %4676 = vmatpush2.bf16.msra.mxu0 %v8381_v6  ;;  %v3937_v6 = vld [vmem:[%s13084_s1 + $0x9a0] sm:$0xff] }
 0x289   :  { %4677 = vmatprep.subr.bf16.mxu0 %v8378_v8  ;;  %v3939_v8 = vld [vmem:[%s13084_s1 + $0x9e0] sm:$0xff] }
 0x28a   :  { %3845 = vmatpush2.bf16.msra.mxu1 %v9227_v9  ;;  %v8359_v9 = vcombine.low %v3882_v52, %v3884_v53  ;;  %v8413_v24 = vcombine.low %v3937_v6, %v3939_v8  ;;  %v3922_v53 = vld [vmem:[%s13084_s1 + $0x7a8] sm:$0xff] }
 0x28b   :  { %3846 = vmatprep.subr.bf16.mxu1 %v9232_v14  ;;  %v3874_v14 = vld [vmem:[%s13084_s1 + $0x1a8] sm:$0xff] }
 0x28c   :  { %4678 = vmatpush2.bf16.msra.mxu0 %v8377_v15  ;;  %v3876_v15 = vld [vmem:[%s13084_s1 + $0x1e8] sm:$0xff] }
 0x28d   :  { %4679 = vmatprep.subr.bf16.mxu0 %v8374_v16  ;;  %v8414_v16 = vcombine.high %v3937_v6, %v3939_v8  ;;  %v8351_v28 = vcombine.low %v3874_v14, %v3876_v15  ;;  %v3914_v8 = vld [vmem:[%s13084_s1 + $0x6a8] sm:$0xff] }
 0x28e   :  { %3847 = vmatpush2.bf16.msra.mxu1 %v9230_v17  ;;  %v3933_v17 = vld [vmem:[%s13084_s1 + $0x920] sm:$0xff] }
 0x28f   :  { %3848 = vmatprep.subr.bf16.mxu1 %v9235_v22  ;;  %v8352_v22 = vcombine.high %v3874_v14, %v3876_v15  ;;  %v3975_v14 = vld [vmem:[%s13084_s1 + $0xe60] sm:$0xff] }
 0x290   :  { %4680 = vmatpush2.bf16.msra.mxu0 %v8373_v25  ;;  %v3872_v25 = vld [vmem:[%s13084_s1 + $0x168] sm:$0xff] }
 0x291   :  { %4681 = vmatprep.subr.bf16.mxu0 %v8370_v34  ;;  %v8410_v34 = vcombine.high %v3933_v17, %v3935_v18  ;;  %v8347_v37 = vcombine.low %v3870_v38, %v3872_v25 }
 0x292   :  { %3849 = vmatpush2.bf16.msra.mxu1 %v9233_v26  ;;  %v3929_v26 = vld [vmem:[%s13084_s1 + $0x8a0] sm:$0xff] }
 0x293   :  { %4694 = vmatprep.subr.bf16.mxu1 %v8430_v30  ;;  %v8409_v30 = vcombine.low %v3933_v17, %v3935_v18  ;;  %v3910_v18 = vld [vmem:[%s13084_s1 + $0x628] sm:$0xff] }
 0x294   :  { %4682 = vmatpush2.bf16.msra.mxu0 %v8369_v33  ;;  %v8406_v33 = vcombine.high %v3929_v26, %v3931_v27 }
 0x295   :  { %3851 = vmatmul.mubr.bf16.vlgmr.msra.gmra.mxu1 %v10726_v40  ;;  %v2954_v48 = vpop.f32.mrf.mxu1  ;;  %4737 = vmatprep.subr.bf16.mxu0 %v8368_v35  ;;  %v8422_v40 = vcombine.high %v3945_v13, %v3947_v44  ;;  %v3925_v35 = vld [vmem:[%s13084_s1 + $0x820] sm:$0xff]  ;;  %v3864_v13 = vld [vmem:[%s13084_s1 + $0x68] sm:$0xff] }
 0x296   :  { %v11462_v50 = vadd.f32 %v2954_v48, %v2911_v29  ;;  %4695 = vmatpush1.bf16.msra.mxu1 %v8429_v36  ;;  %4726 = vmatprep.mubr.bf16.mxu1 %v9797_v63  ;;  %v8348_v29 = vcombine.high %v3870_v38, %v3872_v25  ;;  %v3927_v36 = vld [vmem:[%s13084_s1 + $0x860] sm:$0xff] }
 0x297   :  { %v2956_v55 = vpop.f32.mrf.mxu1  ;;  %4696 = vmatprep.subr.bf16.mxu1 %v8426_v42  ;;  %4684 = vmatmul.mubr.bf16.vlgmr.msra.gmra.mxu0 %v9927_v20  ;;  %v3862_v42 = vld [vmem:[%s13084_s1 + $0x28] sm:$0xff]  ;;  %v8402_v44 = vcombine.high %v3925_v35, %v3927_v36  ;;  %v3987_v48 = vld [vmem:[%s13084_s1 + $0xfe0] sm:$0xff]  ;;  %v8401_v52 = vcombine.low %v3925_v35, %v3927_v36 }
 0x298   :  { %v11472_v56 = vadd.f32 %v2956_v55, %v2913_v39  ;;  %4738 = vmatpush1.bf16.msra.mxu0 %v8367_v46  ;;  %4769 = vmatprep.mubr.bf16.mxu0 %v9783_v58  ;;  %v8405_v39 = vcombine.low %v3929_v26, %v3931_v27  ;;  %v3985_v46 = vld [vmem:[%s13084_s1 + $0xfa0] sm:$0xff]  ;;  %v8339_v11 = vcombine.low %v3862_v42, %v3864_v13  ;;  %v3906_v27 = vld [vmem:[%s13084_s1 + $0x5a8] sm:$0xff] }
 0x299   :  { %v2958_v60 = vpop.f32.mrf.mxu1  ;;  %4739 = vmatprep.subr.bf16.mxu0 %v8364_v49  ;;  %v8343_v49 = vcombine.low %v3866_v31, %v3868_v32  ;;  %v8462_v55 = vcombine.high %v3985_v46, %v3987_v48  ;;  %v3971_v38 = vld [vmem:[%s13084_s1 + $0xde0] sm:$0xff]  ;;  %v3902_v36 = vld [vmem:[%s13084_s1 + $0x528] sm:$0xff] }
 0x29a   :  { %v11481_v45 = vadd.f32 %v2958_v60, %v2915_v54  ;;  %4697 = vmatpush1.bf16.msra.mxu1 %v8425_v51  ;;  %v8340_v51 = vcombine.high %v3862_v42, %v3864_v13  ;;  %v3924_v54 = vld [vmem:[%s13084_s1 + $0x7e8] sm:$0xff]  ;;  %v8461_v60 = vcombine.low %v3985_v46, %v3987_v48  ;;  %v3967_v31 = vld [vmem:[%s13084_s1 + $0xd60] sm:$0xff] }
 0x29b   :  { %v2960_v3 = vpop.f32.mrf.mxu1  ;;  %4698 = vmatprep.subr.bf16.mxu1 %v8422_v40  ;;  %v3981_v40 = vld [vmem:[%s13084_s1 + $0xf20] sm:$0xff]  ;;  %v3898_v48 = vld [vmem:[%s13084_s1 + $0x4a8] sm:$0xff] }
 0x29c   :  { %v11489_v5 = vadd.f32 %v2960_v3, %v2917_v1  ;;  %4740 = vmatpush1.bf16.msra.mxu0 %v8363_v59  ;;  %v8400_v59 = vcombine.high %v3922_v53, %v3924_v54  ;;  %v8458_v62 = vcombine.high %v3981_v40, %v3983_v57  ;;  %v3979_v1 = vld [vmem:[%s13084_s1 + $0xee0] sm:$0xff]  ;;  %v8399_v3 = vcombine.low %v3922_v53, %v3924_v54 }
 0x29d   :  { %4741 = vmatprep.subr.bf16.mxu0 %v8360_v47  ;;  %v3918_v47 = vld [vmem:[%s13084_s1 + $0x728] sm:$0xff]  ;;  %v8457_v6 = vcombine.low %v3981_v40, %v3983_v57  ;;  %v8453_v17 = vcombine.low %v3977_v0, %v3979_v1  ;;  %v3963_v42 = vld [vmem:[%s13084_s1 + $0xce0] sm:$0xff] }
 0x29e   :  { %4699 = vmatpush1.bf16.msra.mxu1 %v8421_v61  ;;  %v3920_v61 = vld [vmem:[%s13084_s1 + $0x768] sm:$0xff]  ;;  %v3957_v53 = vld [vmem:[%s13084_s1 + $0xc20] sm:$0xff] }
 0x29f   :  { %4700 = vmatprep.subr.bf16.mxu1 %v8418_v4  ;;  %v8396_v4 = vcombine.high %v3918_v47, %v3920_v61  ;;  %v8395_v15 = vcombine.low %v3918_v47, %v3920_v61  ;;  %v3959_v54 = vld [vmem:[%s13084_s1 + $0xc60] sm:$0xff]  ;;  %v3954_v61 = vld [vmem:[%s13084_s1 + $0xba8] sm:$0xff] }
 0x2a0   :  { %4742 = vmatpush1.bf16.msra.mxu0 %v8359_v9  ;;  %v3916_v9 = vld [vmem:[%s13084_s1 + $0x6e8] sm:$0xff]  ;;  %v8434_v47 = vcombine.high %v3957_v53, %v3959_v54 }
 0x2a1   :  { %4743 = vmatprep.subr.bf16.mxu0 %v8356_v10  ;;  %v8454_v10 = vcombine.high %v3977_v0, %v3979_v1  ;;  %v8391_v25 = vcombine.low %v3914_v8, %v3916_v9 }
 0x2a2   :  { %4701 = vmatpush1.bf16.msra.mxu1 %v8417_v12  ;;  %v3973_v12 = vld [vmem:[%s13084_s1 + $0xe20] sm:$0xff] }
 0x2a3   :  { %4702 = vmatprep.subr.bf16.mxu1 %v8414_v16  ;;  %v8392_v16 = vcombine.high %v3914_v8, %v3916_v9  ;;  %v8449_v26 = vcombine.low %v3973_v12, %v3975_v14  ;;  %v3950_v8 = vld [vmem:[%s13084_s1 + $0xb28] sm:$0xff] }
 0x2a4   :  { %4744 = vmatpush1.bf16.msra.mxu0 %v8355_v21  ;;  %v3912_v21 = vld [vmem:[%s13084_s1 + $0x668] sm:$0xff] }
 0x2a5   :  { %4745 = vmatprep.subr.bf16.mxu0 %v8352_v22  ;;  %v8450_v22 = vcombine.high %v3973_v12, %v3975_v14  ;;  %v8387_v32 = vcombine.low %v3910_v18, %v3912_v21  ;;  %v3952_v9 = vld [vmem:[%s13084_s1 + $0xb68] sm:$0xff] }
 0x2a6   :  { %4703 = vmatpush1.bf16.msra.mxu1 %v8413_v24  ;;  %v3969_v24 = vld [vmem:[%s13084_s1 + $0xda0] sm:$0xff] }
 0x2a7   :  { %4704 = vmatprep.subr.bf16.mxu1 %v8410_v34  ;;  %v8388_v34 = vcombine.high %v3910_v18, %v3912_v21  ;;  %v8445_v35 = vcombine.low %v3969_v24, %v3971_v38 }
 0x2a8   :  { %4746 = vmatpush1.bf16.msra.mxu0 %v8351_v28  ;;  %v3908_v28 = vld [vmem:[%s13084_s1 + $0x5e8] sm:$0xff] }
 0x2a9   :  { %4747 = vmatprep.subr.bf16.mxu0 %v8348_v29  ;;  %v8446_v29 = vcombine.high %v3969_v24, %v3971_v38  ;;  %v8383_v13 = vcombine.low %v3906_v27, %v3908_v28  ;;  %v8427_v38 = vcombine.low %v3950_v8, %v3952_v9 }
 0x2aa   :  { %4705 = vmatpush1.bf16.msra.mxu1 %v8409_v30  ;;  %v3965_v30 = vld [vmem:[%s13084_s1 + $0xd20] sm:$0xff] }
 0x2ab   :  { %4706 = vmatprep.subr.bf16.mxu1 %v8406_v33  ;;  %v8384_v33 = vcombine.high %v3906_v27, %v3908_v28  ;;  %v8441_v46 = vcombine.low %v3965_v30, %v3967_v31 }
 0x2ac   :  { %4748 = vmatpush1.bf16.msra.mxu0 %v8347_v37  ;;  %v3904_v37 = vld [vmem:[%s13084_s1 + $0x568] sm:$0xff] }
 0x2ad   :  { %4749 = vmatprep.subr.bf16.mxu0 %v8344_v19  ;;  %v8442_v19 = vcombine.high %v3965_v30, %v3967_v31 }
 0x2ae   :  { %4707 = vmatpush1.bf16.msra.mxu1 %v8405_v39  ;;  %v3961_v39 = vld [vmem:[%s13084_s1 + $0xca0] sm:$0xff] }
 0x2af   :  { %4708 = vmatprep.subr.bf16.mxu1 %v8402_v44  ;;  %v8380_v44 = vcombine.high %v3902_v36, %v3904_v37  ;;  %v8437_v57 = vcombine.low %v3961_v39, %v3963_v42 }
 0x2b0   :  { %4750 = vmatpush1.bf16.msra.mxu0 %v8343_v49  ;;  %v3900_v49 = vld [vmem:[%s13084_s1 + $0x4e8] sm:$0xff] }
 0x2b1   :  { %4751 = vmatprep.subr.bf16.mxu0 %v8340_v51  ;;  %v2997_v51 = vpop.f32.mrf.mxu0  ;;  %v8376_v40 = vcombine.high %v3898_v48, %v3900_v49  ;;  %v8375_v0 = vcombine.low %v3898_v48, %v3900_v49  ;;  %v9239_v49 = vld [vmem:[%s13086_s3 + $0x8c0] ss:$16 sps:$4 sm:$0xff]  }
 0x2b2   :  { %4709 = vmatpush1.bf16.msra.mxu1 %v8401_v52  ;;  %v8438_v52 = vcombine.high %v3961_v39, %v3963_v42 }
 0x2b3   :  { %4710 = vmatprep.subr.bf16.mxu1 %v8462_v55  ;;  %v8379_v55 = vcombine.low %v3902_v36, %v3904_v37 }
 0x2b4   :  { %4752 = vmatpush1.bf16.msra.mxu0 %v8339_v11  ;;  %v3894_v11 = vld [vmem:[%s13084_s1 + $0x428] sm:$0xff] }
 0x2b5   :  { %4753 = vmatprep.subr.bf16.mxu0 %v8400_v59  ;;  %v3896_v59 = vld [vmem:[%s13084_s1 + $0x468] sm:$0xff] }
 0x2b6   :  { %4711 = vmatpush2.bf16.msra.mxu1 %v8461_v60  ;;  %v2999_v60 = vpop.f32.mrf.mxu0  ;;  %v8372_v1 = vcombine.high %v3894_v11, %v3896_v59 }
 0x2b7   :  { %4712 = vmatprep.subr.bf16.mxu1 %v8458_v62  ;;  %v3956_v62 = vld [vmem:[%s13084_s1 + $0xbe8] sm:$0xff] }
 0x2b8   :  { %4754 = vmatpush2.bf16.msra.mxu0 %v8399_v3  ;;  %v8433_v3 = vcombine.low %v3957_v53, %v3959_v54  ;;  %v8431_v12 = vcombine.low %v3954_v61, %v3956_v62  ;;  %v9244_v53 = vld [vmem:[%s13086_s3 + $0x8a4] ss:$16 sps:$4 sm:$0xff]  }
 0x2b9   :  { %4755 = vmatprep.subr.bf16.mxu0 %v8396_v4  ;;  %v3001_v4 = vpop.f32.mrf.mxu0 }
 0x2ba   :  { %4713 = vmatpush2.bf16.msra.mxu1 %v8457_v6  ;;  %v8432_v6 = vcombine.high %v3954_v61, %v3956_v62  ;;  %v9245_v61 = vld [vmem:[%s13086_s3 + $0x880] ss:$16 sps:$4 sm:$0xff]   ;;  %v3926_v62 = vld [vmem:[%s13084_s1 + $0x828] sm:$0xff] }
 0x2bb   :  { %4714 = vmatprep.subr.bf16.mxu1 %v8454_v10  ;;  %v8371_v10 = vcombine.low %v3894_v11, %v3896_v59  ;;  %v3003_v14 = vpop.f32.mrf.mxu0  ;;  %v3932_v11 = vld [vmem:[%s13084_s1 + $0x8e8] sm:$0xff]  ;;  %v9247_v59 = vld [vmem:[%s13086_s3 + $0x884] ss:$16 sps:$4 sm:$0xff]  }
 0x2bc   :  { %4756 = vmatpush2.bf16.msra.mxu0 %v8395_v15  ;;  %v8428_v15 = vcombine.high %v3950_v8, %v3952_v9  ;;  %v3986_v8 = vld [vmem:[%s13084_s1 + $0xfa8] sm:$0xff] }
 0x2bd   :  { %4757 = vmatprep.subr.bf16.mxu0 %v8392_v16  ;;  %v3946_v16 = vld [vmem:[%s13084_s1 + $0xaa8] sm:$0xff] }
 0x2be   :  { %4715 = vmatpush2.bf16.msra.mxu1 %v8453_v17  ;;  %v3948_v17 = vld [vmem:[%s13084_s1 + $0xae8] sm:$0xff] }
 0x2bf   :  { %4716 = vmatprep.subr.bf16.mxu1 %v8450_v22  ;;  %v3988_v9 = vld [vmem:[%s13084_s1 + $0xfe8] sm:$0xff] }
 0x2c0   :  { %4758 = vmatpush2.bf16.msra.mxu0 %v8391_v25 }
 0x2c1   :  { %4759 = vmatprep.subr.bf16.mxu0 %v8388_v34 }
 0x2c2   :  { %4717 = vmatpush2.bf16.msra.mxu1 %v8449_v26  ;;  %v8424_v26 = vcombine.high %v3946_v16, %v3948_v17 }
 0x2c3   :  { %4718 = vmatprep.subr.bf16.mxu1 %v8446_v29  ;;  %v3944_v29 = vld [vmem:[%s13084_s1 + $0xa68] sm:$0xff] }
 0x2c4   :  { %4760 = vmatpush2.bf16.msra.mxu0 %v8387_v32 }
 0x2c5   :  { %4761 = vmatprep.subr.bf16.mxu0 %v8384_v33 }
 0x2c6   :  { %4719 = vmatpush2.bf16.msra.mxu1 %v8445_v35  ;;  %v8423_v35 = vcombine.low %v3946_v16, %v3948_v17  ;;  %v3982_v16 = vld [vmem:[%s13084_s1 + $0xf28] sm:$0xff] }
 0x2c7   :  { %4720 = vmatprep.subr.bf16.mxu1 %v8442_v19  ;;  %v3938_v19 = vld [vmem:[%s13084_s1 + $0x9a8] sm:$0xff] }
 0x2c8   :  { %4762 = vmatpush2.bf16.msra.mxu0 %v8383_v13  ;;  %v9236_v13 = vld [vmem:[%s13086_s3 + $0x8e0] ss:$16 sps:$4 sm:$0xff]   ;;  %v3984_v17 = vld [vmem:[%s13084_s1 + $0xf68] sm:$0xff] }
 0x2c9   :  { %4763 = vmatprep.subr.bf16.mxu0 %v8380_v44  ;;  %v9238_v44 = vld [vmem:[%s13086_s3 + $0x8e4] ss:$16 sps:$4 sm:$0xff]  }
 0x2ca   :  { %4721 = vmatpush2.bf16.msra.mxu1 %v8441_v46  ;;  %v9241_v46 = vld [vmem:[%s13086_s3 + $0x8c4] ss:$16 sps:$4 sm:$0xff]  }
 0x2cb   :  { %4722 = vmatprep.subr.bf16.mxu1 %v8438_v52  ;;  %v3936_v52 = vld [vmem:[%s13084_s1 + $0x968] sm:$0xff] }
 0x2cc   :  { %4764 = vmatpush2.bf16.msra.mxu0 %v8379_v55 }
 0x2cd   :  { %4765 = vmatprep.subr.bf16.mxu0 %v8376_v40  ;;  %v9242_v40 = vld [vmem:[%s13086_s3 + $0x8a0] ss:$16 sps:$4 sm:$0xff]  }
 0x2ce   :  { %4723 = vmatpush2.bf16.msra.mxu1 %v8437_v57  ;;  %v3930_v57 = vld [vmem:[%s13084_s1 + $0x8a8] sm:$0xff] }
 0x2cf   :  { %4724 = vmatprep.subr.bf16.mxu1 %v8434_v47  ;;  %v8408_v47 = vcombine.high %v3930_v57, %v3932_v11 }
 0x2d0   :  { %4766 = vmatpush2.bf16.msra.mxu0 %v8375_v0  ;;  %v3928_v0 = vld [vmem:[%s13084_s1 + $0x868] sm:$0xff] }
 0x2d1   :  { %4767 = vmatprep.subr.bf16.mxu0 %v8372_v1  ;;  %v9250_v1 = vld [vmem:[%s13086_s3 + $0x864] ss:$16 sps:$4 sm:$0xff]  }
 0x2d2   :  { %4725 = vmatpush2.bf16.msra.mxu1 %v8433_v3  ;;  %v8407_v3 = vcombine.low %v3930_v57, %v3932_v11  ;;  %v3962_v57 = vld [vmem:[%s13084_s1 + $0xca8] sm:$0xff] }
 0x2d3   :  { %4780 = vmatprep.subr.bf16.mxu1 %v8432_v6  ;;  %v9248_v6 = vld [vmem:[%s13086_s3 + $0x860] ss:$16 sps:$4 sm:$0xff]   ;;  %v3964_v11 = vld [vmem:[%s13084_s1 + $0xce8] sm:$0xff] }
 0x2d4   :  { %4768 = vmatpush2.bf16.msra.mxu0 %v8371_v10  ;;  %v9253_v10 = vld [vmem:[%s13086_s3 + $0x844] ss:$16 sps:$4 sm:$0xff]  }
 0x2d5   :  { %v3040_v18 = vpop.f32.mrf.mxu1  ;;  %v3723_v21 = vpop.f32.mrf.mxu0  ;;  %4727 = vmatmul.mubr.bf16.vlgmr.msra.gmra.mxu1 %v9935_v23  ;;  %5603 = vmatprep.subr.bf16.mxu0 %v9238_v44  ;;  %v3972_v44 = vld [vmem:[%s13084_s1 + $0xde8] sm:$0xff] }
 0x2d6   :  { %v11654_v22 = vadd.f32 %v3040_v18, %v2997_v51  ;;  %v11657_v24 = vadd.f32 %v3723_v21, %v11462_v50  ;;  %4781 = vmatpush1.bf16.msra.mxu1 %v8431_v12  ;;  %4812 = vmatprep.mubr.bf16.mxu1 %v9797_v63  ;;  %v3942_v50 = vld [vmem:[%s13084_s1 + $0xa28] sm:$0xff]  ;;  %v8403_v12 = vcombine.low %v3926_v62, %v3928_v0  ;;  %v9256_v18 = vld [vmem:[%s13086_s3 + $0x824] ss:$16 sps:$4 sm:$0xff]  }
 0x2d7   :  { %v3042_v25 = vpop.f32.mrf.mxu1  ;;  %v3725_v34 = vpop.f32.mrf.mxu0  ;;  %4782 = vmatprep.subr.bf16.mxu1 %v8428_v15  ;;  %4770 = vmatmul.mubr.bf16.vlgmr.msra.gmra.mxu0 %v9927_v20  ;;  %v8420_v37 = vcombine.high %v3942_v50, %v3944_v29  ;;  %v8419_v48 = vcombine.low %v3942_v50, %v3944_v29  ;;  %v3934_v51 = vld [vmem:[%s13084_s1 + $0x928] sm:$0xff]  ;;  %v9251_v15 = vld [vmem:[%s13086_s3 + $0x840] ss:$16 sps:$4 sm:$0xff]   ;;  %v8463_v21 = vcombine.low %v3986_v8, %v3988_v9  ;;  %v9259_v50 = vld [vmem:[%s13086_s3 + $0x804] ss:$16 sps:$4 sm:$0xff]  }
 0x2d8   :  { %v11661_v27 = vadd.f32 %v3042_v25, %v2999_v60  ;;  %v11664_v28 = vadd.f32 %v3725_v34, %v11472_v56  ;;  %5604 = vmatpush1.bf16.msra.mxu0 %v9236_v13  ;;  %v8412_v55 = vcombine.high %v3934_v51, %v3936_v52  ;;  %v8411_v60 = vcombine.low %v3934_v51, %v3936_v52  ;;  %v9254_v25 = vld [vmem:[%s13086_s3 + $0x820] ss:$16 sps:$4 sm:$0xff]   ;;  %v3978_v34 = vld [vmem:[%s13084_s1 + $0xea8] sm:$0xff] }
 0x2d9   :  { %v3044_v30 = vpop.f32.mrf.mxu1  ;;  %v3727_v31 = vpop.f32.mrf.mxu0  ;;  %5605 = vmatprep.subr.bf16.mxu0 %v9241_v46  ;;  %v8459_v29 = vcombine.low %v3982_v16, %v3984_v17  ;;  %v3970_v13 = vld [vmem:[%s13084_s1 + $0xda8] sm:$0xff]  ;;  %v9265_v46 = vld [vmem:[%s13086_s3 + $0x9c4] ss:$16 sps:$4 sm:$0xff]  }
 0x2da   :  { %v11672_v32 = vadd.f32 %v3044_v30, %v3001_v4  ;;  %v11675_v33 = vadd.f32 %v3727_v31, %v11481_v45  ;;  %4783 = vmatpush1.bf16.msra.mxu1 %v8427_v38  ;;  %v3940_v45 = vld [vmem:[%s13084_s1 + $0x9e8] sm:$0xff]  ;;  %v8404_v4 = vcombine.high %v3926_v62, %v3928_v0  ;;  %v8460_v38 = vcombine.high %v3982_v16, %v3984_v17  ;;  %v9257_v31 = vld [vmem:[%s13086_s3 + $0x800] ss:$16 sps:$4 sm:$0xff]  }
 0x2db   :  { %v3046_v36 = vpop.f32.mrf.mxu1  ;;  %v3729_v56 = vpop.f32.mrf.mxu0  ;;  %4784 = vmatprep.subr.bf16.mxu1 %v8424_v26  ;;  %v8415_v54 = vcombine.low %v3938_v19, %v3940_v45  ;;  %v3980_v26 = vld [vmem:[%s13084_s1 + $0xee8] sm:$0xff] }
 0x2dc   :  { %v11680_v39 = vadd.f32 %v3046_v36, %v3003_v14  ;;  %v11683_v42 = vadd.f32 %v3729_v56, %v11489_v5  ;;  %v8416_v5 = vcombine.high %v3938_v19, %v3940_v45  ;;  %5606 = vmatpush1.bf16.msra.mxu0 %v9239_v49  ;;  %v8464_v14 = vcombine.high %v3986_v8, %v3988_v9  ;;  %v3976_v36 = vld [vmem:[%s13084_s1 + $0xe68] sm:$0xff]  ;;  %v9262_v56 = vld [vmem:[%s13086_s3 + $0x9e4] ss:$16 sps:$4 sm:$0xff]   ;;  %v9260_v45 = vld [vmem:[%s13086_s3 + $0x9e0] ss:$16 sps:$4 sm:$0xff]  }
 0x2dd   :  { %5607 = vmatprep.subr.bf16.mxu0 %v9244_v53  ;;  %v8456_v30 = vcombine.high %v3978_v34, %v3980_v26  ;;  %v9263_v49 = vld [vmem:[%s13086_s3 + $0x9c0] ss:$16 sps:$4 sm:$0xff]   ;;  %v3966_v51 = vld [vmem:[%s13084_s1 + $0xd28] sm:$0xff]  ;;  %v9268_v53 = vld [vmem:[%s13086_s3 + $0x9a4] ss:$16 sps:$4 sm:$0xff]  }
 0x2de   :  { %4785 = vmatpush1.bf16.msra.mxu1 %v8423_v35  ;;  %v3974_v35 = vld [vmem:[%s13084_s1 + $0xe28] sm:$0xff] }
 0x2df   :  { %4786 = vmatprep.subr.bf16.mxu1 %v8420_v37  ;;  %v8455_v37 = vcombine.low %v3978_v34, %v3980_v26  ;;  %v8452_v19 = vcombine.high %v3974_v35, %v3976_v36  ;;  %v3968_v52 = vld [vmem:[%s13084_s1 + $0xd68] sm:$0xff]  ;;  %v9278_v26 = vld [vmem:[%s13086_s3 + $0x920] ss:$16 sps:$4 sm:$0xff]  }
 0x2e0   :  { %5608 = vmatpush1.bf16.msra.mxu0 %v9242_v40  ;;  %v9266_v40 = vld [vmem:[%s13086_s3 + $0x9a0] ss:$16 sps:$4 sm:$0xff]   ;;  %v3958_v62 = vld [vmem:[%s13084_s1 + $0xc28] sm:$0xff] }
 0x2e1   :  { %5609 = vmatprep.subr.bf16.mxu0 %v9247_v59  ;;  %v9271_v59 = vld [vmem:[%s13086_s3 + $0x984] ss:$16 sps:$4 sm:$0xff]   ;;  %v3960_v0 = vld [vmem:[%s13084_s1 + $0xc68] sm:$0xff] }
 0x2e2   :  { %4787 = vmatpush1.bf16.msra.mxu1 %v8419_v48  ;;  %v8451_v48 = vcombine.low %v3974_v35, %v3976_v36  ;;  %v8435_v8 = vcombine.low %v3958_v62, %v3960_v0  ;;  %v9290_v35 = vld [vmem:[%s13086_s3 + $0xac0] ss:$16 sps:$4 sm:$0xff]   ;;  %v9292_v36 = vld [vmem:[%s13086_s3 + $0xac4] ss:$16 sps:$4 sm:$0xff]  }
 0x2e3   :  { %4788 = vmatprep.subr.bf16.mxu1 %v8416_v5  ;;  %v8448_v5 = vcombine.high %v3970_v13, %v3972_v44 }
 0x2e4   :  { %5610 = vmatpush1.bf16.msra.mxu0 %v9245_v61  ;;  %v9269_v61 = vld [vmem:[%s13086_s3 + $0x980] ss:$16 sps:$4 sm:$0xff]  }
 0x2e5   :  { %5611 = vmatprep.subr.bf16.mxu0 %v9250_v1  ;;  %v9274_v1 = vld [vmem:[%s13086_s3 + $0x964] ss:$16 sps:$4 sm:$0xff]  }
 0x2e6   :  { %4789 = vmatpush1.bf16.msra.mxu1 %v8415_v54  ;;  %v8447_v54 = vcombine.low %v3970_v13, %v3972_v44  ;;  %v9308_v13 = vld [vmem:[%s13086_s3 + $0xa60] ss:$16 sps:$4 sm:$0xff]   ;;  %v9310_v44 = vld [vmem:[%s13086_s3 + $0xa64] ss:$16 sps:$4 sm:$0xff]  }
 0x2e7   :  { %4790 = vmatprep.subr.bf16.mxu1 %v8412_v55  ;;  %v8444_v55 = vcombine.high %v3966_v51, %v3968_v52 }
 0x2e8   :  { %5612 = vmatpush1.bf16.msra.mxu0 %v9248_v6  ;;  %v9272_v6 = vld [vmem:[%s13086_s3 + $0x960] ss:$16 sps:$4 sm:$0xff]  }
 0x2e9   :  { %5613 = vmatprep.subr.bf16.mxu0 %v9253_v10  ;;  %v9277_v10 = vld [vmem:[%s13086_s3 + $0x944] ss:$16 sps:$4 sm:$0xff]  }
 0x2ea   :  { %4791 = vmatpush1.bf16.msra.mxu1 %v8411_v60  ;;  %v8443_v60 = vcombine.low %v3966_v51, %v3968_v52  ;;  %v9326_v51 = vld [vmem:[%s13086_s3 + $0xa00] ss:$16 sps:$4 sm:$0xff]   ;;  %v9328_v52 = vld [vmem:[%s13086_s3 + $0xa04] ss:$16 sps:$4 sm:$0xff]  }
 0x2eb   :  { %4792 = vmatprep.subr.bf16.mxu1 %v8408_v47  ;;  %v8440_v47 = vcombine.high %v3962_v57, %v3964_v11 }
 0x2ec   :  { %5614 = vmatpush1.bf16.msra.mxu0 %v9251_v15  ;;  %v9275_v15 = vld [vmem:[%s13086_s3 + $0x940] ss:$16 sps:$4 sm:$0xff]  }
 0x2ed   :  { %5615 = vmatprep.subr.bf16.mxu0 %v9256_v18 }
 0x2ee   :  { %4793 = vmatpush1.bf16.msra.mxu1 %v8407_v3  ;;  %v8439_v3 = vcombine.low %v3962_v57, %v3964_v11  ;;  %v9344_v57 = vld [vmem:[%s13086_s3 + $0xba0] ss:$16 sps:$4 sm:$0xff]   ;;  %v9346_v11 = vld [vmem:[%s13086_s3 + $0xba4] ss:$16 sps:$4 sm:$0xff]  }
 0x2ef   :  { %4794 = vmatprep.subr.bf16.mxu1 %v8404_v4  ;;  %v8436_v4 = vcombine.high %v3958_v62, %v3960_v0  ;;  %v9364_v0 = vld [vmem:[%s13086_s3 + $0xb44] ss:$16 sps:$4 sm:$0xff]  }
 0x2f0   :  { %5616 = vmatpush1.bf16.msra.mxu0 %v9254_v25  ;;  %v9280_v25 = vld [vmem:[%s13086_s3 + $0x924] ss:$16 sps:$4 sm:$0xff]  }
 0x2f1   :  { %5617 = vmatprep.subr.bf16.mxu0 %v9259_v50 }
 0x2f2   :  { %4795 = vmatpush1.bf16.msra.mxu1 %v8403_v12 }
 0x2f3   :  { %4796 = vmatprep.subr.bf16.mxu1 %v8464_v14 }
 0x2f4   :  { %5618 = vmatpush1.bf16.msra.mxu0 %v9257_v31  ;;  %v9281_v31 = vld [vmem:[%s13086_s3 + $0x900] ss:$16 sps:$4 sm:$0xff]  }
 0x2f5   :  { %5619 = vmatprep.subr.bf16.mxu0 %v9262_v56  ;;  %v9296_v56 = vld [vmem:[%s13086_s3 + $0xaa0] ss:$16 sps:$4 sm:$0xff]  }
 0x2f6   :  { %4797 = vmatpush2.bf16.msra.mxu1 %v8463_v21 }
 0x2f7   :  { %4798 = vmatprep.subr.bf16.mxu1 %v8460_v38 }
 0x2f8   :  { %5620 = vmatpush2.bf16.msra.mxu0 %v9260_v45  ;;  %v9304_v45 = vld [vmem:[%s13086_s3 + $0xa84] ss:$16 sps:$4 sm:$0xff]  }
 0x2f9   :  { %5621 = vmatprep.subr.bf16.mxu0 %v9265_v46  ;;  %v9314_v46 = vld [vmem:[%s13086_s3 + $0xa40] ss:$16 sps:$4 sm:$0xff]  }
 0x2fa   :  { %4799 = vmatpush2.bf16.msra.mxu1 %v8459_v29 }
 0x2fb   :  { %4800 = vmatprep.subr.bf16.mxu1 %v8456_v30 }
 0x2fc   :  { %5622 = vmatpush2.bf16.msra.mxu0 %v9263_v49  ;;  %v9322_v49 = vld [vmem:[%s13086_s3 + $0xa24] ss:$16 sps:$4 sm:$0xff]  }
 0x2fd   :  { %5623 = vmatprep.subr.bf16.mxu0 %v9268_v53  ;;  %v9332_v53 = vld [vmem:[%s13086_s3 + $0xbe0] ss:$16 sps:$4 sm:$0xff]  }
 0x2fe   :  { %4801 = vmatpush2.bf16.msra.mxu1 %v8455_v37  ;;  %v9298_v37 = vld [vmem:[%s13086_s3 + $0xaa4] ss:$16 sps:$4 sm:$0xff]  }
 0x2ff   :  { %4802 = vmatprep.subr.bf16.mxu1 %v8452_v19  ;;  %v9302_v19 = vld [vmem:[%s13086_s3 + $0xa80] ss:$16 sps:$4 sm:$0xff]  }
 0x300   :  { %5624 = vmatpush2.bf16.msra.mxu0 %v9266_v40  ;;  %v9340_v40 = vld [vmem:[%s13086_s3 + $0xbc4] ss:$16 sps:$4 sm:$0xff]  }
 0x301   :  { %5625 = vmatprep.subr.bf16.mxu0 %v9271_v59  ;;  %v9350_v59 = vld [vmem:[%s13086_s3 + $0xb80] ss:$16 sps:$4 sm:$0xff]  }
 0x302   :  { %4803 = vmatpush2.bf16.msra.mxu1 %v8451_v48  ;;  %v9316_v48 = vld [vmem:[%s13086_s3 + $0xa44] ss:$16 sps:$4 sm:$0xff]  }
 0x303   :  { %4804 = vmatprep.subr.bf16.mxu1 %v8448_v5  ;;  %v9320_v5 = vld [vmem:[%s13086_s3 + $0xa20] ss:$16 sps:$4 sm:$0xff]  }
 0x304   :  { %5626 = vmatpush2.bf16.msra.mxu0 %v9269_v61  ;;  %v9358_v61 = vld [vmem:[%s13086_s3 + $0xb64] ss:$16 sps:$4 sm:$0xff]  }
 0x305   :  { %5627 = vmatprep.subr.bf16.mxu0 %v9274_v1 }
 0x306   :  { %4805 = vmatpush2.bf16.msra.mxu1 %v8447_v54  ;;  %v9334_v54 = vld [vmem:[%s13086_s3 + $0xbe4] ss:$16 sps:$4 sm:$0xff]  }
 0x307   :  { %4806 = vmatprep.subr.bf16.mxu1 %v8444_v55  ;;  %v9338_v55 = vld [vmem:[%s13086_s3 + $0xbc0] ss:$16 sps:$4 sm:$0xff]  }
 0x308   :  { %5628 = vmatpush2.bf16.msra.mxu0 %v9272_v6 }
 0x309   :  { %5629 = vmatprep.subr.bf16.mxu0 %v9277_v10 }
 0x30a   :  { %4807 = vmatpush2.bf16.msra.mxu1 %v8443_v60  ;;  %v9352_v60 = vld [vmem:[%s13086_s3 + $0xb84] ss:$16 sps:$4 sm:$0xff]  }
 0x30b   :  { %4808 = vmatprep.subr.bf16.mxu1 %v8440_v47  ;;  %v9356_v47 = vld [vmem:[%s13086_s3 + $0xb60] ss:$16 sps:$4 sm:$0xff]  }
 0x30c   :  { %5630 = vmatpush2.bf16.msra.mxu0 %v9275_v15 }
 0x30d   :  { %5631 = vmatprep.subr.bf16.mxu0 %v9280_v25  ;;  %v11992_v25 = vld [vmem:[%s13085_s2 + $0x8] sm:$0xf] }
 0x30e   :  { %4809 = vmatpush2.bf16.msra.mxu1 %v8439_v3  ;;  %v9362_v3 = vld [vmem:[%s13086_s3 + $0xb40] ss:$16 sps:$4 sm:$0xff]  }
 0x30f   :  { %4810 = vmatprep.subr.bf16.mxu1 %v8436_v4 }
 0x310   :  { %5632 = vmatpush2.bf16.msra.mxu0 %v9278_v26  ;;  %v3998_v26 = vrot.slane %v11992_v25, %v10515_v43 }
 0x312   :  { %4811 = vmatpush2.bf16.msra.mxu1 %v8435_v8 }
 0x315   :  { %v3766_v9 = vpop.f32.mrf.mxu1  ;;  %4813 = vmatmul.mubr.bf16.vlgmr.msra.gmra.mxu1 %v9935_v23 }
 0x316   :  { %v11837_v12 = vadd.f32 %v3766_v9, %v11657_v24  ;;  %v3809_v14 = vpop.f32.mrf.mxu0  ;;  %v9370_v9 = vld [vmem:[%s13086_s3 + $0xb24] ss:$16 sps:$4 sm:$0xff]  }
 0x317   :  { %v11843_v16 = vadd.f32 %v3809_v14, %v11654_v22  ;;  %v3768_v17 = vpop.f32.mrf.mxu1  ;;  %v9368_v14 = vld [vmem:[%s13086_s3 + $0xb20] ss:$16 sps:$4 sm:$0xff]  }
 0x318   :  { %v11846_v18 = vadd.f32 %v3768_v17, %v11664_v28  ;;  %v3811_v21 = vpop.f32.mrf.mxu0  ;;  %v9376_v17 = vld [vmem:[%s13086_s3 + $0xb04] ss:$16 sps:$4 sm:$0xff]  }
 0x319   :  { %v11849_v38 = vadd.f32 %v3811_v21, %v11661_v27  ;;  %v3770_v24 = vpop.f32.mrf.mxu1  ;;  %v9374_v21 = vld [vmem:[%s13086_s3 + $0xb00] ss:$16 sps:$4 sm:$0xff]  }
 0x31a   :  { %v11855_v34 = vadd.f32 %v3770_v24, %v11675_v33  ;;  %v3813_v22 = vpop.f32.mrf.mxu0  ;;  %v9283_v33 = vld [vmem:[%s13086_s3 + $0x904] ss:$16 sps:$4 sm:$0xff]  }
 0x31b   :  { %v11861_v28 = vadd.f32 %v3813_v22, %v11672_v32  ;;  %v3772_v50 = vpop.f32.mrf.mxu1  ;;  %5633 = vmatprep.subr.bf16.mxu0 %v9283_v33  ;;  %v9286_v32 = vld [vmem:[%s13086_s3 + $0xae4] ss:$16 sps:$4 sm:$0xff]  }
 0x31c   :  { %v11864_v27 = vadd.f32 %v3772_v50, %v11683_v42  ;;  %v3815_v29 = vpop.f32.mrf.mxu0  ;;  %5634 = vmatpush2.bf16.msra.mxu0 %v9281_v31  ;;  %v9289_v42 = vld [vmem:[%s13086_s3 + $0x8ec] ss:$16 sps:$4 sm:$0xff]   ;;  %5646 = vmatprep.subr.bf16.mxu1 %v9286_v32 }
 0x31d   :  { %v11867_v30 = vadd.f32 %v3815_v29, %v11680_v39  ;;  %v9284_v39 = vld [vmem:[%s13086_s3 + $0xae0] ss:$16 sps:$4 sm:$0xff]   ;;  %5689 = vmatprep.subr.bf16.mxu0 %v9289_v42 }
 0x31e   :  { %5647 = vmatpush1.bf16.msra.mxu1 %v9284_v39 }
 0x31f   :  { %5648 = vmatprep.subr.bf16.mxu1 %v9292_v36 }
 0x322   :  { %5649 = vmatpush1.bf16.msra.mxu1 %v9290_v35 }
 0x323   :  { %5650 = vmatprep.subr.bf16.mxu1 %v9298_v37 }
 0x326   :  { %5651 = vmatpush1.bf16.msra.mxu1 %v9296_v56 }
 0x327   :  { %5652 = vmatprep.subr.bf16.mxu1 %v9304_v45 }
 0x32a   :  { %5653 = vmatpush1.bf16.msra.mxu1 %v9302_v19 }
 0x32b   :  { %5654 = vmatprep.subr.bf16.mxu1 %v9310_v44 }
 0x32e   :  { %5655 = vmatpush1.bf16.msra.mxu1 %v9308_v13 }
 0x32f   :  { %5656 = vmatprep.subr.bf16.mxu1 %v9316_v48 }
 0x332   :  { %5657 = vmatpush1.bf16.msra.mxu1 %v9314_v46 }
 0x333   :  { %5658 = vmatprep.subr.bf16.mxu1 %v9322_v49  ;;  %v9287_v49 = vld [vmem:[%s13086_s3 + $0x8e8] ss:$16 sps:$4 sm:$0xff]  }
 0x336   :  { %5659 = vmatpush1.bf16.msra.mxu1 %v9320_v5 }
 0x337   :  { %5660 = vmatprep.subr.bf16.mxu1 %v9328_v52  ;;  %v9295_v52 = vld [vmem:[%s13086_s3 + $0x8cc] ss:$16 sps:$4 sm:$0xff]  }
 0x33a   :  { %5661 = vmatpush1.bf16.msra.mxu1 %v9326_v51 }
 0x33b   :  { %5662 = vmatprep.subr.bf16.mxu1 %v9334_v54  ;;  %v9301_v54 = vld [vmem:[%s13086_s3 + $0x8ac] ss:$16 sps:$4 sm:$0xff]  }
 0x33e   :  { %5663 = vmatpush2.bf16.msra.mxu1 %v9332_v53  ;;  %v9293_v53 = vld [vmem:[%s13086_s3 + $0x8c8] ss:$16 sps:$4 sm:$0xff]  }
 0x33f   :  { %5664 = vmatprep.subr.bf16.mxu1 %v9340_v40  ;;  %v9307_v40 = vld [vmem:[%s13086_s3 + $0x88c] ss:$16 sps:$4 sm:$0xff]  }
 0x342   :  { %5665 = vmatpush2.bf16.msra.mxu1 %v9338_v55  ;;  %v9299_v55 = vld [vmem:[%s13086_s3 + $0x8a8] ss:$16 sps:$4 sm:$0xff]  }
 0x343   :  { %5666 = vmatprep.subr.bf16.mxu1 %v9346_v11  ;;  %v9313_v11 = vld [vmem:[%s13086_s3 + $0x86c] ss:$16 sps:$4 sm:$0xff]  }
 0x346   :  { %5667 = vmatpush2.bf16.msra.mxu1 %v9344_v57  ;;  %v9305_v57 = vld [vmem:[%s13086_s3 + $0x888] ss:$16 sps:$4 sm:$0xff]  }
 0x347   :  { %5668 = vmatprep.subr.bf16.mxu1 %v9352_v60  ;;  %v9319_v60 = vld [vmem:[%s13086_s3 + $0x84c] ss:$16 sps:$4 sm:$0xff]  }
 0x34a   :  { %5669 = vmatpush2.bf16.msra.mxu1 %v9350_v59  ;;  %v9311_v59 = vld [vmem:[%s13086_s3 + $0x868] ss:$16 sps:$4 sm:$0xff]  }
 0x34b   :  { %5670 = vmatprep.subr.bf16.mxu1 %v9358_v61  ;;  %v9325_v61 = vld [vmem:[%s13086_s3 + $0x82c] ss:$16 sps:$4 sm:$0xff]  }
 0x34e   :  { %5671 = vmatpush2.bf16.msra.mxu1 %v9356_v47  ;;  %v9317_v47 = vld [vmem:[%s13086_s3 + $0x848] ss:$16 sps:$4 sm:$0xff]  }
 0x34f   :  { %5672 = vmatprep.subr.bf16.mxu1 %v9364_v0  ;;  %v9331_v0 = vld [vmem:[%s13086_s3 + $0x80c] ss:$16 sps:$4 sm:$0xff]  }
 0x352   :  { %5673 = vmatpush2.bf16.msra.mxu1 %v9362_v3  ;;  %v9329_v3 = vld [vmem:[%s13086_s3 + $0x808] ss:$16 sps:$4 sm:$0xff]  }
 0x353   :  { %5674 = vmatprep.subr.bf16.mxu1 %v9370_v9  ;;  %v9343_v9 = vld [vmem:[%s13086_s3 + $0x9cc] ss:$16 sps:$4 sm:$0xff]  }
 0x355   :  { %v3852_v62 = vpop.f32.mrf.mxu1 }
 0x356   :  { %v11960_v1 = vadd.f32 %v3852_v62, %v11843_v16  ;;  %5675 = vmatpush2.bf16.msra.mxu1 %v9368_v14  ;;  %v9323_v62 = vld [vmem:[%s13086_s3 + $0x828] ss:$16 sps:$4 sm:$0xff]  }
 0x357   :  { %v3854_v4 = vpop.f32.mrf.mxu1  ;;  %5676 = vmatprep.subr.bf16.mxu1 %v9376_v17  ;;  %v4685_v24 = vpop.f32.mrf.mxu0  ;;  %v9341_v14 = vld [vmem:[%s13086_s3 + $0x9c8] ss:$16 sps:$4 sm:$0xff]  }
 0x358   :  { %v11966_v6 = vadd.f32 %v3854_v4, %v11849_v38  ;;  %v9382_v38 = vld [vmem:[%s13086_s3 + $0xaec] ss:$16 sps:$4 sm:$0xff]   ;;  %v9347_v17 = vld [vmem:[%s13086_s3 + $0x9a8] ss:$16 sps:$4 sm:$0xff]  }
 0x359   :  { %v3856_v8 = vpop.f32.mrf.mxu1  ;;  %v4687_v22 = vpop.f32.mrf.mxu0  ;;  %v9337_v4 = vld [vmem:[%s13086_s3 + $0x9ec] ss:$16 sps:$4 sm:$0xff]  }
 0x35a   :  { %v11972_v10 = vadd.f32 %v3856_v8, %v11861_v28  ;;  %5677 = vmatpush2.bf16.msra.mxu1 %v9374_v21  ;;  %v3994_v28 = vrot.slane %v11992_v25, %v10512_v41  ;;  %v9335_v8 = vld [vmem:[%s13086_s3 + $0x9e8] ss:$16 sps:$4 sm:$0xff]   ;;  %v9355_v21 = vld [vmem:[%s13086_s3 + $0x98c] ss:$16 sps:$4 sm:$0xff]  }
 0x35b   :  { %v3858_v15 = vpop.f32.mrf.mxu1  ;;  %5732 = vmatprep.subr.bf16.mxu1 %v9382_v38  ;;  %v4689_v50 = vpop.f32.mrf.mxu0 }
 0x35c   :  { %v11978_v16 = vadd.f32 %v3858_v15, %v11867_v30  ;;  %v4688_v30 = vadd.f32 %v4687_v22, %v3998_v26  ;;  %v4686_v33 = vadd.f32 %v4685_v24, %v3994_v28  ;;  %v4690_v42 = vadd.f32 %v4689_v50, %v3994_v28  ;;  %v9349_v15 = vld [vmem:[%s13086_s3 + $0x9ac] ss:$16 sps:$4 sm:$0xff]   ;;  %v9353_v24 = vld [vmem:[%s13086_s3 + $0x988] ss:$16 sps:$4 sm:$0xff]  }
 0x35d   :  { %v4691_v31 = vpop.f32.mrf.mxu0  ;;  %v9361_v22 = vld [vmem:[%s13086_s3 + $0x96c] ss:$16 sps:$4 sm:$0xff]   ;;  %v9359_v28 = vld [vmem:[%s13086_s3 + $0x968] ss:$16 sps:$4 sm:$0xff]  }
 0x35e   :  { %v4692_v35 = vadd.f32 %v4691_v31, %v3998_v26  ;;  %v9367_v50 = vld [vmem:[%s13086_s3 + $0x94c] ss:$16 sps:$4 sm:$0xff]   ;;  %v9365_v31 = vld [vmem:[%s13086_s3 + $0x948] ss:$16 sps:$4 sm:$0xff]  }
 0x395   :  { %v4728_v29 = vpop.f32.mrf.mxu1 }
 0x396   :  { %v4729_v37 = vadd.f32 %v4728_v29, %v4686_v33  ;;  %v4002_v29 = vrot.slane %v11992_v25, %v10684_v2  ;;  %v4006_v33 = vrot.slane %v11992_v25, %v10699_v7  ;;  %v9371_v25 = vld [vmem:[%s13086_s3 + $0x928] ss:$16 sps:$4 sm:$0xff]  }
 0x397   :  { %v4730_v32 = vpop.f32.mrf.mxu1  ;;  %v4771_v38 = vpop.f32.mrf.mxu0 }
 0x398   :  { %v4731_v36 = vadd.f32 %v4730_v32, %v4688_v30  ;;  %v4823_v48 = vmax.f32 %v4729_v37, 0.0 }
 0x399   :  { %v4732_v39 = vpop.f32.mrf.mxu1  ;;  %v4773_v26 = vpop.f32.mrf.mxu0 }
 0x39a   :  { %v4733_v56 = vadd.f32 %v4732_v39, %v4690_v42  ;;  %v4824_v44 = vmax.f32 %v4731_v36, 0.0  ;;  %v9373_v42 = vld [vmem:[%s13086_s3 + $0x92c] ss:$16 sps:$4 sm:$0xff]   ;;  %v4772_v39 = vadd.f32 %v4771_v38, %v4002_v29  ;;  %v5799_v38 = vld [vmem:[%s13084_s1 + $0x230] sm:$0xff] }
 0x39b   :  { %v4734_v19 = vpop.f32.mrf.mxu1  ;;  %v4775_v30 = vpop.f32.mrf.mxu0 }
 0x39c   :  { %v4735_v45 = vadd.f32 %v4734_v19, %v4692_v35  ;;  %v4827_v13 = vmax.f32 %v4733_v56, 0.0  ;;  %v4774_v56 = vadd.f32 %v4773_v26, %v4006_v33  ;;  %v4776_v37 = vadd.f32 %v4775_v30, %v4002_v29  ;;  %v9391_v26 = vld [vmem:[%s13086_s3 + $0xa8c] ss:$16 sps:$4 sm:$0xff]   ;;  %v5795_v29 = vld [vmem:[%s13084_s1 + $0x1b0] sm:$0xff] }
 0x39d   :  { %v4777_v35 = vpop.f32.mrf.mxu0  ;;  %v5797_v30 = vld [vmem:[%s13084_s1 + $0x1f0] sm:$0xff] }
 0x39e   :  { %v4828_v46 = vmax.f32 %v4735_v45, 0.0  ;;  %v12001_v51 = vpack.c.bf16 %v4827_v13, %v4823_v48  ;;  %v9379_v45 = vld [vmem:[%s13086_s3 + $0x90c] ss:$16 sps:$4 sm:$0xff]   ;;  %v4778_v13 = vadd.f32 %v4777_v35, %v4006_v33  ;;  %v5811_v48 = vld [vmem:[%s13084_s1 + $0x3b0] sm:$0xff]  ;;  %v9389_v33 = vld [vmem:[%s13086_s3 + $0xa88] ss:$16 sps:$4 sm:$0xff]  }
 0x39f   :  { %v5793_v35 = vld [vmem:[%s13084_s1 + $0x170] sm:$0xff] }
 0x3a0   :  { %v4832_v5 = vpack.c.bf16 %v4828_v46, %v4824_v44 }
 0x3a2   :  { %5635 = vmatprep.mubr.bf16.mxu0 %v4832_v5 }
 0x3a3   :  { %5636 = vmatmul.mubr.bf16.vlgmr.msra.gmra.mxu0 %v12001_v51 }
 0x3a4   :  { %5690 = vmatpush1.bf16.msra.mxu0 %v9287_v49  ;;  %5721 = vmatprep.mubr.bf16.mxu0 %v4832_v5  ;;  %v5813_v5 = vld [vmem:[%s13084_s1 + $0x3f0] sm:$0xff] }
 0x3a5   :  { %5691 = vmatprep.subr.bf16.mxu0 %v9295_v52 }
 0x3a8   :  { %5692 = vmatpush1.bf16.msra.mxu0 %v9293_v53 }
 0x3a9   :  { %5693 = vmatprep.subr.bf16.mxu0 %v9301_v54  ;;  %v9377_v54 = vld [vmem:[%s13086_s3 + $0x908] ss:$16 sps:$4 sm:$0xff]  }
 0x3ac   :  { %5694 = vmatpush1.bf16.msra.mxu0 %v9299_v55 }
 0x3ad   :  { %5695 = vmatprep.subr.bf16.mxu0 %v9307_v40  ;;  %v8622_v40 = vcombine.high %v5811_v48, %v5813_v5 }
 0x3b0   :  { %5696 = vmatpush1.bf16.msra.mxu0 %v9305_v57 }
 0x3b1   :  { %5697 = vmatprep.subr.bf16.mxu0 %v9313_v11 }
 0x3b4   :  { %5698 = vmatpush1.bf16.msra.mxu0 %v9311_v59 }
 0x3b5   :  { %5699 = vmatprep.subr.bf16.mxu0 %v9319_v60  ;;  %v5807_v60 = vld [vmem:[%s13084_s1 + $0x330] sm:$0xff] }
 0x3b8   :  { %5700 = vmatpush1.bf16.msra.mxu0 %v9317_v47  ;;  %v5809_v47 = vld [vmem:[%s13084_s1 + $0x370] sm:$0xff] }
 0x3b9   :  { %5701 = vmatprep.subr.bf16.mxu0 %v9325_v61 }
 0x3bc   :  { %5702 = vmatpush1.bf16.msra.mxu0 %v9323_v62  ;;  %v9380_v62 = vld [vmem:[%s13086_s3 + $0xae8] ss:$16 sps:$4 sm:$0xff]  }
 0x3bd   :  { %5703 = vmatprep.subr.bf16.mxu0 %v9331_v0 }
 0x3c0   :  { %5704 = vmatpush1.bf16.msra.mxu0 %v9329_v3  ;;  %v9385_v3 = vld [vmem:[%s13086_s3 + $0xacc] ss:$16 sps:$4 sm:$0xff]  }
 0x3c1   :  { %5705 = vmatprep.subr.bf16.mxu0 %v9337_v4  ;;  %v8621_v4 = vcombine.low %v5811_v48, %v5813_v5  ;;  %v5783_v5 = vld [vmem:[%s13084_s1 + $0x30] sm:$0xff] }
 0x3c4   :  { %5706 = vmatpush2.bf16.msra.mxu0 %v9335_v8  ;;  %v8618_v8 = vcombine.high %v5807_v60, %v5809_v47 }
 0x3c5   :  { %5707 = vmatprep.subr.bf16.mxu0 %v9343_v9  ;;  %v5803_v9 = vld [vmem:[%s13084_s1 + $0x2b0] sm:$0xff] }
 0x3c8   :  { %5708 = vmatpush2.bf16.msra.mxu0 %v9341_v14  ;;  %v5805_v14 = vld [vmem:[%s13084_s1 + $0x2f0] sm:$0xff] }
 0x3c9   :  { %5709 = vmatprep.subr.bf16.mxu0 %v9349_v15  ;;  %v9383_v15 = vld [vmem:[%s13086_s3 + $0xac8] ss:$16 sps:$4 sm:$0xff]  }
 0x3cc   :  { %5710 = vmatpush2.bf16.msra.mxu0 %v9347_v17  ;;  %v8617_v17 = vcombine.low %v5807_v60, %v5809_v47 }
 0x3cd   :  { %5711 = vmatprep.subr.bf16.mxu0 %v9355_v21  ;;  %v8614_v21 = vcombine.high %v5803_v9, %v5805_v14 }
 0x3d0   :  { %5712 = vmatpush2.bf16.msra.mxu0 %v9353_v24  ;;  %v5801_v24 = vld [vmem:[%s13084_s1 + $0x270] sm:$0xff] }
 0x3d1   :  { %5713 = vmatprep.subr.bf16.mxu0 %v9361_v22  ;;  %v9386_v22 = vld [vmem:[%s13086_s3 + $0xaa8] ss:$16 sps:$4 sm:$0xff]  }
 0x3d4   :  { %5714 = vmatpush2.bf16.msra.mxu0 %v9359_v28  ;;  %v8613_v28 = vcombine.low %v5803_v9, %v5805_v14  ;;  %v5835_v14 = vld [vmem:[%s13084_s1 + $0x6b0] sm:$0xff] }
 0x3d5   :  { %v4814_v32 = vpop.f32.mrf.mxu1  ;;  %5715 = vmatprep.subr.bf16.mxu0 %v9367_v50  ;;  %v8610_v50 = vcombine.high %v5799_v38, %v5801_v24 }
 0x3d6   :  { %v4815_v49 = vadd.f32 %v4814_v32, %v4772_v39  ;;  %v8609_v32 = vcombine.low %v5799_v38, %v5801_v24  ;;  %v5791_v39 = vld [vmem:[%s13084_s1 + $0x130] sm:$0xff] }
 0x3d7   :  { %v4816_v36 = vpop.f32.mrf.mxu1  ;;  %v5831_v24 = vld [vmem:[%s13084_s1 + $0x630] sm:$0xff] }
 0x3d8   :  { %5716 = vmatpush2.bf16.msra.mxu0 %v9365_v31  ;;  %v4817_v44 = vadd.f32 %v4816_v36, %v4774_v56  ;;  %v4825_v59 = vmax.f32 %v4815_v49, 0.0  ;;  %v9394_v31 = vld [vmem:[%s13086_s3 + $0xa6c] ss:$16 sps:$4 sm:$0xff]   ;;  %v9392_v36 = vld [vmem:[%s13086_s3 + $0xa68] ss:$16 sps:$4 sm:$0xff]   ;;  %v5785_v49 = vld [vmem:[%s13084_s1 + $0x70] sm:$0xff] }
 0x3d9   :  { %v4818_v19 = vpop.f32.mrf.mxu1  ;;  %5717 = vmatprep.subr.bf16.mxu0 %v9373_v42  ;;  %v8606_v42 = vcombine.high %v5795_v29, %v5797_v30  ;;  %v9397_v56 = vld [vmem:[%s13086_s3 + $0xa4c] ss:$16 sps:$4 sm:$0xff]   ;;  %v8593_v60 = vcombine.low %v5783_v5, %v5785_v49 }
 0x3da   :  { %v4819_v46 = vadd.f32 %v4818_v19, %v4776_v37  ;;  %v4826_v57 = vmax.f32 %v4817_v44, 0.0  ;;  %v8605_v37 = vcombine.low %v5795_v29, %v5797_v30  ;;  %v5787_v19 = vld [vmem:[%s13084_s1 + $0xb0] sm:$0xff]  ;;  %v9400_v44 = vld [vmem:[%s13086_s3 + $0xa2c] ss:$16 sps:$4 sm:$0xff]  }
 0x3db   :  { %v4820_v52 = vpop.f32.mrf.mxu1  ;;  %v5827_v30 = vld [vmem:[%s13084_s1 + $0x5b0] sm:$0xff] }
 0x3dc   :  { %v4821_v53 = vadd.f32 %v4820_v52, %v4778_v13  ;;  %5718 = vmatpush2.bf16.msra.mxu0 %v9371_v25  ;;  %v4829_v55 = vmax.f32 %v4819_v46, 0.0  ;;  %v8602_v25 = vcombine.high %v5791_v39, %v5793_v35  ;;  %v9395_v13 = vld [vmem:[%s13086_s3 + $0xa48] ss:$16 sps:$4 sm:$0xff]   ;;  %v8601_v46 = vcombine.low %v5791_v39, %v5793_v35  ;;  %v5823_v35 = vld [vmem:[%s13084_s1 + $0x530] sm:$0xff] }
 0x3dd   :  { %5719 = vmatprep.subr.bf16.mxu0 %v9379_v45  ;;  %v5789_v45 = vld [vmem:[%s13084_s1 + $0xf0] sm:$0xff]  ;;  %v9398_v52 = vld [vmem:[%s13086_s3 + $0xa28] ss:$16 sps:$4 sm:$0xff]  }
 0x3de   :  { %v4830_v11 = vmax.f32 %v4821_v53, 0.0  ;;  %v12113_v0 = vpack.c.bf16 %v4829_v55, %v4825_v59  ;;  %v8598_v48 = vcombine.high %v5787_v19, %v5789_v45  ;;  %v9403_v53 = vld [vmem:[%s13086_s3 + $0xa0c] ss:$16 sps:$4 sm:$0xff]   ;;  %v8594_v55 = vcombine.high %v5783_v5, %v5785_v49  ;;  %v5815_v49 = vld [vmem:[%s13084_s1 + $0x430] sm:$0xff] }
 0x3df   :  { %v9406_v59 = vld [vmem:[%s13086_s3 + $0xbec] ss:$16 sps:$4 sm:$0xff]  }
 0x3e0   :  { %v4834_v61 = vpack.c.bf16 %v4830_v11, %v4826_v57  ;;  %5720 = vmatpush2.bf16.msra.mxu0 %v9377_v54  ;;  %v8597_v54 = vcombine.low %v5787_v19, %v5789_v45  ;;  %v5845_v57 = vld [vmem:[%s13084_s1 + $0x7f0] sm:$0xff]  ;;  %v9401_v11 = vld [vmem:[%s13086_s3 + $0xa08] ss:$16 sps:$4 sm:$0xff]  }
 0x3e1   :  { %6573 = vmatprep.subr.bf16.mxu0 %v8622_v40  ;;  %v5843_v40 = vld [vmem:[%s13084_s1 + $0x7b0] sm:$0xff] }
 0x3e2   :  { %5678 = vmatprep.mubr.bf16.mxu1 %v4834_v61  ;;  %v8654_v47 = vcombine.high %v5843_v40, %v5845_v57  ;;  %v5819_v45 = vld [vmem:[%s13084_s1 + $0x4b0] sm:$0xff] }
 0x3e3   :  { %5722 = vmatmul.mubr.bf16.vlgmr.msra.gmra.mxu0 %v12001_v51  ;;  %5679 = vmatmul.mubr.bf16.vlgmr.msra.gmra.mxu1 %v12113_v0  ;;  %v9388_v51 = vld [vmem:[%s13086_s3 + $0xaac] ss:$16 sps:$4 sm:$0xff]  }
 0x3e4   :  { %5733 = vmatpush1.bf16.msra.mxu1 %v9380_v62  ;;  %5764 = vmatprep.mubr.bf16.mxu1 %v4834_v61  ;;  %v5839_v61 = vld [vmem:[%s13084_s1 + $0x730] sm:$0xff] }
 0x3e5   :  { %5734 = vmatprep.subr.bf16.mxu1 %v9385_v3  ;;  %6574 = vmatpush1.bf16.msra.mxu0 %v8621_v4  ;;  %v5841_v62 = vld [vmem:[%s13084_s1 + $0x770] sm:$0xff]  ;;  %v9404_v3 = vld [vmem:[%s13086_s3 + $0xbe8] ss:$16 sps:$4 sm:$0xff]   ;;  %v9409_v4 = vld [vmem:[%s13086_s3 + $0xbcc] ss:$16 sps:$4 sm:$0xff]  }
 0x3e6   :  { %6575 = vmatprep.subr.bf16.mxu0 %v8618_v8  ;;  %6605 = vmatprep.mubr.bf16.mxu0 %v9783_v58  ;;  %v8653_v8 = vcombine.low %v5843_v40, %v5845_v57  ;;  %v8650_v9 = vcombine.high %v5839_v61, %v5841_v62  ;;  %v5875_v40 = vld [vmem:[%s13084_s1 + $0xbb0] sm:$0xff] }
 0x3e7   :  { %v5877_v57 = vld [vmem:[%s13084_s1 + $0xbf0] sm:$0xff] }
 0x3e8   :  { %5735 = vmatpush1.bf16.msra.mxu1 %v9383_v15  ;;  %v5837_v15 = vld [vmem:[%s13084_s1 + $0x6f0] sm:$0xff] }
 0x3e9   :  { %5736 = vmatprep.subr.bf16.mxu1 %v9388_v51  ;;  %6576 = vmatpush1.bf16.msra.mxu0 %v8617_v17  ;;  %v9407_v51 = vld [vmem:[%s13086_s3 + $0xbc8] ss:$16 sps:$4 sm:$0xff]   ;;  %v9412_v17 = vld [vmem:[%s13086_s3 + $0xbac] ss:$16 sps:$4 sm:$0xff]   ;;  %v8646_v38 = vcombine.high %v5835_v14, %v5837_v15 }
 0x3ea   :  { %6577 = vmatprep.subr.bf16.mxu0 %v8614_v21  ;;  %v8649_v21 = vcombine.low %v5839_v61, %v5841_v62  ;;  %v8686_v61 = vcombine.high %v5875_v40, %v5877_v57 }
 0x3ec   :  { %5737 = vmatpush1.bf16.msra.mxu1 %v9386_v22  ;;  %v5833_v22 = vld [vmem:[%s13084_s1 + $0x670] sm:$0xff] }
 0x3ed   :  { %5738 = vmatprep.subr.bf16.mxu1 %v9391_v26  ;;  %6578 = vmatpush1.bf16.msra.mxu0 %v8613_v28  ;;  %v9410_v26 = vld [vmem:[%s13086_s3 + $0xba8] ss:$16 sps:$4 sm:$0xff]   ;;  %v9415_v28 = vld [vmem:[%s13086_s3 + $0xb8c] ss:$16 sps:$4 sm:$0xff]   ;;  %v8642_v29 = vcombine.high %v5831_v24, %v5833_v22 }
 0x3ee   :  { %6579 = vmatprep.subr.bf16.mxu0 %v8610_v50  ;;  %v8645_v50 = vcombine.low %v5835_v14, %v5837_v15  ;;  %v5810_v14 = vld [vmem:[%s13084_s1 + $0x378] sm:$0xff]  ;;  %v8685_v15 = vcombine.low %v5875_v40, %v5877_v57  ;;  %v5853_v40 = vld [vmem:[%s13084_s1 + $0x8f0] sm:$0xff] }
 0x3f0   :  { %5739 = vmatpush1.bf16.msra.mxu1 %v9389_v33  ;;  %v5829_v33 = vld [vmem:[%s13084_s1 + $0x5f0] sm:$0xff] }
 0x3f1   :  { %5740 = vmatprep.subr.bf16.mxu1 %v9394_v31  ;;  %6580 = vmatpush1.bf16.msra.mxu0 %v8609_v32  ;;  %v9413_v31 = vld [vmem:[%s13086_s3 + $0xb88] ss:$16 sps:$4 sm:$0xff]   ;;  %v9418_v32 = vld [vmem:[%s13086_s3 + $0xb6c] ss:$16 sps:$4 sm:$0xff]   ;;  %v8638_v39 = vcombine.high %v5827_v30, %v5829_v33 }
 0x3f2   :  { %6581 = vmatprep.subr.bf16.mxu0 %v8606_v42  ;;  %v8641_v42 = vcombine.low %v5831_v24, %v5833_v22  ;;  %v5804_v22 = vld [vmem:[%s13084_s1 + $0x2b8] sm:$0xff] }
 0x3f4   :  { %5741 = vmatpush1.bf16.msra.mxu1 %v9392_v36  ;;  %v5825_v36 = vld [vmem:[%s13084_s1 + $0x570] sm:$0xff] }
 0x3f5   :  { %5742 = vmatprep.subr.bf16.mxu1 %v9397_v56  ;;  %6582 = vmatpush1.bf16.msra.mxu0 %v8605_v37  ;;  %v9416_v56 = vld [vmem:[%s13086_s3 + $0xb68] ss:$16 sps:$4 sm:$0xff]   ;;  %v9421_v37 = vld [vmem:[%s13086_s3 + $0xb4c] ss:$16 sps:$4 sm:$0xff]   ;;  %v8634_v19 = vcombine.high %v5823_v35, %v5825_v36 }
 0x3f6   :  { %6583 = vmatprep.subr.bf16.mxu0 %v8602_v25  ;;  %v8637_v25 = vcombine.low %v5827_v30, %v5829_v33  ;;  %v5865_v30 = vld [vmem:[%s13084_s1 + $0xa70] sm:$0xff] }
 0x3f8   :  { %5743 = vmatpush1.bf16.msra.mxu1 %v9395_v13  ;;  %v5821_v13 = vld [vmem:[%s13084_s1 + $0x4f0] sm:$0xff] }
 0x3f9   :  { %5744 = vmatprep.subr.bf16.mxu1 %v9400_v44  ;;  %6584 = vmatpush1.bf16.msra.mxu0 %v8601_v46  ;;  %v9419_v44 = vld [vmem:[%s13086_s3 + $0xb48] ss:$16 sps:$4 sm:$0xff]   ;;  %v9424_v46 = vld [vmem:[%s13086_s3 + $0xb2c] ss:$16 sps:$4 sm:$0xff]   ;;  %v8630_v5 = vcombine.high %v5819_v45, %v5821_v13 }
 0x3fa   :  { %6585 = vmatprep.subr.bf16.mxu0 %v8598_v48  ;;  %v8633_v48 = vcombine.low %v5823_v35, %v5825_v36  ;;  %v5859_v36 = vld [vmem:[%s13084_s1 + $0x9b0] sm:$0xff] }
 0x3fc   :  { %5745 = vmatpush1.bf16.msra.mxu1 %v9398_v52  ;;  %v5817_v52 = vld [vmem:[%s13084_s1 + $0x470] sm:$0xff] }
 0x3fd   :  { %5746 = vmatprep.subr.bf16.mxu1 %v9403_v53  ;;  %6586 = vmatpush1.bf16.msra.mxu0 %v8597_v54  ;;  %v9422_v53 = vld [vmem:[%s13086_s3 + $0xb28] ss:$16 sps:$4 sm:$0xff]   ;;  %v9427_v54 = vld [vmem:[%s13086_s3 + $0xb0c] ss:$16 sps:$4 sm:$0xff]   ;;  %v8625_v62 = vcombine.low %v5815_v49, %v5817_v52 }
 0x3fe   :  { %6587 = vmatprep.subr.bf16.mxu0 %v8594_v55  ;;  %v8629_v55 = vcombine.low %v5819_v45, %v5821_v13 }
 0x400   :  { %5747 = vmatpush1.bf16.msra.mxu1 %v9401_v11  ;;  %v8626_v11 = vcombine.high %v5815_v49, %v5817_v52  ;;  %v5794_v49 = vld [vmem:[%s13084_s1 + $0x178] sm:$0xff] }
 0x401   :  { %5748 = vmatprep.subr.bf16.mxu1 %v9406_v59  ;;  %6588 = vmatpush1.bf16.msra.mxu0 %v8593_v60  ;;  %v5812_v59 = vld [vmem:[%s13084_s1 + $0x3b8] sm:$0xff] }
 0x402   :  { %6589 = vmatprep.subr.bf16.mxu0 %v8654_v47  ;;  %v5814_v60 = vld [vmem:[%s13084_s1 + $0x3f8] sm:$0xff] }
 0x403   :  { %v9425_v47 = vld [vmem:[%s13086_s3 + $0xb08] ss:$16 sps:$4 sm:$0xff]  }
 0x404   :  { %5749 = vmatpush2.bf16.msra.mxu1 %v9404_v3  ;;  %v5871_v3 = vld [vmem:[%s13084_s1 + $0xb30] sm:$0xff] }
 0x405   :  { %5750 = vmatprep.subr.bf16.mxu1 %v9409_v4  ;;  %6590 = vmatpush2.bf16.msra.mxu0 %v8653_v8  ;;  %v5873_v4 = vld [vmem:[%s13084_s1 + $0xb70] sm:$0xff]  ;;  %v8624_v8 = vcombine.high %v5812_v59, %v5814_v60 }
 0x406   :  { %6591 = vmatprep.subr.bf16.mxu0 %v8650_v9  ;;  %v5808_v9 = vld [vmem:[%s13084_s1 + $0x338] sm:$0xff] }
 0x407   :  { %v8620_v24 = vcombine.high %v5808_v9, %v5810_v14 }
 0x408   :  { %5751 = vmatpush2.bf16.msra.mxu1 %v9407_v51  ;;  %v8682_v51 = vcombine.high %v5871_v3, %v5873_v4 }
 0x409   :  { %5752 = vmatprep.subr.bf16.mxu1 %v9412_v17  ;;  %6592 = vmatpush2.bf16.msra.mxu0 %v8649_v21  ;;  %v8623_v17 = vcombine.low %v5812_v59, %v5814_v60  ;;  %v5867_v21 = vld [vmem:[%s13084_s1 + $0xab0] sm:$0xff]  ;;  %v5790_v59 = vld [vmem:[%s13084_s1 + $0xf8] sm:$0xff] }
 0x40a   :  { %6593 = vmatprep.subr.bf16.mxu0 %v8646_v38  ;;  %v5869_v38 = vld [vmem:[%s13084_s1 + $0xaf0] sm:$0xff] }
 0x40c   :  { %5753 = vmatpush2.bf16.msra.mxu1 %v9410_v26  ;;  %v5806_v26 = vld [vmem:[%s13084_s1 + $0x2f8] sm:$0xff] }
 0x40d   :  { %5754 = vmatprep.subr.bf16.mxu1 %v9415_v28  ;;  %6594 = vmatpush2.bf16.msra.mxu0 %v8645_v50  ;;  %v8681_v28 = vcombine.low %v5871_v3, %v5873_v4  ;;  %v8678_v50 = vcombine.high %v5867_v21, %v5869_v38  ;;  %v8616_v33 = vcombine.high %v5804_v22, %v5806_v26  ;;  %v5849_v3 = vld [vmem:[%s13084_s1 + $0x870] sm:$0xff] }
 0x40e   :  { %6595 = vmatprep.subr.bf16.mxu0 %v8642_v29  ;;  %v8619_v29 = vcombine.low %v5808_v9, %v5810_v14  ;;  %v8615_v35 = vcombine.low %v5804_v22, %v5806_v26  ;;  %v5786_v9 = vld [vmem:[%s13084_s1 + $0x78] sm:$0xff] }
 0x40f   :  { %v5846_v22 = vld [vmem:[%s13084_s1 + $0x7f8] sm:$0xff] }
 0x410   :  { %5755 = vmatpush2.bf16.msra.mxu1 %v9413_v31  ;;  %v5800_v31 = vld [vmem:[%s13084_s1 + $0x238] sm:$0xff] }
 0x411   :  { %5756 = vmatprep.subr.bf16.mxu1 %v9418_v32  ;;  %6596 = vmatpush2.bf16.msra.mxu0 %v8641_v42  ;;  %v5802_v32 = vld [vmem:[%s13084_s1 + $0x278] sm:$0xff]  ;;  %v8677_v42 = vcombine.low %v5867_v21, %v5869_v38  ;;  %v5909_v21 = vld [vmem:[%s13084_s1 + $0xff0] sm:$0xff] }
 0x412   :  { %6597 = vmatprep.subr.bf16.mxu0 %v8638_v39  ;;  %v8611_v13 = vcombine.low %v5800_v31, %v5802_v32 }
 0x414   :  { %5757 = vmatpush2.bf16.msra.mxu1 %v9416_v56  ;;  %v5861_v56 = vld [vmem:[%s13084_s1 + $0x9f0] sm:$0xff] }
 0x415   :  { %5758 = vmatprep.subr.bf16.mxu1 %v9421_v37  ;;  %6598 = vmatpush2.bf16.msra.mxu0 %v8637_v25  ;;  %v8612_v37 = vcombine.high %v5800_v31, %v5802_v32  ;;  %v5798_v25 = vld [vmem:[%s13084_s1 + $0x1f8] sm:$0xff]  ;;  %v8670_v45 = vcombine.high %v5859_v36, %v5861_v56  ;;  %v8669_v52 = vcombine.low %v5859_v36, %v5861_v56  ;;  %v5901_v36 = vld [vmem:[%s13084_s1 + $0xef0] sm:$0xff] }
 0x416   :  { %6599 = vmatprep.subr.bf16.mxu0 %v8634_v19  ;;  %v5842_v31 = vld [vmem:[%s13084_s1 + $0x778] sm:$0xff] }
 0x418   :  { %5759 = vmatpush2.bf16.msra.mxu1 %v9419_v44  ;;  %v5855_v44 = vld [vmem:[%s13084_s1 + $0x930] sm:$0xff] }
 0x419   :  { %5760 = vmatprep.subr.bf16.mxu1 %v9424_v46  ;;  %6600 = vmatpush2.bf16.msra.mxu0 %v8633_v48  ;;  %v5857_v46 = vld [vmem:[%s13084_s1 + $0x970] sm:$0xff] }
 0x41a   :  { %6601 = vmatprep.subr.bf16.mxu0 %v8630_v5  ;;  %v5792_v5 = vld [vmem:[%s13084_s1 + $0x138] sm:$0xff]  ;;  %v8665_v60 = vcombine.low %v5855_v44, %v5857_v46 }
 0x41b   :  { %v8604_v57 = vcombine.high %v5792_v5, %v5794_v49 }
 0x41c   :  { %5761 = vmatpush2.bf16.msra.mxu1 %v9422_v53  ;;  %v8666_v53 = vcombine.high %v5855_v44, %v5857_v46  ;;  %v5897_v44 = vld [vmem:[%s13084_s1 + $0xe70] sm:$0xff] }
 0x41d   :  { %5762 = vmatprep.subr.bf16.mxu1 %v9427_v54  ;;  %6602 = vmatpush2.bf16.msra.mxu0 %v8629_v55  ;;  %v5851_v55 = vld [vmem:[%s13084_s1 + $0x8b0] sm:$0xff] }
 0x41e   :  { %6603 = vmatprep.subr.bf16.mxu0 %v8626_v11  ;;  %v5788_v11 = vld [vmem:[%s13084_s1 + $0xb8] sm:$0xff]  ;;  %v8661_v14 = vcombine.low %v5851_v55, %v5853_v40 }
 0x41f   :  { %v8600_v4 = vcombine.high %v5788_v11, %v5790_v59 }
 0x420   :  { %5763 = vmatpush2.bf16.msra.mxu1 %v9425_v47  ;;  %v8662_v47 = vcombine.high %v5851_v55, %v5853_v40  ;;  %v5893_v55 = vld [vmem:[%s13084_s1 + $0xdf0] sm:$0xff] }
 0x421   :  { %6616 = vmatprep.subr.bf16.mxu1 %v8686_v61  ;;  %6604 = vmatpush2.bf16.msra.mxu0 %v8625_v62  ;;  %v8603_v61 = vcombine.low %v5792_v5, %v5794_v49  ;;  %v5847_v62 = vld [vmem:[%s13084_s1 + $0x830] sm:$0xff]  ;;  %v5834_v5 = vld [vmem:[%s13084_s1 + $0x678] sm:$0xff] }
 0x422   :  { %6659 = vmatprep.subr.bf16.mxu0 %v8624_v8  ;;  %v5784_v8 = vld [vmem:[%s13084_s1 + $0x38] sm:$0xff]  ;;  %v8657_v26 = vcombine.low %v5847_v62, %v5849_v3 }
 0x423   :  { %5765 = vmatmul.mubr.bf16.vlgmr.msra.gmra.mxu1 %v12113_v0  ;;  %v5863_v0 = vld [vmem:[%s13084_s1 + $0xa30] sm:$0xff]  ;;  %v8596_v38 = vcombine.high %v5784_v8, %v5786_v9 }
 0x424   :  { %6617 = vmatpush1.bf16.msra.mxu1 %v8685_v15  ;;  %6606 = vmatmul.mubr.bf16.vlgmr.msra.gmra.mxu0 %v9927_v20  ;;  %v8674_v39 = vcombine.high %v5863_v0, %v5865_v30  ;;  %v8673_v19 = vcombine.low %v5863_v0, %v5865_v30  ;;  %v8658_v15 = vcombine.high %v5847_v62, %v5849_v3  ;;  %v5905_v0 = vld [vmem:[%s13084_s1 + $0xf70] sm:$0xff] }
 0x425   :  { %6618 = vmatprep.subr.bf16.mxu1 %v8682_v51  ;;  %6660 = vmatpush1.bf16.msra.mxu0 %v8623_v17  ;;  %v8599_v51 = vcombine.low %v5788_v11, %v5790_v59  ;;  %v5907_v17 = vld [vmem:[%s13084_s1 + $0xfb0] sm:$0xff]  ;;  %v5830_v11 = vld [vmem:[%s13084_s1 + $0x5f8] sm:$0xff] }
 0x426   :  { %6661 = vmatprep.subr.bf16.mxu0 %v8620_v24  ;;  %6648 = vmatprep.mubr.bf16.mxu1 %v9797_v63  ;;  %v5844_v24 = vld [vmem:[%s13084_s1 + $0x7b8] sm:$0xff]  ;;  %v8717_v32 = vcombine.low %v5907_v17, %v5909_v21  ;;  %v5889_v62 = vld [vmem:[%s13084_s1 + $0xd70] sm:$0xff] }
 0x427   :  { %6691 = vmatprep.mubr.bf16.mxu0 %v9783_v58  ;;  %v5796_v58 = vld [vmem:[%s13084_s1 + $0x1b8] sm:$0xff]  ;;  %v8656_v30 = vcombine.high %v5844_v24, %v5846_v22 }
 0x428   :  { %6619 = vmatpush1.bf16.msra.mxu1 %v8681_v28  ;;  %v8608_v48 = vcombine.high %v5796_v58, %v5798_v25  ;;  %v8607_v54 = vcombine.low %v5796_v58, %v5798_v25  ;;  %v8718_v28 = vcombine.high %v5907_v17, %v5909_v21  ;;  %v5838_v58 = vld [vmem:[%s13084_s1 + $0x6f8] sm:$0xff]  ;;  %v5885_v17 = vld [vmem:[%s13084_s1 + $0xcf0] sm:$0xff] }
 0x429   :  { %6620 = vmatprep.subr.bf16.mxu1 %v8678_v50  ;;  %6662 = vmatpush1.bf16.msra.mxu0 %v8619_v29  ;;  %v8595_v50 = vcombine.low %v5784_v8, %v5786_v9  ;;  %v5903_v29 = vld [vmem:[%s13084_s1 + $0xf30] sm:$0xff]  ;;  %v5826_v8 = vld [vmem:[%s13084_s1 + $0x578] sm:$0xff] }
 0x42a   :  { %6663 = vmatprep.subr.bf16.mxu0 %v8616_v33  ;;  %v5840_v33 = vld [vmem:[%s13084_s1 + $0x738] sm:$0xff]  ;;  %v8713_v25 = vcombine.low %v5903_v29, %v5905_v0 }
 0x42b   :  { %v8652_v56 = vcombine.high %v5840_v33, %v5842_v31 }
 0x42c   :  { %6621 = vmatpush1.bf16.msra.mxu1 %v8677_v42  ;;  %v8714_v42 = vcombine.high %v5903_v29, %v5905_v0  ;;  %v5881_v29 = vld [vmem:[%s13084_s1 + $0xc70] sm:$0xff] }
 0x42d   :  { %6622 = vmatprep.subr.bf16.mxu1 %v8674_v39  ;;  %6664 = vmatpush1.bf16.msra.mxu0 %v8615_v35  ;;  %v8655_v39 = vcombine.low %v5844_v24, %v5846_v22  ;;  %v5899_v35 = vld [vmem:[%s13084_s1 + $0xeb0] sm:$0xff]  ;;  %v5822_v24 = vld [vmem:[%s13084_s1 + $0x4f8] sm:$0xff] }
 0x42e   :  { %6665 = vmatprep.subr.bf16.mxu0 %v8612_v37  ;;  %v5836_v37 = vld [vmem:[%s13084_s1 + $0x6b8] sm:$0xff]  ;;  %v8709_v49 = vcombine.low %v5899_v35, %v5901_v36 }
 0x42f   :  { %v8648_v46 = vcombine.high %v5836_v37, %v5838_v58 }
 0x430   :  { %6623 = vmatpush1.bf16.msra.mxu1 %v8673_v19  ;;  %v8710_v19 = vcombine.high %v5899_v35, %v5901_v36  ;;  %v5878_v35 = vld [vmem:[%s13084_s1 + $0xbf8] sm:$0xff] }
 0x431   :  { %6624 = vmatprep.subr.bf16.mxu1 %v8670_v45  ;;  %6666 = vmatpush1.bf16.msra.mxu0 %v8611_v13  ;;  %v8651_v45 = vcombine.low %v5840_v33, %v5842_v31  ;;  %v5895_v13 = vld [vmem:[%s13084_s1 + $0xe30] sm:$0xff]  ;;  %v5818_v33 = vld [vmem:[%s13084_s1 + $0x478] sm:$0xff] }
 0x432   :  { %6667 = vmatprep.subr.bf16.mxu0 %v8608_v48  ;;  %v5832_v48 = vld [vmem:[%s13084_s1 + $0x638] sm:$0xff]  ;;  %v8705_v59 = vcombine.low %v5895_v13, %v5897_v44 }
 0x433   :  { %v8644_v40 = vcombine.high %v5832_v48, %v5834_v5 }
 0x434   :  { %6625 = vmatpush1.bf16.msra.mxu1 %v8669_v52  ;;  %v8706_v52 = vcombine.high %v5895_v13, %v5897_v44  ;;  %v5868_v44 = vld [vmem:[%s13084_s1 + $0xab8] sm:$0xff] }
 0x435   :  { %6626 = vmatprep.subr.bf16.mxu1 %v8666_v53  ;;  %6668 = vmatpush1.bf16.msra.mxu0 %v8607_v54  ;;  %v8647_v53 = vcombine.low %v5836_v37, %v5838_v58  ;;  %v5891_v54 = vld [vmem:[%s13084_s1 + $0xdb0] sm:$0xff] }
 0x436   :  { %6669 = vmatprep.subr.bf16.mxu0 %v8604_v57  ;;  %v5828_v57 = vld [vmem:[%s13084_s1 + $0x5b8] sm:$0xff]  ;;  %v8701_v9 = vcombine.low %v5891_v54, %v5893_v55 }
 0x437   :  { %v8640_v3 = vcombine.high %v5828_v57, %v5830_v11 }
 0x438   :  { %6627 = vmatpush1.bf16.msra.mxu1 %v8665_v60  ;;  %v8702_v60 = vcombine.high %v5891_v54, %v5893_v55 }
 0x439   :  { %6628 = vmatprep.subr.bf16.mxu1 %v8662_v47  ;;  %6670 = vmatpush1.bf16.msra.mxu0 %v8603_v61  ;;  %v8643_v47 = vcombine.low %v5832_v48, %v5834_v5  ;;  %v5887_v61 = vld [vmem:[%s13084_s1 + $0xd30] sm:$0xff] }
 0x43a   :  { %6671 = vmatprep.subr.bf16.mxu0 %v8600_v4  ;;  %v5824_v4 = vld [vmem:[%s13084_s1 + $0x538] sm:$0xff]  ;;  %v8697_v22 = vcombine.low %v5887_v61, %v5889_v62 }
 0x43b   :  { %v8636_v21 = vcombine.high %v5824_v4, %v5826_v8 }
 0x43c   :  { %6629 = vmatpush1.bf16.msra.mxu1 %v8661_v14  ;;  %v8698_v14 = vcombine.high %v5887_v61, %v5889_v62  ;;  %v9431_v61 = vld [vmem:[%s13086_s3 + $0xcc0] ss:$16 sps:$4 sm:$0xff]  }
 0x43d   :  { %6630 = vmatprep.subr.bf16.mxu1 %v8658_v15  ;;  %6672 = vmatpush1.bf16.msra.mxu0 %v8599_v51  ;;  %v8639_v15 = vcombine.low %v5828_v57, %v5830_v11  ;;  %v5883_v51 = vld [vmem:[%s13084_s1 + $0xcb0] sm:$0xff] }
 0x43e   :  { %6673 = vmatprep.subr.bf16.mxu0 %v8596_v38  ;;  %v5820_v38 = vld [vmem:[%s13084_s1 + $0x4b8] sm:$0xff]  ;;  %v8693_v31 = vcombine.low %v5883_v51, %v5885_v17  ;;  %v9430_v57 = vld [vmem:[%s13086_s3 + $0xce4] ss:$16 sps:$4 sm:$0xff]  }
 0x43f   :  { %v8632_v0 = vcombine.high %v5820_v38, %v5822_v24 }
 0x440   :  { %6631 = vmatpush1.bf16.msra.mxu1 %v8657_v26  ;;  %v8694_v26 = vcombine.high %v5883_v51, %v5885_v17  ;;  %v9439_v51 = vld [vmem:[%s13086_s3 + $0xc84] ss:$16 sps:$4 sm:$0xff]  }
 0x441   :  { %6632 = vmatprep.subr.bf16.mxu1 %v8718_v28  ;;  %6674 = vmatpush1.bf16.msra.mxu0 %v8595_v50  ;;  %v8635_v28 = vcombine.low %v5824_v4, %v5826_v8  ;;  %v5879_v50 = vld [vmem:[%s13084_s1 + $0xc30] sm:$0xff]  ;;  %v5852_v8 = vld [vmem:[%s13084_s1 + $0x8b8] sm:$0xff] }
 0x442   :  { %6675 = vmatprep.subr.bf16.mxu0 %v8656_v30  ;;  %v5816_v30 = vld [vmem:[%s13084_s1 + $0x438] sm:$0xff] }
 0x443   :  { %v8628_v36 = vcombine.high %v5816_v30, %v5818_v33  ;;  %v8627_v58 = vcombine.low %v5816_v30, %v5818_v33  ;;  %v9445_v33 = vld [vmem:[%s13086_s3 + $0xc44] ss:$16 sps:$4 sm:$0xff]  }
 0x444   :  { %6633 = vmatpush2.bf16.msra.mxu1 %v8717_v32  ;;  %v8690_v32 = vcombine.high %v5879_v50, %v5881_v29 }
 0x445   :  { %6634 = vmatprep.subr.bf16.mxu1 %v8714_v42  ;;  %6676 = vmatpush2.bf16.msra.mxu0 %v8655_v39  ;;  %v8631_v42 = vcombine.low %v5820_v38, %v5822_v24  ;;  %v5876_v39 = vld [vmem:[%s13084_s1 + $0xbb8] sm:$0xff]  ;;  %v9437_v24 = vld [vmem:[%s13086_s3 + $0xc80] ss:$16 sps:$4 sm:$0xff]  }
 0x446   :  { %6677 = vmatprep.subr.bf16.mxu0 %v8652_v56  ;;  %v8689_v56 = vcombine.low %v5879_v50, %v5881_v29  ;;  %v8688_v37 = vcombine.high %v5876_v39, %v5878_v35  ;;  %v5850_v38 = vld [vmem:[%s13084_s1 + $0x878] sm:$0xff] }
 0x447   :  { %v5908_v50 = vld [vmem:[%s13084_s1 + $0xfb8] sm:$0xff] }
 0x448   :  { %6635 = vmatpush2.bf16.msra.mxu1 %v8713_v25  ;;  %v5872_v25 = vld [vmem:[%s13084_s1 + $0xb38] sm:$0xff] }
 0x449   :  { %6636 = vmatprep.subr.bf16.mxu1 %v8710_v19  ;;  %6678 = vmatpush2.bf16.msra.mxu0 %v8651_v45  ;;  %v5874_v19 = vld [vmem:[%s13084_s1 + $0xb78] sm:$0xff]  ;;  %v8687_v45 = vcombine.low %v5876_v39, %v5878_v35  ;;  %v9443_v39 = vld [vmem:[%s13086_s3 + $0xc40] ss:$16 sps:$4 sm:$0xff]  }
 0x44a   :  { %6679 = vmatprep.subr.bf16.mxu0 %v8648_v46  ;;  %v8684_v13 = vcombine.high %v5872_v25, %v5874_v19  ;;  %v5870_v46 = vld [vmem:[%s13084_s1 + $0xaf8] sm:$0xff]  ;;  %v8683_v48 = vcombine.low %v5872_v25, %v5874_v19  ;;  %v9446_v25 = vld [vmem:[%s13086_s3 + $0xc20] ss:$16 sps:$4 sm:$0xff]  }
 0x44b   :  { %v8680_v5 = vcombine.high %v5868_v44, %v5870_v46  ;;  %v5910_v29 = vld [vmem:[%s13084_s1 + $0xff8] sm:$0xff] }
 0x44c   :  { %6637 = vmatpush2.bf16.msra.mxu1 %v8709_v49  ;;  %v5864_v49 = vld [vmem:[%s13084_s1 + $0xa38] sm:$0xff]  ;;  %v8719_v35 = vcombine.low %v5908_v50, %v5910_v29 }
 0x44d   :  { %6638 = vmatprep.subr.bf16.mxu1 %v8706_v52  ;;  %6680 = vmatpush2.bf16.msra.mxu0 %v8647_v53  ;;  %v5866_v52 = vld [vmem:[%s13084_s1 + $0xa78] sm:$0xff]  ;;  %v8679_v53 = vcombine.low %v5868_v44, %v5870_v46 }
 0x44e   :  { %6681 = vmatprep.subr.bf16.mxu0 %v8644_v40  ;;  %v8676_v54 = vcombine.high %v5864_v49, %v5866_v52  ;;  %v8675_v55 = vcombine.low %v5864_v49, %v5866_v52  ;;  %v9428_v40 = vld [vmem:[%s13086_s3 + $0xce0] ss:$16 sps:$4 sm:$0xff]   ;;  %v5896_v44 = vld [vmem:[%s13084_s1 + $0xe38] sm:$0xff]  ;;  %v9454_v49 = vld [vmem:[%s13086_s3 + $0xde4] ss:$16 sps:$4 sm:$0xff]  }
 0x44f   :  { %v5898_v46 = vld [vmem:[%s13084_s1 + $0xe78] sm:$0xff] }
 0x450   :  { %6639 = vmatpush2.bf16.msra.mxu1 %v8705_v59  ;;  %v9433_v59 = vld [vmem:[%s13086_s3 + $0xcc4] ss:$16 sps:$4 sm:$0xff]   ;;  %v8708_v52 = vcombine.high %v5896_v44, %v5898_v46 }
 0x451   :  { %6640 = vmatprep.subr.bf16.mxu1 %v8702_v60  ;;  %6682 = vmatpush2.bf16.msra.mxu0 %v8643_v47  ;;  %v5856_v60 = vld [vmem:[%s13084_s1 + $0x938] sm:$0xff] }
 0x452   :  { %6683 = vmatprep.subr.bf16.mxu0 %v8640_v3  ;;  %v5858_v47 = vld [vmem:[%s13084_s1 + $0x978] sm:$0xff]  ;;  %v9436_v3 = vld [vmem:[%s13086_s3 + $0xca4] ss:$16 sps:$4 sm:$0xff]  }
 0x453   :  { %v8668_v4 = vcombine.high %v5856_v60, %v5858_v47 }
 0x454   :  { %6641 = vmatpush2.bf16.msra.mxu1 %v8701_v9  ;;  %v5854_v9 = vld [vmem:[%s13084_s1 + $0x8f8] sm:$0xff] }
 0x455   :  { %6642 = vmatprep.subr.bf16.mxu1 %v8698_v14  ;;  %6684 = vmatpush2.bf16.msra.mxu0 %v8639_v15  ;;  %v9434_v14 = vld [vmem:[%s13086_s3 + $0xca0] ss:$16 sps:$4 sm:$0xff]   ;;  %v8667_v15 = vcombine.low %v5856_v60, %v5858_v47  ;;  %v8664_v17 = vcombine.high %v5852_v8, %v5854_v9  ;;  %v9460_v47 = vld [vmem:[%s13086_s3 + $0xda4] ss:$16 sps:$4 sm:$0xff]  }
 0x456   :  { %6685 = vmatprep.subr.bf16.mxu0 %v8636_v21  ;;  %v5848_v21 = vld [vmem:[%s13084_s1 + $0x838] sm:$0xff] }
 0x457   :  { %v8659_v30 = vcombine.low %v5848_v21, %v5850_v38 }
 0x458   :  { %6643 = vmatpush2.bf16.msra.mxu1 %v8697_v22  ;;  %v8663_v22 = vcombine.low %v5852_v8, %v5854_v9  ;;  %v9463_v9 = vld [vmem:[%s13086_s3 + $0xd84] ss:$16 sps:$4 sm:$0xff]  }
 0x459   :  { %6644 = vmatprep.subr.bf16.mxu1 %v8694_v26  ;;  %6686 = vmatpush2.bf16.msra.mxu0 %v8635_v28  ;;  %v9442_v26 = vld [vmem:[%s13086_s3 + $0xc64] ss:$16 sps:$4 sm:$0xff]   ;;  %v8660_v28 = vcombine.high %v5848_v21, %v5850_v38 }
 0x45a   :  { %6687 = vmatprep.subr.bf16.mxu0 %v8632_v0  ;;  %v9440_v0 = vld [vmem:[%s13086_s3 + $0xc60] ss:$16 sps:$4 sm:$0xff]   ;;  %v9466_v38 = vld [vmem:[%s13086_s3 + $0xd64] ss:$16 sps:$4 sm:$0xff]  }
 0x45c   :  { %6645 = vmatpush2.bf16.msra.mxu1 %v8693_v31  ;;  %v8720_v31 = vcombine.high %v5908_v50, %v5910_v29  ;;  %v9469_v29 = vld [vmem:[%s13086_s3 + $0xd44] ss:$16 sps:$4 sm:$0xff]  }
 0x45d   :  { %6646 = vmatprep.subr.bf16.mxu1 %v8690_v32  ;;  %6688 = vmatpush2.bf16.msra.mxu0 %v8631_v42  ;;  %v5904_v32 = vld [vmem:[%s13084_s1 + $0xf38] sm:$0xff] }
 0x45e   :  { %6689 = vmatprep.subr.bf16.mxu0 %v8628_v36  ;;  %v5906_v42 = vld [vmem:[%s13084_s1 + $0xf78] sm:$0xff]  ;;  %v9448_v36 = vld [vmem:[%s13086_s3 + $0xc24] ss:$16 sps:$4 sm:$0xff]  }
 0x45f   :  { %v8715_v19 = vcombine.low %v5904_v32, %v5906_v42 }
 0x460   :  { %6647 = vmatpush2.bf16.msra.mxu1 %v8689_v56  ;;  %v8716_v56 = vcombine.high %v5904_v32, %v5906_v42 }
 0x461   :  { %6702 = vmatprep.subr.bf16.mxu1 %v8688_v37  ;;  %6690 = vmatpush2.bf16.msra.mxu0 %v8627_v58  ;;  %v5900_v37 = vld [vmem:[%s13084_s1 + $0xeb8] sm:$0xff] }
 0x462   :  { %7525 = vmatprep.subr.bf16.mxu0 %v9430_v57  ;;  %v5902_v58 = vld [vmem:[%s13084_s1 + $0xef8] sm:$0xff] }
 0x463   :  { %6649 = vmatmul.mubr.bf16.vlgmr.msra.gmra.mxu1 %v9935_v23  ;;  %v5888_v57 = vld [vmem:[%s13084_s1 + $0xd38] sm:$0xff] }
 0x464   :  { %6703 = vmatpush1.bf16.msra.mxu1 %v8687_v45  ;;  %6692 = vmatmul.mubr.bf16.vlgmr.msra.gmra.mxu0 %v9927_v20  ;;  %v5860_v20 = vld [vmem:[%s13084_s1 + $0x9b8] sm:$0xff]  ;;  %v9451_v45 = vld [vmem:[%s13086_s3 + $0xc04] ss:$16 sps:$4 sm:$0xff]  }
 0x465   :  { %6704 = vmatprep.subr.bf16.mxu1 %v8684_v13  ;;  %6734 = vmatprep.mubr.bf16.mxu1 %v9797_v63  ;;  %v5862_v63 = vld [vmem:[%s13084_s1 + $0x9f8] sm:$0xff]  ;;  %v8712_v13 = vcombine.high %v5900_v37, %v5902_v58 }
 0x466   :  { %v8672_v11 = vcombine.high %v5860_v20, %v5862_v63  ;;  %7526 = vmatpush1.bf16.msra.mxu0 %v9428_v40  ;;  %v8671_v62 = vcombine.low %v5860_v20, %v5862_v63  ;;  %v9452_v20 = vld [vmem:[%s13086_s3 + $0xde0] ss:$16 sps:$4 sm:$0xff]   ;;  %v8707_v63 = vcombine.low %v5896_v44, %v5898_v46  ;;  %v9478_v44 = vld [vmem:[%s13086_s3 + $0xee4] ss:$16 sps:$4 sm:$0xff]  }
 0x467   :  { %7527 = vmatprep.subr.bf16.mxu0 %v9433_v59  ;;  %v9455_v59 = vld [vmem:[%s13086_s3 + $0xdc0] ss:$16 sps:$4 sm:$0xff]  }
 0x468   :  { %6705 = vmatpush1.bf16.msra.mxu1 %v8683_v48  ;;  %v9449_v48 = vld [vmem:[%s13086_s3 + $0xc00] ss:$16 sps:$4 sm:$0xff]  }
 0x469   :  { %6706 = vmatprep.subr.bf16.mxu1 %v8680_v5  ;;  %v8711_v5 = vcombine.low %v5900_v37, %v5902_v58  ;;  %v9476_v46 = vld [vmem:[%s13086_s3 + $0xee0] ss:$16 sps:$4 sm:$0xff]  }
 0x46a   :  { %7528 = vmatpush1.bf16.msra.mxu0 %v9431_v61 }
 0x46b   :  { %7529 = vmatprep.subr.bf16.mxu0 %v9436_v3  ;;  %v5886_v3 = vld [vmem:[%s13084_s1 + $0xcf8] sm:$0xff] }
 0x46c   :  { %6707 = vmatpush1.bf16.msra.mxu1 %v8679_v53  ;;  %v5892_v53 = vld [vmem:[%s13084_s1 + $0xdb8] sm:$0xff] }
 0x46d   :  { %6708 = vmatprep.subr.bf16.mxu1 %v8676_v54  ;;  %v5894_v54 = vld [vmem:[%s13084_s1 + $0xdf8] sm:$0xff] }
 0x46e   :  { %7530 = vmatpush1.bf16.msra.mxu0 %v9434_v14  ;;  %v8704_v40 = vcombine.high %v5892_v53, %v5894_v54  ;;  %v8703_v60 = vcombine.low %v5892_v53, %v5894_v54  ;;  %v9496_v53 = vld [vmem:[%s13086_s3 + $0xe84] ss:$16 sps:$4 sm:$0xff]   ;;  %v9500_v54 = vld [vmem:[%s13086_s3 + $0xe60] ss:$16 sps:$4 sm:$0xff]  }
 0x46f   :  { %7531 = vmatprep.subr.bf16.mxu0 %v9439_v51  ;;  %v5882_v51 = vld [vmem:[%s13084_s1 + $0xc78] sm:$0xff] }
 0x470   :  { %6709 = vmatpush1.bf16.msra.mxu1 %v8675_v55  ;;  %v9457_v55 = vld [vmem:[%s13086_s3 + $0xdc4] ss:$16 sps:$4 sm:$0xff]  }
 0x471   :  { %6710 = vmatprep.subr.bf16.mxu1 %v8672_v11  ;;  %v5890_v11 = vld [vmem:[%s13084_s1 + $0xd78] sm:$0xff] }
 0x472   :  { %7532 = vmatpush1.bf16.msra.mxu0 %v9437_v24  ;;  %v8700_v61 = vcombine.high %v5888_v57, %v5890_v11  ;;  %v8699_v8 = vcombine.low %v5888_v57, %v5890_v11  ;;  %v9514_v57 = vld [vmem:[%s13086_s3 + $0xe24] ss:$16 sps:$4 sm:$0xff]   ;;  %v9518_v11 = vld [vmem:[%s13086_s3 + $0xe00] ss:$16 sps:$4 sm:$0xff]  }
 0x473   :  { %7533 = vmatprep.subr.bf16.mxu0 %v9442_v26 }
 0x474   :  { %6711 = vmatpush1.bf16.msra.mxu1 %v8671_v62  ;;  %v5884_v62 = vld [vmem:[%s13084_s1 + $0xcb8] sm:$0xff] }
 0x475   :  { %6712 = vmatprep.subr.bf16.mxu1 %v8668_v4  ;;  %v9458_v4 = vld [vmem:[%s13086_s3 + $0xda0] ss:$16 sps:$4 sm:$0xff]   ;;  %v8696_v14 = vcombine.high %v5884_v62, %v5886_v3  ;;  %v8695_v21 = vcombine.low %v5884_v62, %v5886_v3  ;;  %v9532_v62 = vld [vmem:[%s13086_s3 + $0xfc4] ss:$16 sps:$4 sm:$0xff]  }
 0x476   :  { %7534 = vmatpush1.bf16.msra.mxu0 %v9440_v0  ;;  %v9536_v3 = vld [vmem:[%s13086_s3 + $0xfa0] ss:$16 sps:$4 sm:$0xff]  }
 0x477   :  { %7535 = vmatprep.subr.bf16.mxu0 %v9445_v33 }
 0x478   :  { %6713 = vmatpush1.bf16.msra.mxu1 %v8667_v15  ;;  %v5880_v15 = vld [vmem:[%s13084_s1 + $0xc38] sm:$0xff] }
 0x479   :  { %6714 = vmatprep.subr.bf16.mxu1 %v8664_v17  ;;  %v9461_v17 = vld [vmem:[%s13086_s3 + $0xd80] ss:$16 sps:$4 sm:$0xff]   ;;  %v8692_v24 = vcombine.high %v5880_v15, %v5882_v51  ;;  %v8691_v26 = vcombine.low %v5880_v15, %v5882_v51  ;;  %v9550_v51 = vld [vmem:[%s13086_s3 + $0xf64] ss:$16 sps:$4 sm:$0xff]  }
 0x47a   :  { %7536 = vmatpush1.bf16.msra.mxu0 %v9443_v39  ;;  %v9548_v15 = vld [vmem:[%s13086_s3 + $0xf60] ss:$16 sps:$4 sm:$0xff]  }
 0x47b   :  { %7537 = vmatprep.subr.bf16.mxu0 %v9448_v36 }
 0x47c   :  { %6715 = vmatpush1.bf16.msra.mxu1 %v8663_v22  ;;  %v9464_v22 = vld [vmem:[%s13086_s3 + $0xd60] ss:$16 sps:$4 sm:$0xff]  }
 0x47d   :  { %6716 = vmatprep.subr.bf16.mxu1 %v8660_v28  ;;  %v5637_v28 = vpop.f32.mrf.mxu0 }
 0x47e   :  { %7538 = vmatpush1.bf16.msra.mxu0 %v9446_v25 }
 0x47f   :  { %7539 = vmatprep.subr.bf16.mxu0 %v9451_v45  ;;  %v5639_v50 = vpop.f32.mrf.mxu0  ;;  %v9475_v45 = vld [vmem:[%s13086_s3 + $0xd04] ss:$16 sps:$4 sm:$0xff]  }
 0x480   :  { %6717 = vmatpush1.bf16.msra.mxu1 %v8659_v30  ;;  %v9467_v30 = vld [vmem:[%s13086_s3 + $0xd40] ss:$16 sps:$4 sm:$0xff]  }
 0x481   :  { %6718 = vmatprep.subr.bf16.mxu1 %v8720_v31  ;;  %v5641_v31 = vpop.f32.mrf.mxu0 }
 0x482   :  { %7540 = vmatpush1.bf16.msra.mxu0 %v9449_v48  ;;  %v9484_v48 = vld [vmem:[%s13086_s3 + $0xec4] ss:$16 sps:$4 sm:$0xff]  }
 0x483   :  { %7541 = vmatprep.subr.bf16.mxu0 %v9454_v49  ;;  %v5643_v58 = vpop.f32.mrf.mxu0  ;;  %v9490_v49 = vld [vmem:[%s13086_s3 + $0xea4] ss:$16 sps:$4 sm:$0xff]  }
 0x484   :  { %6719 = vmatpush2.bf16.msra.mxu1 %v8719_v35  ;;  %v9472_v35 = vld [vmem:[%s13086_s3 + $0xd24] ss:$16 sps:$4 sm:$0xff]  }
 0x485   :  { %6720 = vmatprep.subr.bf16.mxu1 %v8716_v56 }
 0x486   :  { %7542 = vmatpush2.bf16.msra.mxu0 %v9452_v20  ;;  %v9502_v20 = vld [vmem:[%s13086_s3 + $0xe64] ss:$16 sps:$4 sm:$0xff]  }
 0x487   :  { %7543 = vmatprep.subr.bf16.mxu0 %v9457_v55  ;;  %v9508_v55 = vld [vmem:[%s13086_s3 + $0xe44] ss:$16 sps:$4 sm:$0xff]  }
 0x488   :  { %6721 = vmatpush2.bf16.msra.mxu1 %v8715_v19 }
 0x489   :  { %6722 = vmatprep.subr.bf16.mxu1 %v8712_v13  ;;  %v9473_v13 = vld [vmem:[%s13086_s3 + $0xd00] ss:$16 sps:$4 sm:$0xff]  }
 0x48a   :  { %7544 = vmatpush2.bf16.msra.mxu0 %v9455_v59  ;;  %v9520_v59 = vld [vmem:[%s13086_s3 + $0xe04] ss:$16 sps:$4 sm:$0xff]  }
 0x48b   :  { %7545 = vmatprep.subr.bf16.mxu0 %v9460_v47  ;;  %v9526_v47 = vld [vmem:[%s13086_s3 + $0xfe4] ss:$16 sps:$4 sm:$0xff]  }
 0x48c   :  { %6723 = vmatpush2.bf16.msra.mxu1 %v8711_v5  ;;  %v9488_v5 = vld [vmem:[%s13086_s3 + $0xea0] ss:$16 sps:$4 sm:$0xff]  }
 0x48d   :  { %6724 = vmatprep.subr.bf16.mxu1 %v8708_v52  ;;  %v9494_v52 = vld [vmem:[%s13086_s3 + $0xe80] ss:$16 sps:$4 sm:$0xff]  }
 0x48e   :  { %7546 = vmatpush2.bf16.msra.mxu0 %v9458_v4  ;;  %v9538_v4 = vld [vmem:[%s13086_s3 + $0xfa4] ss:$16 sps:$4 sm:$0xff]  }
 0x48f   :  { %7547 = vmatprep.subr.bf16.mxu0 %v9463_v9  ;;  %v9544_v9 = vld [vmem:[%s13086_s3 + $0xf84] ss:$16 sps:$4 sm:$0xff]  }
 0x490   :  { %6725 = vmatpush2.bf16.msra.mxu1 %v8707_v63  ;;  %v9506_v63 = vld [vmem:[%s13086_s3 + $0xe40] ss:$16 sps:$4 sm:$0xff]  }
 0x491   :  { %6726 = vmatprep.subr.bf16.mxu1 %v8704_v40  ;;  %v9512_v40 = vld [vmem:[%s13086_s3 + $0xe20] ss:$16 sps:$4 sm:$0xff]  }
 0x492   :  { %7548 = vmatpush2.bf16.msra.mxu0 %v9461_v17 }
 0x493   :  { %7549 = vmatprep.subr.bf16.mxu0 %v9466_v38  ;;  %v9556_v38 = vld [vmem:[%s13086_s3 + $0xf44] ss:$16 sps:$4 sm:$0xff]  }
 0x494   :  { %6727 = vmatpush2.bf16.msra.mxu1 %v8703_v60  ;;  %v9524_v60 = vld [vmem:[%s13086_s3 + $0xfe0] ss:$16 sps:$4 sm:$0xff]  }
 0x495   :  { %6728 = vmatprep.subr.bf16.mxu1 %v8700_v61  ;;  %v9530_v61 = vld [vmem:[%s13086_s3 + $0xfc0] ss:$16 sps:$4 sm:$0xff]  }
 0x496   :  { %7550 = vmatpush2.bf16.msra.mxu0 %v9464_v22  ;;  %v9554_v22 = vld [vmem:[%s13086_s3 + $0xf40] ss:$16 sps:$4 sm:$0xff]  }
 0x497   :  { %7551 = vmatprep.subr.bf16.mxu0 %v9469_v29 }
 0x498   :  { %6729 = vmatpush2.bf16.msra.mxu1 %v8699_v8  ;;  %v9542_v8 = vld [vmem:[%s13086_s3 + $0xf80] ss:$16 sps:$4 sm:$0xff]  }
 0x499   :  { %6730 = vmatprep.subr.bf16.mxu1 %v8696_v14 }
 0x49a   :  { %7552 = vmatpush2.bf16.msra.mxu0 %v9467_v30  ;;  %v9562_v30 = vld [vmem:[%s13086_s3 + $0xf24] ss:$16 sps:$4 sm:$0xff]  }
 0x49b   :  { %7553 = vmatprep.subr.bf16.mxu0 %v9472_v35 }
 0x49c   :  { %6731 = vmatpush2.bf16.msra.mxu1 %v8695_v21 }
 0x49d   :  { %6732 = vmatprep.subr.bf16.mxu1 %v8692_v24 }
 0x4a0   :  { %6733 = vmatpush2.bf16.msra.mxu1 %v8691_v26 }
 0x4a1   :  { %7568 = vmatprep.subr.bf16.mxu1 %v9478_v44 }
 0x4a3   :  { %6735 = vmatmul.mubr.bf16.vlgmr.msra.gmra.mxu1 %v9935_v23  ;;  %v5680_v0 = vpop.f32.mrf.mxu1  ;;  %v9470_v23 = vld [vmem:[%s13086_s3 + $0xd20] ss:$16 sps:$4 sm:$0xff]   ;;  %v5723_v14 = vpop.f32.mrf.mxu0 }
 0x4a4   :  { %v5681_v33 = vadd.f32 %v5680_v0, %v5637_v28  ;;  %7554 = vmatpush2.bf16.msra.mxu0 %v9470_v23  ;;  %7569 = vmatpush1.bf16.msra.mxu1 %v9476_v46  ;;  %v9568_v23 = vld [vmem:[%s13086_s3 + $0xf04] ss:$16 sps:$4 sm:$0xff]  }
 0x4a5   :  { %v5682_v32 = vpop.f32.mrf.mxu1  ;;  %7555 = vmatprep.subr.bf16.mxu0 %v9475_v45  ;;  %7570 = vmatprep.subr.bf16.mxu1 %v9484_v48  ;;  %v5725_v17 = vpop.f32.mrf.mxu0 }
 0x4a6   :  { %v12673_v42 = vadd.f32 %v5681_v33, %v11837_v12  ;;  %v5683_v39 = vadd.f32 %v5682_v32, %v5639_v50  ;;  %v9560_v32 = vld [vmem:[%s13086_s3 + $0xf20] ss:$16 sps:$4 sm:$0xff]  }
 0x4a7   :  { %v5684_v36 = vpop.f32.mrf.mxu1  ;;  %v5727_v26 = vpop.f32.mrf.mxu0 }
 0x4a8   :  { %v12682_v56 = vadd.f32 %v5683_v39, %v11846_v18  ;;  %v5685_v37 = vadd.f32 %v5684_v36, %v5641_v31  ;;  %7556 = vmatpush2.bf16.msra.mxu0 %v9473_v13 }
 0x4a9   :  { %v5686_v25 = vpop.f32.mrf.mxu1  ;;  %v5729_v39 = vpop.f32.mrf.mxu0 }
 0x4aa   :  { %v12685_v12 = vadd.f32 %v5685_v37, %v11855_v34  ;;  %v5687_v19 = vadd.f32 %v5686_v25, %v5643_v58  ;;  %v9481_v34 = vld [vmem:[%s13086_s3 + $0xcec] ss:$16 sps:$4 sm:$0xff]   ;;  %v9566_v37 = vld [vmem:[%s13086_s3 + $0xf00] ss:$16 sps:$4 sm:$0xff]  }
 0x4ab   :  { %7611 = vmatprep.subr.bf16.mxu0 %v9481_v34  ;;  %v12813_v25 = vld [vmem:[%s13085_s2 + $0xc] sm:$0xf] }
 0x4ac   :  { %v12694_v18 = vadd.f32 %v5687_v19, %v11864_v27  ;;  %v9482_v27 = vld [vmem:[%s13086_s3 + $0xec0] ss:$16 sps:$4 sm:$0xff]   ;;  %v5916_v45 = vrot.slane %v12813_v25, %v10512_v41 }
 0x4ad   :  { %7571 = vmatpush1.bf16.msra.mxu1 %v9482_v27 }
 0x4ae   :  { %7572 = vmatprep.subr.bf16.mxu1 %v9490_v49 }
 0x4b1   :  { %7573 = vmatpush1.bf16.msra.mxu1 %v9488_v5 }
 0x4b2   :  { %7574 = vmatprep.subr.bf16.mxu1 %v9496_v53 }
 0x4b5   :  { %7575 = vmatpush1.bf16.msra.mxu1 %v9494_v52 }
 0x4b6   :  { %7576 = vmatprep.subr.bf16.mxu1 %v9502_v20 }
 0x4b9   :  { %7577 = vmatpush1.bf16.msra.mxu1 %v9500_v54 }
 0x4ba   :  { %7578 = vmatprep.subr.bf16.mxu1 %v9508_v55 }
 0x4bd   :  { %7579 = vmatpush1.bf16.msra.mxu1 %v9506_v63 }
 0x4be   :  { %7580 = vmatprep.subr.bf16.mxu1 %v9514_v57 }
 0x4c1   :  { %7581 = vmatpush1.bf16.msra.mxu1 %v9512_v40 }
 0x4c2   :  { %7582 = vmatprep.subr.bf16.mxu1 %v9520_v59 }
 0x4c5   :  { %7583 = vmatpush1.bf16.msra.mxu1 %v9518_v11 }
 0x4c6   :  { %7584 = vmatprep.subr.bf16.mxu1 %v9526_v47  ;;  %v9479_v47 = vld [vmem:[%s13086_s3 + $0xce8] ss:$16 sps:$4 sm:$0xff]  }
 0x4c9   :  { %7585 = vmatpush2.bf16.msra.mxu1 %v9524_v60 }
 0x4ca   :  { %7586 = vmatprep.subr.bf16.mxu1 %v9532_v62  ;;  %v9487_v62 = vld [vmem:[%s13086_s3 + $0xccc] ss:$16 sps:$4 sm:$0xff]  }
 0x4cd   :  { %7587 = vmatpush2.bf16.msra.mxu1 %v9530_v61 }
 0x4ce   :  { %7588 = vmatprep.subr.bf16.mxu1 %v9538_v4  ;;  %v9493_v4 = vld [vmem:[%s13086_s3 + $0xcac] ss:$16 sps:$4 sm:$0xff]  }
 0x4d1   :  { %7589 = vmatpush2.bf16.msra.mxu1 %v9536_v3  ;;  %v9485_v3 = vld [vmem:[%s13086_s3 + $0xcc8] ss:$16 sps:$4 sm:$0xff]  }
 0x4d2   :  { %7590 = vmatprep.subr.bf16.mxu1 %v9544_v9  ;;  %v9499_v9 = vld [vmem:[%s13086_s3 + $0xc8c] ss:$16 sps:$4 sm:$0xff]  }
 0x4d5   :  { %7591 = vmatpush2.bf16.msra.mxu1 %v9542_v8  ;;  %v9491_v8 = vld [vmem:[%s13086_s3 + $0xca8] ss:$16 sps:$4 sm:$0xff]  }
 0x4d6   :  { %7592 = vmatprep.subr.bf16.mxu1 %v9550_v51  ;;  %v9503_v51 = vld [vmem:[%s13086_s3 + $0xc68] ss:$16 sps:$4 sm:$0xff]  }
 0x4d9   :  { %7593 = vmatpush2.bf16.msra.mxu1 %v9548_v15  ;;  %v9505_v15 = vld [vmem:[%s13086_s3 + $0xc6c] ss:$16 sps:$4 sm:$0xff]  }
 0x4da   :  { %7594 = vmatprep.subr.bf16.mxu1 %v9556_v38  ;;  %v9517_v38 = vld [vmem:[%s13086_s3 + $0xc2c] ss:$16 sps:$4 sm:$0xff]  }
 0x4dd   :  { %7595 = vmatpush2.bf16.msra.mxu1 %v9554_v22  ;;  %v9523_v22 = vld [vmem:[%s13086_s3 + $0xc0c] ss:$16 sps:$4 sm:$0xff]  }
 0x4de   :  { %7596 = vmatprep.subr.bf16.mxu1 %v9562_v30  ;;  %v9533_v30 = vld [vmem:[%s13086_s3 + $0xdc8] ss:$16 sps:$4 sm:$0xff]  }
 0x4e1   :  { %7597 = vmatpush2.bf16.msra.mxu1 %v9560_v32  ;;  %v9539_v32 = vld [vmem:[%s13086_s3 + $0xda8] ss:$16 sps:$4 sm:$0xff]  }
 0x4e2   :  { %7598 = vmatprep.subr.bf16.mxu1 %v9568_v23  ;;  %v9553_v23 = vld [vmem:[%s13086_s3 + $0xd6c] ss:$16 sps:$4 sm:$0xff]  }
 0x4e3   :  { %v5766_v21 = vpop.f32.mrf.mxu1 }
 0x4e4   :  { %v5767_v24 = vadd.f32 %v5766_v21, %v5723_v14  ;;  %v6607_v58 = vpop.f32.mrf.mxu0  ;;  %v9497_v14 = vld [vmem:[%s13086_s3 + $0xc88] ss:$16 sps:$4 sm:$0xff]  }
 0x4e5   :  { %v5768_v28 = vpop.f32.mrf.mxu1  ;;  %7599 = vmatpush2.bf16.msra.mxu1 %v9566_v37  ;;  %v6608_v46 = vadd.f32 %v6607_v58, %v5916_v45  ;;  %v9509_v21 = vld [vmem:[%s13086_s3 + $0xc48] ss:$16 sps:$4 sm:$0xff]   ;;  %v9559_v58 = vld [vmem:[%s13086_s3 + $0xd4c] ss:$16 sps:$4 sm:$0xff]  }
 0x4e6   :  { %v12784_v50 = vadd.f32 %v5767_v24, %v11960_v1  ;;  %v5769_v29 = vadd.f32 %v5768_v28, %v5725_v17  ;;  %v6609_v19 = vpop.f32.mrf.mxu0  ;;  %v9511_v17 = vld [vmem:[%s13086_s3 + $0xc4c] ss:$16 sps:$4 sm:$0xff]   ;;  %v9515_v24 = vld [vmem:[%s13086_s3 + $0xc28] ss:$16 sps:$4 sm:$0xff]  }
 0x4e7   :  { %v5770_v0 = vpop.f32.mrf.mxu1  ;;  %v9529_v28 = vld [vmem:[%s13086_s3 + $0xdec] ss:$16 sps:$4 sm:$0xff]  }
 0x4e8   :  { %v12790_v33 = vadd.f32 %v5769_v29, %v11966_v6  ;;  %v5771_v31 = vadd.f32 %v5770_v0, %v5727_v26  ;;  %v6611_v13 = vpop.f32.mrf.mxu0  ;;  %v9521_v26 = vld [vmem:[%s13086_s3 + $0xc08] ss:$16 sps:$4 sm:$0xff]   ;;  %v9535_v0 = vld [vmem:[%s13086_s3 + $0xdcc] ss:$16 sps:$4 sm:$0xff]  }
 0x4e9   :  { %v5772_v35 = vpop.f32.mrf.mxu1  ;;  %v6612_v5 = vadd.f32 %v6611_v13, %v5916_v45  ;;  %v9527_v29 = vld [vmem:[%s13086_s3 + $0xde8] ss:$16 sps:$4 sm:$0xff]   ;;  %v5928_v45 = vrot.slane %v12813_v25, %v10699_v7 }
 0x4ea   :  { %v12796_v1 = vadd.f32 %v5771_v31, %v11972_v10  ;;  %v5773_v36 = vadd.f32 %v5772_v35, %v5729_v39  ;;  %v9574_v10 = vld [vmem:[%s13086_s3 + $0xeec] ss:$16 sps:$4 sm:$0xff]   ;;  %v6613_v27 = vpop.f32.mrf.mxu0  ;;  %v9557_v13 = vld [vmem:[%s13086_s3 + $0xd48] ss:$16 sps:$4 sm:$0xff]  }
 0x4eb   :  { %7654 = vmatprep.subr.bf16.mxu1 %v9574_v10  ;;  %v9541_v31 = vld [vmem:[%s13086_s3 + $0xdac] ss:$16 sps:$4 sm:$0xff]   ;;  %v9551_v10 = vld [vmem:[%s13086_s3 + $0xd68] ss:$16 sps:$4 sm:$0xff]  }
 0x4ec   :  { %v12802_v6 = vadd.f32 %v5773_v36, %v11978_v16  ;;  %v5920_v16 = vrot.slane %v12813_v25, %v10515_v43  ;;  %v9547_v39 = vld [vmem:[%s13086_s3 + $0xd8c] ss:$16 sps:$4 sm:$0xff]   ;;  %v9545_v36 = vld [vmem:[%s13086_s3 + $0xd88] ss:$16 sps:$4 sm:$0xff]  }
 0x4ee   :  { %v6610_v34 = vadd.f32 %v6609_v19, %v5920_v16  ;;  %v6614_v52 = vadd.f32 %v6613_v27, %v5920_v16  ;;  %v5924_v19 = vrot.slane %v12813_v25, %v10684_v2  ;;  %v9563_v25 = vld [vmem:[%s13086_s3 + $0xd28] ss:$16 sps:$4 sm:$0xff]  }
 0x523   :  { %v6650_v44 = vpop.f32.mrf.mxu1 }
 0x524   :  { %v6651_v20 = vadd.f32 %v6650_v44, %v6608_v46  ;;  %v6693_v35 = vpop.f32.mrf.mxu0 }
 0x525   :  { %v6652_v48 = vpop.f32.mrf.mxu1  ;;  %v6694_v46 = vadd.f32 %v6693_v35, %v5924_v19  ;;  %v9604_v35 = vld [vmem:[%s13086_s3 + $0xfac] ss:$16 sps:$4 sm:$0xff]  }
 0x526   :  { %v6653_v53 = vadd.f32 %v6652_v48, %v6610_v34  ;;  %v6745_v59 = vmax.f32 %v6651_v20, 0.0  ;;  %v6695_v37 = vpop.f32.mrf.mxu0  ;;  %v9565_v34 = vld [vmem:[%s13086_s3 + $0xd2c] ss:$16 sps:$4 sm:$0xff]  }
 0x527   :  { %v6654_v49 = vpop.f32.mrf.mxu1 }
 0x528   :  { %v6655_v54 = vadd.f32 %v6654_v49, %v6612_v5  ;;  %v6746_v57 = vmax.f32 %v6653_v53, 0.0  ;;  %v6697_v16 = vpop.f32.mrf.mxu0  ;;  %v6696_v5 = vadd.f32 %v6695_v37, %v5928_v45  ;;  %v9571_v53 = vld [vmem:[%s13086_s3 + $0xd0c] ss:$16 sps:$4 sm:$0xff]   ;;  %v9605_v37 = vld [vmem:[%s13086_s3 + $0xf88] ss:$16 sps:$4 sm:$0xff]  }
 0x529   :  { %v6656_v63 = vpop.f32.mrf.mxu1  ;;  %v6698_v49 = vadd.f32 %v6697_v16, %v5924_v19  ;;  %v9613_v19 = vld [vmem:[%s13086_s3 + $0xf4c] ss:$16 sps:$4 sm:$0xff]   ;;  %v9611_v16 = vld [vmem:[%s13086_s3 + $0xf48] ss:$16 sps:$4 sm:$0xff]  }
 0x52a   :  { %v6657_v55 = vadd.f32 %v6656_v63, %v6614_v52  ;;  %v6749_v40 = vmax.f32 %v6655_v54, 0.0  ;;  %v6699_v27 = vpop.f32.mrf.mxu0 }
 0x52b   :  { %v6700_v54 = vadd.f32 %v6699_v27, %v5928_v45  ;;  %v9616_v45 = vld [vmem:[%s13086_s3 + $0xf2c] ss:$16 sps:$4 sm:$0xff]  }
 0x52c   :  { %v6750_v11 = vmax.f32 %v6657_v55, 0.0  ;;  %v12822_v61 = vpack.c.bf16 %v6749_v40, %v6745_v59 }
 0x52e   :  { %v6754_v60 = vpack.c.bf16 %v6750_v11, %v6746_v57  ;;  %v9569_v11 = vld [vmem:[%s13086_s3 + $0xd08] ss:$16 sps:$4 sm:$0xff]  }
 0x530   :  { %7557 = vmatprep.mubr.bf16.mxu0 %v6754_v60 }
 0x531   :  { %7558 = vmatmul.mubr.bf16.vlgmr.msra.gmra.mxu0 %v12822_v61 }
 0x532   :  { %7612 = vmatpush1.bf16.msra.mxu0 %v9479_v47  ;;  %7643 = vmatprep.mubr.bf16.mxu0 %v6754_v60 }
 0x533   :  { %7613 = vmatprep.subr.bf16.mxu0 %v9487_v62 }
 0x536   :  { %7614 = vmatpush1.bf16.msra.mxu0 %v9485_v3 }
 0x537   :  { %7615 = vmatprep.subr.bf16.mxu0 %v9493_v4  ;;  %v9572_v4 = vld [vmem:[%s13086_s3 + $0xee8] ss:$16 sps:$4 sm:$0xff]  }
 0x53a   :  { %7616 = vmatpush1.bf16.msra.mxu0 %v9491_v8 }
 0x53b   :  { %7617 = vmatprep.subr.bf16.mxu0 %v9499_v9  ;;  %v9577_v9 = vld [vmem:[%s13086_s3 + $0xecc] ss:$16 sps:$4 sm:$0xff]  }
 0x53e   :  { %7618 = vmatpush1.bf16.msra.mxu0 %v9497_v14  ;;  %v9575_v14 = vld [vmem:[%s13086_s3 + $0xec8] ss:$16 sps:$4 sm:$0xff]  }
 0x53f   :  { %7619 = vmatprep.subr.bf16.mxu0 %v9505_v15  ;;  %v9580_v15 = vld [vmem:[%s13086_s3 + $0xeac] ss:$16 sps:$4 sm:$0xff]  }
 0x542   :  { %7620 = vmatpush1.bf16.msra.mxu0 %v9503_v51  ;;  %v9578_v51 = vld [vmem:[%s13086_s3 + $0xea8] ss:$16 sps:$4 sm:$0xff]  }
 0x543   :  { %7621 = vmatprep.subr.bf16.mxu0 %v9511_v17  ;;  %v9581_v17 = vld [vmem:[%s13086_s3 + $0xe88] ss:$16 sps:$4 sm:$0xff]  }
 0x546   :  { %7622 = vmatpush1.bf16.msra.mxu0 %v9509_v21  ;;  %v9586_v21 = vld [vmem:[%s13086_s3 + $0xe6c] ss:$16 sps:$4 sm:$0xff]  }
 0x547   :  { %7623 = vmatprep.subr.bf16.mxu0 %v9517_v38  ;;  %v9584_v38 = vld [vmem:[%s13086_s3 + $0xe68] ss:$16 sps:$4 sm:$0xff]  }
 0x54a   :  { %7624 = vmatpush1.bf16.msra.mxu0 %v9515_v24  ;;  %v9589_v24 = vld [vmem:[%s13086_s3 + $0xe4c] ss:$16 sps:$4 sm:$0xff]  }
 0x54b   :  { %7625 = vmatprep.subr.bf16.mxu0 %v9523_v22  ;;  %v9587_v22 = vld [vmem:[%s13086_s3 + $0xe48] ss:$16 sps:$4 sm:$0xff]  }
 0x54e   :  { %7626 = vmatpush1.bf16.msra.mxu0 %v9521_v26  ;;  %v9592_v26 = vld [vmem:[%s13086_s3 + $0xe2c] ss:$16 sps:$4 sm:$0xff]  }
 0x54f   :  { %7627 = vmatprep.subr.bf16.mxu0 %v9529_v28  ;;  %v9590_v28 = vld [vmem:[%s13086_s3 + $0xe28] ss:$16 sps:$4 sm:$0xff]  }
 0x552   :  { %7628 = vmatpush2.bf16.msra.mxu0 %v9527_v29  ;;  %v9595_v29 = vld [vmem:[%s13086_s3 + $0xe0c] ss:$16 sps:$4 sm:$0xff]  }
 0x553   :  { %7629 = vmatprep.subr.bf16.mxu0 %v9535_v0  ;;  %v9593_v0 = vld [vmem:[%s13086_s3 + $0xe08] ss:$16 sps:$4 sm:$0xff]  }
 0x556   :  { %7630 = vmatpush2.bf16.msra.mxu0 %v9533_v30  ;;  %v9598_v30 = vld [vmem:[%s13086_s3 + $0xfec] ss:$16 sps:$4 sm:$0xff]  }
 0x557   :  { %7631 = vmatprep.subr.bf16.mxu0 %v9541_v31  ;;  %v9596_v31 = vld [vmem:[%s13086_s3 + $0xfe8] ss:$16 sps:$4 sm:$0xff]  }
 0x55a   :  { %7632 = vmatpush2.bf16.msra.mxu0 %v9539_v32  ;;  %v9601_v32 = vld [vmem:[%s13086_s3 + $0xfcc] ss:$16 sps:$4 sm:$0xff]  }
 0x55b   :  { %7633 = vmatprep.subr.bf16.mxu0 %v9547_v39  ;;  %v9599_v39 = vld [vmem:[%s13086_s3 + $0xfc8] ss:$16 sps:$4 sm:$0xff]  }
 0x55e   :  { %7634 = vmatpush2.bf16.msra.mxu0 %v9545_v36  ;;  %v9602_v36 = vld [vmem:[%s13086_s3 + $0xfa8] ss:$16 sps:$4 sm:$0xff]  }
 0x55f   :  { %7635 = vmatprep.subr.bf16.mxu0 %v9553_v23  ;;  %v9607_v23 = vld [vmem:[%s13086_s3 + $0xf8c] ss:$16 sps:$4 sm:$0xff]  }
 0x562   :  { %7636 = vmatpush2.bf16.msra.mxu0 %v9551_v10  ;;  %v9610_v10 = vld [vmem:[%s13086_s3 + $0xf6c] ss:$16 sps:$4 sm:$0xff]  }
 0x563   :  { %v6736_v44 = vpop.f32.mrf.mxu1  ;;  %7637 = vmatprep.subr.bf16.mxu0 %v9559_v58  ;;  %v9608_v58 = vld [vmem:[%s13086_s3 + $0xf68] ss:$16 sps:$4 sm:$0xff]  }
 0x564   :  { %v6737_v55 = vadd.f32 %v6736_v44, %v6694_v46  ;;  %v9619_v44 = vld [vmem:[%s13086_s3 + $0xf0c] ss:$16 sps:$4 sm:$0xff]  }
 0x565   :  { %v6738_v48 = vpop.f32.mrf.mxu1 }
 0x566   :  { %7638 = vmatpush2.bf16.msra.mxu0 %v9557_v13  ;;  %v6739_v20 = vadd.f32 %v6738_v48, %v6696_v5  ;;  %v6747_v62 = vmax.f32 %v6737_v55, 0.0  ;;  %v9614_v13 = vld [vmem:[%s13086_s3 + $0xf28] ss:$16 sps:$4 sm:$0xff]   ;;  %v7705_v55 = vld [vmem:[%s13087_s4] sm:$0xf] }
 0x567   :  { %v6740_v52 = vpop.f32.mrf.mxu1  ;;  %7639 = vmatprep.subr.bf16.mxu0 %v9565_v34  ;;  %v9617_v34 = vld [vmem:[%s13086_s3 + $0xf08] ss:$16 sps:$4 sm:$0xff]  }
 0x568   :  { %v6741_v63 = vadd.f32 %v6740_v52, %v6698_v49  ;;  %v6748_v60 = vmax.f32 %v6739_v20, 0.0 }
 0x569   :  { %v6742_v40 = vpop.f32.mrf.mxu1 }
 0x56a   :  { %v6743_v57 = vadd.f32 %v6742_v40, %v6700_v54  ;;  %7640 = vmatpush2.bf16.msra.mxu0 %v9563_v25  ;;  %v6751_v59 = vmax.f32 %v6741_v63, 0.0 }
 0x56b   :  { %7641 = vmatprep.subr.bf16.mxu0 %v9571_v53 }
 0x56c   :  { %v6752_v47 = vmax.f32 %v6743_v57, 0.0  ;;  %v12922_v8 = vpack.c.bf16 %v6751_v59, %v6747_v62 }
 0x56e   :  { %v6756_v3 = vpack.c.bf16 %v6752_v47, %v6748_v60  ;;  %7642 = vmatpush2.bf16.msra.mxu0 %v9569_v11  ;;  %v7714_v11 = vrot.slane %v7705_v55, %v10515_v43  ;;  %v7710_v47 = vrot.slane %v7705_v55, %v10512_v41  ;;  %v9624_v43 = vld [vmem:[%s13083_s0 + $0x8] sm:$0xff] }
 0x570   :  { %7600 = vmatprep.mubr.bf16.mxu1 %v6756_v3 }
 0x571   :  { %7644 = vmatmul.mubr.bf16.vlgmr.msra.gmra.mxu0 %v12822_v61  ;;  %7601 = vmatmul.mubr.bf16.vlgmr.msra.gmra.mxu1 %v12922_v8  ;;  %v9583_v61 = vld [vmem:[%s13086_s3 + $0xe8c] ss:$16 sps:$4 sm:$0xff]  }
 0x572   :  { %7655 = vmatpush1.bf16.msra.mxu1 %v9572_v4  ;;  %7686 = vmatprep.mubr.bf16.mxu1 %v6756_v3 }
 0x573   :  { %7656 = vmatprep.subr.bf16.mxu1 %v9577_v9 }
 0x576   :  { %7657 = vmatpush1.bf16.msra.mxu1 %v9575_v14 }
 0x577   :  { %7658 = vmatprep.subr.bf16.mxu1 %v9580_v15 }
 0x57a   :  { %7659 = vmatpush1.bf16.msra.mxu1 %v9578_v51 }
 0x57b   :  { %7660 = vmatprep.subr.bf16.mxu1 %v9583_v61  ;;  %v7718_v61 = vrot.slane %v7705_v55, %v10684_v2  ;;  %v9626_v2 = vld [vmem:[%s13083_s0 + $0x28] sm:$0xff] }
 0x57e   :  { %7661 = vmatpush1.bf16.msra.mxu1 %v9581_v17 }
 0x57f   :  { %7662 = vmatprep.subr.bf16.mxu1 %v9586_v21 }
 0x582   :  { %7663 = vmatpush1.bf16.msra.mxu1 %v9584_v38  ;;  %v9625_v38 = vld [vmem:[%s13083_s0] sm:$0xff] }
 0x583   :  { %7664 = vmatprep.subr.bf16.mxu1 %v9589_v24 }
 0x586   :  { %7665 = vmatpush1.bf16.msra.mxu1 %v9587_v22 }
 0x587   :  { %7666 = vmatprep.subr.bf16.mxu1 %v9592_v26 }
 0x58a   :  { %7667 = vmatpush1.bf16.msra.mxu1 %v9590_v28 }
 0x58b   :  { %7668 = vmatprep.subr.bf16.mxu1 %v9595_v29 }
 0x58e   :  { %7669 = vmatpush1.bf16.msra.mxu1 %v9593_v0 }
 0x58f   :  { %7670 = vmatprep.subr.bf16.mxu1 %v9598_v30 }
 0x592   :  { %7671 = vmatpush2.bf16.msra.mxu1 %v9596_v31 }
 0x593   :  { %7672 = vmatprep.subr.bf16.mxu1 %v9601_v32 }
 0x596   :  { %7673 = vmatpush2.bf16.msra.mxu1 %v9599_v39 }
 0x597   :  { %7674 = vmatprep.subr.bf16.mxu1 %v9604_v35 }
 0x59a   :  { %7675 = vmatpush2.bf16.msra.mxu1 %v9602_v36 }
 0x59b   :  { %7676 = vmatprep.subr.bf16.mxu1 %v9607_v23 }
 0x59e   :  { %7677 = vmatpush2.bf16.msra.mxu1 %v9605_v37 }
 0x59f   :  { %7678 = vmatprep.subr.bf16.mxu1 %v9610_v10 }
 0x5a2   :  { %7679 = vmatpush2.bf16.msra.mxu1 %v9608_v58 }
 0x5a3   :  { %7680 = vmatprep.subr.bf16.mxu1 %v9613_v19 }
 0x5a6   :  { %7681 = vmatpush2.bf16.msra.mxu1 %v9611_v16 }
 0x5a7   :  { %7682 = vmatprep.subr.bf16.mxu1 %v9616_v45  ;;  %v9629_v45 = vld [vmem:[%s13083_s0 + $0x18] sm:$0xff] }
 0x5aa   :  { %7683 = vmatpush2.bf16.msra.mxu1 %v9614_v13 }
 0x5ab   :  { %7684 = vmatprep.subr.bf16.mxu1 %v9619_v44 }
 0x5ae   :  { %7685 = vmatpush2.bf16.msra.mxu1 %v9617_v34 }
 0x5b1   :  { %7687 = vmatmul.mubr.bf16.vlgmr.msra.gmra.mxu1 %v12922_v8 }
 0x5f1   :  { %v7559_v27 = vpop.f32.mrf.mxu0 }
 0x5f3   :  { %v7561_v5 = vpop.f32.mrf.mxu0 }
 0x5f5   :  { %v7563_v25 = vpop.f32.mrf.mxu0 }
 0x5f7   :  { %v7565_v54 = vpop.f32.mrf.mxu0 }
 0x631   :  { %v7602_v46 = vpop.f32.mrf.mxu1  ;;  %v7645_v40 = vpop.f32.mrf.mxu0 }
 0x632   :  { %v7603_v20 = vadd.f32 %v7602_v46, %v7559_v27 }
 0x633   :  { %v7604_v48 = vpop.f32.mrf.mxu1  ;;  %v7647_v3 = vpop.f32.mrf.mxu0 }
 0x634   :  { %v7605_v53 = vadd.f32 %v7604_v48, %v7561_v5  ;;  %v7697_v60 = vadd.f32 %v7603_v20, %v12673_v42  ;;  %v9630_v48 = vld [vmem:[%s13083_s0 + $0x30] sm:$0xff] }
 0x635   :  { %v7606_v49 = vpop.f32.mrf.mxu1  ;;  %v7649_v42 = vpop.f32.mrf.mxu0 }
 0x636   :  { %v7698_v57 = vadd.f32 %v7605_v53, %v12682_v56  ;;  %v7607_v59 = vadd.f32 %v7606_v49, %v7563_v25  ;;  %v7727_v9 = vadd.f32 %v7710_v47, %v7697_v60  ;;  %v9631_v53 = vld [vmem:[%s13083_s0 + $0x38] sm:$0xff] }
 0x637   :  { %v7608_v52 = vpop.f32.mrf.mxu1  ;;  %v7651_v30 = vpop.f32.mrf.mxu0 }
 0x638   :  { %v7609_v63 = vadd.f32 %v7608_v52, %v7565_v54  ;;  %v7728_v4 = vadd.f32 %v7714_v11, %v7698_v57  ;;  %v7701_v8 = vadd.f32 %v7607_v59, %v12685_v12  ;;  %v7722_v12 = vrot.slane %v7705_v55, %v10699_v7  ;;  %v9627_v7 = vld [vmem:[%s13083_s0 + $0x20] sm:$0xff] }
 0x639   :  { %v13037_v24 = vadd.f32 %v9625_v38, %v7727_v9 }
 0x63a   :  { %v7702_v62 = vadd.f32 %v7609_v63, %v12694_v18  ;;  %v13030_v56 = vadd.f32 %v9624_v43, %v7728_v4  ;;  %v7731_v41 = vadd.f32 %v7710_v47, %v7701_v8 }
 0x63b   :  { %v7755_v10 = vmul.f32 %v13037_v24, %v13037_v24 }
 0x63c   :  { %v7732_v14 = vadd.f32 %v7714_v11, %v7702_v62  ;;  %v13048_v0 = vadd.f32 %v9627_v7, %v7731_v41  ;;  %v7743_v32 = vadd.f32 %v13030_v56, %v13037_v24  ;;  %v7756_v39 = vmul.f32 %v13030_v56, %v13030_v56 }
 0x63e   :  { %v13042_v22 = vadd.f32 %v9626_v2, %v7732_v14  ;;  %v7763_v34 = vadd.f32 %v7756_v39, %v7755_v10  ;;  %v7759_v27 = vmul.f32 %v13048_v0, %v13048_v0 }
 0x640   :  { %v7760_v58 = vmul.f32 %v13042_v22, %v13042_v22  ;;  %v7748_v46 = vadd.f32 %v13042_v22, %v13048_v0 }
 0x642   :  { %v7768_v55 = vadd.f32 %v7760_v58, %v7759_v27 }
 0x671   :  { %v7688_v15 = vpop.f32.mrf.mxu1 }
 0x672   :  { %v7689_v51 = vadd.f32 %v7688_v15, %v7645_v40 }
 0x673   :  { %v7690_v17 = vpop.f32.mrf.mxu1 }
 0x674   :  { %v7699_v18 = vadd.f32 %v7689_v51, %v12784_v50  ;;  %v7691_v21 = vadd.f32 %v7690_v17, %v7647_v3 }
 0x675   :  { %v7692_v26 = vpop.f32.mrf.mxu1 }
 0x676   :  { %v7729_v28 = vadd.f32 %v7718_v61, %v7699_v18  ;;  %v7700_v29 = vadd.f32 %v7691_v21, %v12790_v33  ;;  %v7693_v50 = vadd.f32 %v7692_v26, %v7649_v42  ;;  %v9628_v33 = vld [vmem:[%s13083_s0 + $0x10] sm:$0xff]  ;;  %s9654_s0 = smov [#allocation2]  }
 0x677   :  { %v7694_v31 = vpop.f32.mrf.mxu1  ;;  %s7814_s16 = sshll.u32 %s9654_s0, 4  ;;  %s7815_s16 = int_to_ptr.vmem [resolvable:$true] %s7814_s16 }
 0x678   :  { %v7730_v35 = vadd.f32 %v7722_v12, %v7700_v29  ;;  %v7703_v36 = vadd.f32 %v7693_v50, %v12796_v1  ;;  %v7695_v23 = vadd.f32 %v7694_v31, %v7651_v30  ;;  %v7737_v37 = vadd.f32 %v9628_v33, %v7729_v28  ;;  %s9632_s17 = scalar_lea.vmem %s7815_s16, 1024  ;;  %p9637_p1 = scmp.lt.s32.totalorder %s7815_s16, %s7815_s16 }
 0x679   :  { %p9633_p0 = scmp.ne.s32.totalorder %s7815_s16, %s9632_s17  ;;  %p9638_p2 = scmp.lt.s32.totalorder %s9632_s17, %s9632_s17 }
 0x67a   :  { %v7733_v19 = vadd.f32 %v7718_v61, %v7703_v36  ;;  %v7704_v16 = vadd.f32 %v7695_v23, %v12802_v6  ;;  %v7738_v1 = vadd.f32 %v9629_v45, %v7730_v35  ;;  %v7744_v13 = vadd.f32 %v7743_v32, %v7737_v37 }
 0x67b   :  { %v7757_v44 = vmul.f32 %v7737_v37, %v7737_v37  ;;  %p9639_p3 = por %p9638_p2, %p9637_p1 }
 0x67c   :  { %v7741_v5 = vadd.f32 %v9630_v48, %v7733_v19  ;;  %v7734_v6 = vadd.f32 %v7722_v12, %v7704_v16  ;;  %v7745_v49 = vadd.f32 %v7744_v13, %v7738_v1  ;;  %v7758_v25 = vmul.f32 %v7738_v1, %v7738_v1 }
 0x67d   :  { %v7764_v52 = vadd.f32 %v7763_v34, %v7757_v44  ;;  %p9640_p4 = pnand %p9639_p3, %p9633_p0 }
 0x67e   :  { %7746 = vadd.xlane.f32.xlu0 %v7745_v49  ;;  %v7742_v54 = vadd.f32 %v9631_v53, %v7734_v6  ;;  %v7749_v20 = vadd.f32 %v7748_v46, %v7741_v5  ;;  %v7761_v63 = vmul.f32 %v7741_v5, %v7741_v5 }
 0x67f   :  { %v7765_v40 = vadd.f32 %v7764_v52, %v7758_v25 }
 0x680   :  { %v7750_v57 = vadd.f32 %v7749_v20, %v7742_v54  ;;  %v7762_v11 = vmul.f32 %v7742_v54, %v7742_v54  ;;  %v7769_v59 = vadd.f32 %v7768_v55, %v7761_v63 }
 0x681   :  { %7766 = vadd.xlane.f32.xlu1 %v7765_v40 }
 0x682   :  { %7751 = vadd.xlane.f32.xlu0 %v7750_v57  ;;  %v7770_v60 = vadd.f32 %v7769_v59, %v7762_v11 }
 0x685   :  { %7771 = vadd.xlane.f32.xlu1 %v7770_v60 }
 0x707   :  { %v7747_v47 = vpop.xlane.xlu0 %7746 }
 0x708   :  { %v7753_v62 = vmul.f32 0.001953125, %v7747_v47 }
 0x70a   :  { %v7767_v3 = vpop.xlane.xlu1 %7766  ;;  %v7775_v8 = vmul.f32 %v7753_v62, %v7753_v62  ;;  %v7781_v12 = vsub.f32 %v13037_v24, %v7753_v62  ;;  %v7782_v38 = vsub.f32 %v13030_v56, %v7753_v62  ;;  %v7783_v2 = vsub.f32 %v7737_v37, %v7753_v62 }
 0x70b   :  { %v7773_v4 = vmul.f32 0.001953125, %v7767_v3  ;;  %v7752_v9 = vpop.xlane.xlu0 %7751  ;;  %v7784_v26 = vsub.f32 %v7738_v1, %v7753_v62 }
 0x70c   :  { %v7754_v14 = vmul.f32 0.001953125, %v7752_v9 }
 0x70d   :  { %v7777_v15 = vsub.f32 %v7773_v4, %v7775_v8 }
 0x70e   :  { %v7772_v51 = vpop.xlane.xlu1 %7771  ;;  %v7776_v42 = vmul.f32 %v7754_v14, %v7754_v14  ;;  %v7785_v31 = vsub.f32 %v13048_v0, %v7754_v14  ;;  %v7786_v32 = vsub.f32 %v13042_v22, %v7754_v14  ;;  %v7787_v39 = vsub.f32 %v7741_v5, %v7754_v14 }
 0x70f   :  { %v7779_v61 = vmax.f32 %v7777_v15, 0.0  ;;  %v7774_v43 = vmul.f32 0.001953125, %v7772_v51  ;;  %v7788_v35 = vsub.f32 %v7742_v54, %v7754_v14 }
 0x711   :  { %v7789_v41 = vadd.f32 1e-05, %v7779_v61  ;;  %v7778_v17 = vsub.f32 %v7774_v43, %v7776_v42 }
 0x713   :  { %9620 = vrsqrt.f32 %v7789_v41  ;;  %v7780_v18 = vmax.f32 %v7778_v17, 0.0 }
 0x715   :  { %v7790_v21 = vadd.f32 1e-05, %v7780_v18 }
 0x717   :  { %9622 = vrsqrt.f32 %v7790_v21 }
 0x720   :  { %v9621_v28 = vpop.eup %9620 }
 0x721   :  { %v7793_v29 = vmul.f32 %v9621_v28, %v7781_v12  ;;  %v7794_v50 = vmul.f32 %v9621_v28, %v7782_v38  ;;  %v7795_v7 = vmul.f32 %v9621_v28, %v7783_v2  ;;  %v7796_v30 = vmul.f32 %v9621_v28, %v7784_v26 }
 0x723   :  { %7801 = vst [vmem:[#allocation2] sm:$0xff] %v7793_v29  ;;  %7802 = vst [vmem:[#allocation2 + $0x8] sm:$0xff] %v7794_v50 }
 0x724   :  { %7803 = vst [vmem:[#allocation2 + $0x10] sm:$0xff] %v7795_v7  ;;  %7804 = vst [vmem:[#allocation2 + $0x18] sm:$0xff] %v7796_v30  ;;  %v9623_v56 = vpop.eup %9622 }
 0x725   :  { %v7797_v24 = vmul.f32 %v9623_v56, %v7785_v31  ;;  %v7798_v36 = vmul.f32 %v9623_v56, %v7786_v32  ;;  %v7799_v23 = vmul.f32 %v9623_v56, %v7787_v39  ;;  %v7800_v33 = vmul.f32 %v9623_v56, %v7788_v35 }
 0x727   :  { %7805 = vst [vmem:[#allocation2 + $0x20] sm:$0xff] %v7797_v24  ;;  %7806 = vst [vmem:[#allocation2 + $0x28] sm:$0xff] %v7798_v36 }
 0x728   :  { %7807 = vst [vmem:[#allocation2 + $0x30] sm:$0xff] %v7799_v23  ;;  %7808 = vst [vmem:[#allocation2 + $0x38] sm:$0xff] %v7800_v33 }
 0x729   :  { %9643 = shalt.err (!%p9640_p4)
}
 0x72a   :  { %s9655_s18 = smov 512   ;;  %s9656_s19 = smov 32  }
 0x72b   :  { %7820 = dma.vmem_to_hbm [thread:$0]  %s7815_s16, 1024, %s13088_s5, [#allocation3], %s9655_s18, %s9655_s18, %s9656_s19  }
 0x72c   :  { %9652 = dma.done.wait [#allocation3], 1024  }
 0x72d   :  { %9653 = vsyncadd [#allocation3], 4294966272 }
 0x72e   :  { %7824 = vsyncpa [#allocation3], 1 }

</bundles_post_ra>
